<compile_context>
chip_gen: v7x
topology: tpu7x:2x2x1
jax: 0.10.0
libtpu: 0.0.40
codegen_flags: <defaults>
</compile_context>

<pallas_src>
import functools

import jax
import jax.numpy as jnp
from jax.experimental import pallas as pl
from jax.experimental.pallas import tpu as pltpu

EPS = 1e-5     # PyTorch BatchNorm2d default eps
LANE = 128     # TPU lane width; channel dims padded to a multiple of this


# ---------------------------------------------------------------------------
# Pallas kernels
# ---------------------------------------------------------------------------
def _conv3x3_bn_relu_kernel(xs_ref, w_ref, b_ref, o_ref, acc_ref, *, taps, Ho, Wo):
    """conv1 (3x3, any stride via space-to-depth taps) + folded BN + ReLU.

    Writes the (Ho+2, Wo+2) output tile including a zero spatial halo so the
    next conv can consume it directly.
    """
    cin = xs_ref.shape[-1]
    acc_ref[...] = jnp.zeros_like(acc_ref)
    for k, (ph, ro, co) in enumerate(taps):                     # 9 taps, unrolled
        patch = xs_ref[ph, ro:ro + Ho, co:co + Wo, :].reshape(Ho * Wo, cin)
        acc_ref[...] += jnp.dot(patch, w_ref[k],
                                preferred_element_type=jnp.float32)
    y = jnp.maximum(acc_ref[...] + b_ref[...], 0.0)
    o_ref[...] = jnp.zeros_like(o_ref)                          # zero halo ring
    o_ref[0, 1:1 + Ho, 1:1 + Wo, :] = y.reshape(Ho, Wo, -1).astype(o_ref.dtype)


def _conv3x3_bn_shortcut_relu_kernel(y1_ref, w_ref, b_ref, xs_ref, *rest,
                                     Ho, Wo, sc_phase, sc_off, proj):
    """conv2 (3x3, stride 1) + folded BN + (identity | 1x1 projection) shortcut
    + ReLU, fused."""
    if proj:
        wsc_ref, bsc_ref, o_ref, acc_ref = rest
    else:
        o_ref, acc_ref = rest

    cin = y1_ref.shape[-1]
    acc_ref[...] = jnp.zeros_like(acc_ref)
    for k in range(9):                                          # unrolled taps
        kh, kw = divmod(k, 3)
        patch = y1_ref[0, kh:kh + Ho, kw:kw + Wo, :].reshape(Ho * Wo, cin)
        acc_ref[...] += jnp.dot(patch, w_ref[k],
                                preferred_element_type=jnp.float32)
    y2 = acc_ref[...] + b_ref[...]

    # shortcut input = x[:, ::s, ::s, :] read straight out of the s2d layout
    xsc = xs_ref[sc_phase, sc_off:sc_off + Ho, sc_off:sc_off + Wo, :]
    xsc = xsc.reshape(Ho * Wo, xsc.shape[-1])
    if proj:
        sc = jnp.dot(xsc, wsc_ref[...],
                     preferred_element_type=jnp.float32) + bsc_ref[...]
    else:
        sc = xsc.astype(jnp.float32)                            # identity: plain add

    out = jnp.maximum(y2 + sc, 0.0)
    o_ref[...] = out.reshape(1, Ho, Wo, -1).astype(o_ref.dtype)


# ---------------------------------------------------------------------------
# pallas_call wrappers
# ---------------------------------------------------------------------------
_COMPILER_PARAMS = pltpu.CompilerParams(
    dimension_semantics=("parallel",),
    vmem_limit_bytes=32 * 1024 * 1024,
)


def _conv1_call(xs, w, b, *, stride, Ho, Wo):
    ss = stride * stride
    n_img = xs.shape[0] // ss
    hs, ws, cin = xs.shape[1], xs.shape[2], xs.shape[3]
    cop = w.shape[2]
    taps = tuple(((kh % stride) * stride + (kw % stride), kh // stride, kw // stride)
                 for kh in range(3) for kw in range(3))
    kernel = functools.partial(_conv3x3_bn_relu_kernel, taps=taps, Ho=Ho, Wo=Wo)

    flops = 2 * n_img * Ho * Wo * 9 * cin * cop
    bytes_accessed = (xs.size * 2 + w.size * 2 + b.size * 4
                      + n_img * (Ho + 2) * (Wo + 2) * cop * 2)
    return pl.pallas_call(
        kernel,
        out_shape=jax.ShapeDtypeStruct((n_img, Ho + 2, Wo + 2, cop), jnp.bfloat16),
        grid_spec=pltpu.PrefetchScalarGridSpec(
            num_scalar_prefetch=0,
            grid=(n_img,),
            in_specs=[
                pl.BlockSpec((ss, hs, ws, cin), lambda n: (n, 0, 0, 0)),
                pl.BlockSpec((9, cin, cop), lambda n: (0, 0, 0)),
                pl.BlockSpec((1, cop), lambda n: (0, 0)),
            ],
            out_specs=pl.BlockSpec((1, Ho + 2, Wo + 2, cop), lambda n: (n, 0, 0, 0)),
            scratch_shapes=[pltpu.VMEM((Ho * Wo, cop), jnp.float32)],
        ),
        compiler_params=_COMPILER_PARAMS,
        cost_estimate=pl.CostEstimate(flops=flops, transcendentals=0,
                                      bytes_accessed=bytes_accessed),
    )(xs, w, b)


def _conv2_shortcut_call(y1p, w2, b2, xs, wsc, bsc, *, stride, Ho, Wo,
                         sc_phase, sc_off):
    n_img = y1p.shape[0]
    ss = stride * stride
    hs, ws, cinp = xs.shape[1], xs.shape[2], xs.shape[3]
    cip, cop = w2.shape[1], w2.shape[2]
    proj = wsc is not None

    kernel = functools.partial(_conv3x3_bn_shortcut_relu_kernel,
                               Ho=Ho, Wo=Wo, sc_phase=sc_phase, sc_off=sc_off,
                               proj=proj)
    in_specs = [
        pl.BlockSpec((1, Ho + 2, Wo + 2, cip), lambda n: (n, 0, 0, 0)),
        pl.BlockSpec((9, cip, cop), lambda n: (0, 0, 0)),
        pl.BlockSpec((1, cop), lambda n: (0, 0)),
        pl.BlockSpec((ss, hs, ws, cinp), lambda n: (n, 0, 0, 0)),
    ]
    args = [y1p, w2, b2, xs]
    flops = 2 * n_img * Ho * Wo * 9 * cip * cop
    bytes_accessed = (y1p.size * 2 + w2.size * 2 + b2.size * 4 + xs.size * 2
                      + n_img * Ho * Wo * cop * 4)
    if proj:
        in_specs += [pl.BlockSpec((cinp, cop), lambda n: (0, 0)),
                     pl.BlockSpec((1, cop), lambda n: (0, 0))]
        args += [wsc, bsc]
        flops += 2 * n_img * Ho * Wo * cinp * cop
        bytes_accessed += wsc.size * 2 + bsc.size * 4

    return pl.pallas_call(
        kernel,
        out_shape=jax.ShapeDtypeStruct((n_img, Ho, Wo, cop), jnp.float32),
        grid_spec=pltpu.PrefetchScalarGridSpec(
            num_scalar_prefetch=0,
            grid=(n_img,),
            in_specs=in_specs,
            out_specs=pl.BlockSpec((1, Ho, Wo, cop), lambda n: (n, 0, 0, 0)),
            scratch_shapes=[pltpu.VMEM((Ho * Wo, cop), jnp.float32)],
        ),
        compiler_params=_COMPILER_PARAMS,
        cost_estimate=pl.CostEstimate(flops=flops, transcendentals=0,
                                      bytes_accessed=bytes_accessed),
    )(*args)


# ---------------------------------------------------------------------------
# Glue: BN folding, weight prep, space-to-depth, forward
# ---------------------------------------------------------------------------
def _round_up(x, m):
    return (x + m - 1) // m * m


def _fold_bn(gamma, beta, mean, var):
    scale = gamma / jnp.sqrt(var + EPS)
    shift = beta - mean * scale
    return scale, shift


def _prep_w3x3(w_oihw, bn_scale, cin_pad, cout_pad):
    co, ci = w_oihw.shape[0], w_oihw.shape[1]
    w = jnp.transpose(w_oihw, (2, 3, 1, 0)).reshape(9, ci, co)   # tap-major (kh*3+kw)
    w = w * bn_scale[None, None, :]                              # fold BN scale
    w = jnp.pad(w, ((0, 0), (0, cin_pad - ci), (0, cout_pad - co)))
    return w.astype(jnp.bfloat16)


def _prep_shift(shift, cout_pad):
    return (jnp.pad(shift, (0, cout_pad - shift.shape[0]))
            .reshape(1, cout_pad).astype(jnp.float32))


def _space_to_depth(xpad, s):
    # (N, Hp, Wp, C) -> (N*s*s, Hp//s, Wp//s, C), phase-major, so every 3x3 tap
    # of a stride-s conv becomes a dense static slice inside the kernel.
    n, hp, wp, c = xpad.shape
    ph, pw = (-hp) % s, (-wp) % s
    if ph or pw:
        xpad = jnp.pad(xpad, ((0, 0), (0, ph), (0, pw), (0, 0)))
        hp, wp = hp + ph, wp + pw
    x = xpad.reshape(n, hp // s, s, wp // s, s, c)
    x = jnp.transpose(x, (0, 2, 4, 1, 3, 5))
    return x.reshape(n * s * s, hp // s, wp // s, c)


def basic_block_forward(x_nchw, params, stride):
    """Pallas-backed BasicBlock forward (NCHW in, NCHW out, eval-mode BN)."""
    x = jnp.transpose(x_nchw, (0, 2, 3, 1)).astype(jnp.float32)   # NHWC
    n, h, w, cin = x.shape
    planes = params["w1"].shape[0]
    cinp = _round_up(cin, LANE)
    cop = _round_up(planes, LANE)
    s = stride
    ho = (h - 1) // s + 1
    wo = (w - 1) // s + 1

    # halo pad + channel pad + bf16 + space-to-depth (handles conv stride)
    xp = jnp.pad(x, ((0, 0), (1, 1), (1, 1), (0, cinp - cin))).astype(jnp.bfloat16)
    xs = _space_to_depth(xp, s)

    # --- conv1 + bn1 + relu  -> bf16 feature map carrying its own zero halo --
    sc1, sh1 = _fold_bn(params["bn1_gamma"], params["bn1_beta"],
                        params["bn1_mean"], params["bn1_var"])
    w1 = _prep_w3x3(params["w1"], sc1, cinp, cop)
    b1 = _prep_shift(sh1, cop)
    y1p = _conv1_call(xs, w1, b1, stride=s, Ho=ho, Wo=wo)

    # --- conv2 + bn2 + shortcut + relu ---------------------------------------
    sc2, sh2 = _fold_bn(params["bn2_gamma"], params["bn2_beta"],
                        params["bn2_mean"], params["bn2_var"])
    w2 = _prep_w3x3(params["w2"], sc2, cop, cop)
    b2 = _prep_shift(sh2, cop)

    sc_phase = (1 % s) * s + (1 % s)      # location of x[:, ::s, ::s] inside xs
    sc_off = 1 // s
    if params["w_sc"] is None:
        wsc = bsc = None                  # identity shortcut: plain add in-kernel
    else:
        scs, shs = _fold_bn(params["bnsc_gamma"], params["bnsc_beta"],
                            params["bnsc_mean"], params["bnsc_var"])
        wsc = jnp.transpose(params["w_sc"][:, :, 0, 0], (1, 0)) * scs[None, :]
        wsc = jnp.pad(wsc, ((0, cinp - cin), (0, cop - planes))).astype(jnp.bfloat16)
        bsc = _prep_shift(shs, cop)

    out = _conv2_shortcut_call(y1p, w2, b2, xs, wsc, bsc,
                               stride=s, Ho=ho, Wo=wo,
                               sc_phase=sc_phase, sc_off=sc_off)
    out = out[..., :planes]                                   # drop channel pad
    return jnp.transpose(out, (0, 3, 1, 2))                   # back to NCHW


# ---------------------------------------------------------------------------
# Parameter init + pure-JAX reference (for correctness check)
# ---------------------------------------------------------------------------
def init_params(key, in_planes, planes, stride):
    ks = jax.random.split(key, 15)
    p = {
        "w1": 0.1 * jax.random.normal(ks[0], (planes, in_planes, 3, 3), jnp.float32),
        "bn1_gamma": 1.0 + 0.1 * jax.random.normal(ks[1], (planes,), jnp.float32),
        "bn1_beta": 0.1 * jax.random.normal(ks[2], (planes,), jnp.float32),
        "bn1_mean": 0.1 * jax.random.normal(ks[3], (planes,), jnp.float32),
        "bn1_var": 1.0 + 0.1 * jnp.abs(jax.random.normal(ks[4], (planes,), jnp.float32)),
        "w2": 0.1 * jax.random.normal(ks[5], (planes, planes, 3, 3), jnp.float32),
        "bn2_gamma": 1.0 + 0.1 * jax.random.normal(ks[6], (planes,), jnp.float32),
        "bn2_beta": 0.1 * jax.random.normal(ks[7], (planes,), jnp.float32),
        "bn2_mean": 0.1 * jax.random.normal(ks[8], (planes,), jnp.float32),
        "bn2_var": 1.0 + 0.1 * jnp.abs(jax.random.normal(ks[9], (planes,), jnp.float32)),
        "w_sc": None,
    }
    if stride != 1 or in_planes != planes:
        p["w_sc"] = 0.1 * jax.random.normal(ks[10], (planes, in_planes, 1, 1), jnp.float32)
        p["bnsc_gamma"] = 1.0 + 0.1 * jax.random.normal(ks[11], (planes,), jnp.float32)
        p["bnsc_beta"] = 0.1 * jax.random.normal(ks[12], (planes,), jnp.float32)
        p["bnsc_mean"] = 0.1 * jax.random.normal(ks[13], (planes,), jnp.float32)
        p["bnsc_var"] = 1.0 + 0.1 * jnp.abs(jax.random.normal(ks[14], (planes,), jnp.float32))
    return p


def reference_basic_block(x, params, stride):
    def conv(x, w, s, pad):
        return jax.lax.conv_general_dilated(
            x, w, (s, s), [(pad, pad), (pad, pad)],
            dimension_numbers=("NCHW", "OIHW", "NCHW"))

    def bn(y, g, b, m, v):
        g, b, m, v = (t[None, :, None, None] for t in (g, b, m, v))
        return (y - m) / jnp.sqrt(v + EPS) * g + b

    out = jax.nn.relu(bn(conv(x, params["w1"], stride, 1),
                         params["bn1_gamma"], params["bn1_beta"],
                         params["bn1_mean"], params["bn1_var"]))
    out = bn(conv(out, params["w2"], 1, 1),
             params["bn2_gamma"], params["bn2_beta"],
             params["bn2_mean"], params["bn2_var"])
    if params["w_sc"] is None:
        sc = x
    else:
        sc = bn(conv(x, params["w_sc"], stride, 0),
                params["bnsc_gamma"], params["bnsc_beta"],
                params["bnsc_mean"], params["bnsc_var"])
    return jax.nn.relu(out + sc)


# ---------------------------------------------------------------------------
if __name__ == "__main__":
    key = jax.random.PRNGKey(0)
    kx, kp1, kp2 = jax.random.split(key, 3)

    # Config A: identity shortcut (in_planes == planes, stride == 1)
    x_a = jax.random.normal(kx, (2, 4, 16, 16), jnp.float32)
    params_a = init_params(kp1, in_planes=4, planes=4, stride=1)
    out_a = jax.block_until_ready(basic_block_forward(x_a, params_a, stride=1))
    ref_a = reference_basic_block(x_a, params_a, 1)
    assert out_a.shape == (2, 4, 16, 16)
    # bf16 MXU operands (f32 accumulate) -> loosened tolerance vs f32 reference
    assert jnp.allclose(out_a, ref_a, rtol=5e-2, atol=5e-2), "config A mismatch"

    # Config B: projection shortcut (stride 2, channel change)
    params_b = init_params(kp2, in_planes=4, planes=8, stride=2)
    out_b = jax.block_until_ready(basic_block_forward(x_a, params_b, stride=2))
    ref_b = reference_basic_block(x_a, params_b, 2)
    assert out_b.shape == (2, 8, 8, 8)
    assert jnp.allclose(out_b, ref_b, rtol=5e-2, atol=5e-2), "config B mismatch"

    print("KERNEL_OK")
</pallas_src>

<mosaic_0001>
module attributes {stable_mosaic.version = 11 : i64} {
  func.func @_conv3x3_bn_relu_kernel(%arg0: i32, %arg1: memref<1x18x18x128xbf16, #tpu.memory_space<vmem>>, %arg2: memref<9x128x128xbf16, #tpu.memory_space<vmem>>, %arg3: memref<1x128xf32, #tpu.memory_space<vmem>>, %arg4: memref<1x18x18x128xbf16, #tpu.memory_space<vmem>>, %arg5: memref<256x128xf32, #tpu.memory_space<vmem>>) attributes {dimension_semantics = [#tpu.dimension_semantics<parallel>], iteration_bounds = array<i64: 2>, scalar_prefetch = 0 : i64, scratch_operands = 1 : i64, tpu.core_type = #tpu.core_type<tc>, window_params = [{transform_indices = @transform_0, window_bounds = array<i64: 1, 18, 18, 128>}, {pipeline_mode = #tpu.pipeline_mode<synchronous>, transform_indices = @transform_1, window_bounds = array<i64: 9, 128, 128>}, {pipeline_mode = #tpu.pipeline_mode<synchronous>, transform_indices = @transform_2, window_bounds = array<i64: 1, 128>}, {transform_indices = @transform_3, window_bounds = array<i64: 1, 18, 18, 128>}]} {
    %cst = arith.constant 0.000000e+00 : f32
    %0 = vector.broadcast %cst : f32 to vector<256x128xf32>
    %c0 = arith.constant 0 : index
    %c0_0 = arith.constant 0 : index
    %1 = vector.load %arg5[%c0, %c0_0] : memref<256x128xf32, #tpu.memory_space<vmem>>, vector<256x128xf32>
    tpu.vector_store %arg5[%c0, %c0_0], %0 {strides = array<i32>} : memref<256x128xf32, #tpu.memory_space<vmem>>, vector<256x128xf32>,
    %c0_1 = arith.constant 0 : index
    %c0_2 = arith.constant 0 : index
    %c0_3 = arith.constant 0 : index
    %c0_4 = arith.constant 0 : index
    %2 = vector.load %arg1[%c0_1, %c0_2, %c0_3, %c0_4] : memref<1x18x18x128xbf16, #tpu.memory_space<vmem>>, vector<1x16x16x128xbf16>
    %3 = vector.shape_cast %2 : vector<1x16x16x128xbf16> to vector<16x16x128xbf16>
    %4 = vector.shape_cast %3 : vector<16x16x128xbf16> to vector<256x128xbf16>
    %c0_5 = arith.constant 0 : index
    %c0_6 = arith.constant 0 : index
    %5 = vector.load %arg5[%c0_5, %c0_6] : memref<256x128xf32, #tpu.memory_space<vmem>>, vector<256x128xf32>
    %c0_7 = arith.constant 0 : index
    %c0_8 = arith.constant 0 : index
    %c0_9 = arith.constant 0 : index
    %6 = vector.load %arg2[%c0_7, %c0_8, %c0_9] : memref<9x128x128xbf16, #tpu.memory_space<vmem>>, vector<1x128x128xbf16>
    %7 = vector.shape_cast %6 : vector<1x128x128xbf16> to vector<128x128xbf16>
    %cst_10 = arith.constant dense<0.000000e+00> : vector<256x128xf32>
    %8 = tpu.matmul %4, %7, %cst_10 {dimension_numbers = #tpu.dot_dimension_numbers<[1], [0], [0], [1], [0, 0, 1, 1], [], []>} : vector<256x128xbf16>, vector<128x128xbf16>, vector<256x128xf32> -> vector<256x128xf32>
    %9 = arith.addf %5, %8 : vector<256x128xf32>
    %c0_11 = arith.constant 0 : index
    %c0_12 = arith.constant 0 : index
    %10 = vector.load %arg5[%c0_11, %c0_12] : memref<256x128xf32, #tpu.memory_space<vmem>>, vector<256x128xf32>
    tpu.vector_store %arg5[%c0_11, %c0_12], %9 {strides = array<i32>} : memref<256x128xf32, #tpu.memory_space<vmem>>, vector<256x128xf32>,
    %c0_13 = arith.constant 0 : index
    %c0_14 = arith.constant 0 : index
    %c1 = arith.constant 1 : index
    %c0_15 = arith.constant 0 : index
    %11 = vector.load %arg1[%c0_13, %c0_14, %c1, %c0_15] : memref<1x18x18x128xbf16, #tpu.memory_space<vmem>>, vector<1x16x16x128xbf16>
    %12 = vector.shape_cast %11 : vector<1x16x16x128xbf16> to vector<16x16x128xbf16>
    %13 = vector.shape_cast %12 : vector<16x16x128xbf16> to vector<256x128xbf16>
    %c0_16 = arith.constant 0 : index
    %c0_17 = arith.constant 0 : index
    %14 = vector.load %arg5[%c0_16, %c0_17] : memref<256x128xf32, #tpu.memory_space<vmem>>, vector<256x128xf32>
    %c1_18 = arith.constant 1 : index
    %c0_19 = arith.constant 0 : index
    %c0_20 = arith.constant 0 : index
    %15 = vector.load %arg2[%c1_18, %c0_19, %c0_20] : memref<9x128x128xbf16, #tpu.memory_space<vmem>>, vector<1x128x128xbf16>
    %16 = vector.shape_cast %15 : vector<1x128x128xbf16> to vector<128x128xbf16>
    %cst_21 = arith.constant dense<0.000000e+00> : vector<256x128xf32>
    %17 = tpu.matmul %13, %16, %cst_21 {dimension_numbers = #tpu.dot_dimension_numbers<[1], [0], [0], [1], [0, 0, 1, 1], [], []>} : vector<256x128xbf16>, vector<128x128xbf16>, vector<256x128xf32> -> vector<256x128xf32>
    %18 = arith.addf %14, %17 : vector<256x128xf32>
    %c0_22 = arith.constant 0 : index
    %c0_23 = arith.constant 0 : index
    %19 = vector.load %arg5[%c0_22, %c0_23] : memref<256x128xf32, #tpu.memory_space<vmem>>, vector<256x128xf32>
    tpu.vector_store %arg5[%c0_22, %c0_23], %18 {strides = array<i32>} : memref<256x128xf32, #tpu.memory_space<vmem>>, vector<256x128xf32>,
    %c0_24 = arith.constant 0 : index
    %c0_25 = arith.constant 0 : index
    %c2 = arith.constant 2 : index
    %c0_26 = arith.constant 0 : index
    %20 = vector.load %arg1[%c0_24, %c0_25, %c2, %c0_26] : memref<1x18x18x128xbf16, #tpu.memory_space<vmem>>, vector<1x16x16x128xbf16>
    %21 = vector.shape_cast %20 : vector<1x16x16x128xbf16> to vector<16x16x128xbf16>
    %22 = vector.shape_cast %21 : vector<16x16x128xbf16> to vector<256x128xbf16>
    %c0_27 = arith.constant 0 : index
    %c0_28 = arith.constant 0 : index
    %23 = vector.load %arg5[%c0_27, %c0_28] : memref<256x128xf32, #tpu.memory_space<vmem>>, vector<256x128xf32>
    %c2_29 = arith.constant 2 : index
    %c0_30 = arith.constant 0 : index
    %c0_31 = arith.constant 0 : index
    %24 = vector.load %arg2[%c2_29, %c0_30, %c0_31] : memref<9x128x128xbf16, #tpu.memory_space<vmem>>, vector<1x128x128xbf16>
    %25 = vector.shape_cast %24 : vector<1x128x128xbf16> to vector<128x128xbf16>
    %cst_32 = arith.constant dense<0.000000e+00> : vector<256x128xf32>
    %26 = tpu.matmul %22, %25, %cst_32 {dimension_numbers = #tpu.dot_dimension_numbers<[1], [0], [0], [1], [0, 0, 1, 1], [], []>} : vector<256x128xbf16>, vector<128x128xbf16>, vector<256x128xf32> -> vector<256x128xf32>
    %27 = arith.addf %23, %26 : vector<256x128xf32>
    %c0_33 = arith.constant 0 : index
    %c0_34 = arith.constant 0 : index
    %28 = vector.load %arg5[%c0_33, %c0_34] : memref<256x128xf32, #tpu.memory_space<vmem>>, vector<256x128xf32>
    tpu.vector_store %arg5[%c0_33, %c0_34], %27 {strides = array<i32>} : memref<256x128xf32, #tpu.memory_space<vmem>>, vector<256x128xf32>,
    %c0_35 = arith.constant 0 : index
    %c1_36 = arith.constant 1 : index
    %c0_37 = arith.constant 0 : index
    %c0_38 = arith.constant 0 : index
    %29 = vector.load %arg1[%c0_35, %c1_36, %c0_37, %c0_38] : memref<1x18x18x128xbf16, #tpu.memory_space<vmem>>, vector<1x16x16x128xbf16>
    %30 = vector.shape_cast %29 : vector<1x16x16x128xbf16> to vector<16x16x128xbf16>
    %31 = vector.shape_cast %30 : vector<16x16x128xbf16> to vector<256x128xbf16>
    %c0_39 = arith.constant 0 : index
    %c0_40 = arith.constant 0 : index
    %32 = vector.load %arg5[%c0_39, %c0_40] : memref<256x128xf32, #tpu.memory_space<vmem>>, vector<256x128xf32>
    %c3 = arith.constant 3 : index
    %c0_41 = arith.constant 0 : index
    %c0_42 = arith.constant 0 : index
    %33 = vector.load %arg2[%c3, %c0_41, %c0_42] : memref<9x128x128xbf16, #tpu.memory_space<vmem>>, vector<1x128x128xbf16>
    %34 = vector.shape_cast %33 : vector<1x128x128xbf16> to vector<128x128xbf16>
    %cst_43 = arith.constant dense<0.000000e+00> : vector<256x128xf32>
    %35 = tpu.matmul %31, %34, %cst_43 {dimension_numbers = #tpu.dot_dimension_numbers<[1], [0], [0], [1], [0, 0, 1, 1], [], []>} : vector<256x128xbf16>, vector<128x128xbf16>, vector<256x128xf32> -> vector<256x128xf32>
    %36 = arith.addf %32, %35 : vector<256x128xf32>
    %c0_44 = arith.constant 0 : index
    %c0_45 = arith.constant 0 : index
    %37 = vector.load %arg5[%c0_44, %c0_45] : memref<256x128xf32, #tpu.memory_space<vmem>>, vector<256x128xf32>
    tpu.vector_store %arg5[%c0_44, %c0_45], %36 {strides = array<i32>} : memref<256x128xf32, #tpu.memory_space<vmem>>, vector<256x128xf32>,
    %c0_46 = arith.constant 0 : index
    %c1_47 = arith.constant 1 : index
    %c1_48 = arith.constant 1 : index
    %c0_49 = arith.constant 0 : index
    %38 = vector.load %arg1[%c0_46, %c1_47, %c1_48, %c0_49] : memref<1x18x18x128xbf16, #tpu.memory_space<vmem>>, vector<1x16x16x128xbf16>
    %39 = vector.shape_cast %38 : vector<1x16x16x128xbf16> to vector<16x16x128xbf16>
    %40 = vector.shape_cast %39 : vector<16x16x128xbf16> to vector<256x128xbf16>
    %c0_50 = arith.constant 0 : index
    %c0_51 = arith.constant 0 : index
    %41 = vector.load %arg5[%c0_50, %c0_51] : memref<256x128xf32, #tpu.memory_space<vmem>>, vector<256x128xf32>
    %c4 = arith.constant 4 : index
    %c0_52 = arith.constant 0 : index
    %c0_53 = arith.constant 0 : index
    %42 = vector.load %arg2[%c4, %c0_52, %c0_53] : memref<9x128x128xbf16, #tpu.memory_space<vmem>>, vector<1x128x128xbf16>
    %43 = vector.shape_cast %42 : vector<1x128x128xbf16> to vector<128x128xbf16>
    %cst_54 = arith.constant dense<0.000000e+00> : vector<256x128xf32>
    %44 = tpu.matmul %40, %43, %cst_54 {dimension_numbers = #tpu.dot_dimension_numbers<[1], [0], [0], [1], [0, 0, 1, 1], [], []>} : vector<256x128xbf16>, vector<128x128xbf16>, vector<256x128xf32> -> vector<256x128xf32>
    %45 = arith.addf %41, %44 : vector<256x128xf32>
    %c0_55 = arith.constant 0 : index
    %c0_56 = arith.constant 0 : index
    %46 = vector.load %arg5[%c0_55, %c0_56] : memref<256x128xf32, #tpu.memory_space<vmem>>, vector<256x128xf32>
    tpu.vector_store %arg5[%c0_55, %c0_56], %45 {strides = array<i32>} : memref<256x128xf32, #tpu.memory_space<vmem>>, vector<256x128xf32>,
    %c0_57 = arith.constant 0 : index
    %c1_58 = arith.constant 1 : index
    %c2_59 = arith.constant 2 : index
    %c0_60 = arith.constant 0 : index
    %47 = vector.load %arg1[%c0_57, %c1_58, %c2_59, %c0_60] : memref<1x18x18x128xbf16, #tpu.memory_space<vmem>>, vector<1x16x16x128xbf16>
    %48 = vector.shape_cast %47 : vector<1x16x16x128xbf16> to vector<16x16x128xbf16>
    %49 = vector.shape_cast %48 : vector<16x16x128xbf16> to vector<256x128xbf16>
    %c0_61 = arith.constant 0 : index
    %c0_62 = arith.constant 0 : index
    %50 = vector.load %arg5[%c0_61, %c0_62] : memref<256x128xf32, #tpu.memory_space<vmem>>, vector<256x128xf32>
    %c5 = arith.constant 5 : index
    %c0_63 = arith.constant 0 : index
    %c0_64 = arith.constant 0 : index
    %51 = vector.load %arg2[%c5, %c0_63, %c0_64] : memref<9x128x128xbf16, #tpu.memory_space<vmem>>, vector<1x128x128xbf16>
    %52 = vector.shape_cast %51 : vector<1x128x128xbf16> to vector<128x128xbf16>
    %cst_65 = arith.constant dense<0.000000e+00> : vector<256x128xf32>
    %53 = tpu.matmul %49, %52, %cst_65 {dimension_numbers = #tpu.dot_dimension_numbers<[1], [0], [0], [1], [0, 0, 1, 1], [], []>} : vector<256x128xbf16>, vector<128x128xbf16>, vector<256x128xf32> -> vector<256x128xf32>
    %54 = arith.addf %50, %53 : vector<256x128xf32>
    %c0_66 = arith.constant 0 : index
    %c0_67 = arith.constant 0 : index
    %55 = vector.load %arg5[%c0_66, %c0_67] : memref<256x128xf32, #tpu.memory_space<vmem>>, vector<256x128xf32>
    tpu.vector_store %arg5[%c0_66, %c0_67], %54 {strides = array<i32>} : memref<256x128xf32, #tpu.memory_space<vmem>>, vector<256x128xf32>,
    %c0_68 = arith.constant 0 : index
    %c2_69 = arith.constant 2 : index
    %c0_70 = arith.constant 0 : index
    %c0_71 = arith.constant 0 : index
    %56 = vector.load %arg1[%c0_68, %c2_69, %c0_70, %c0_71] : memref<1x18x18x128xbf16, #tpu.memory_space<vmem>>, vector<1x16x16x128xbf16>
    %57 = vector.shape_cast %56 : vector<1x16x16x128xbf16> to vector<16x16x128xbf16>
    %58 = vector.shape_cast %57 : vector<16x16x128xbf16> to vector<256x128xbf16>
    %c0_72 = arith.constant 0 : index
    %c0_73 = arith.constant 0 : index
    %59 = vector.load %arg5[%c0_72, %c0_73] : memref<256x128xf32, #tpu.memory_space<vmem>>, vector<256x128xf32>
    %c6 = arith.constant 6 : index
    %c0_74 = arith.constant 0 : index
    %c0_75 = arith.constant 0 : index
    %60 = vector.load %arg2[%c6, %c0_74, %c0_75] : memref<9x128x128xbf16, #tpu.memory_space<vmem>>, vector<1x128x128xbf16>
    %61 = vector.shape_cast %60 : vector<1x128x128xbf16> to vector<128x128xbf16>
    %cst_76 = arith.constant dense<0.000000e+00> : vector<256x128xf32>
    %62 = tpu.matmul %58, %61, %cst_76 {dimension_numbers = #tpu.dot_dimension_numbers<[1], [0], [0], [1], [0, 0, 1, 1], [], []>} : vector<256x128xbf16>, vector<128x128xbf16>, vector<256x128xf32> -> vector<256x128xf32>
    %63 = arith.addf %59, %62 : vector<256x128xf32>
    %c0_77 = arith.constant 0 : index
    %c0_78 = arith.constant 0 : index
    %64 = vector.load %arg5[%c0_77, %c0_78] : memref<256x128xf32, #tpu.memory_space<vmem>>, vector<256x128xf32>
    tpu.vector_store %arg5[%c0_77, %c0_78], %63 {strides = array<i32>} : memref<256x128xf32, #tpu.memory_space<vmem>>, vector<256x128xf32>,
    %c0_79 = arith.constant 0 : index
    %c2_80 = arith.constant 2 : index
    %c1_81 = arith.constant 1 : index
    %c0_82 = arith.constant 0 : index
    %65 = vector.load %arg1[%c0_79, %c2_80, %c1_81, %c0_82] : memref<1x18x18x128xbf16, #tpu.memory_space<vmem>>, vector<1x16x16x128xbf16>
    %66 = vector.shape_cast %65 : vector<1x16x16x128xbf16> to vector<16x16x128xbf16>
    %67 = vector.shape_cast %66 : vector<16x16x128xbf16> to vector<256x128xbf16>
    %c0_83 = arith.constant 0 : index
    %c0_84 = arith.constant 0 : index
    %68 = vector.load %arg5[%c0_83, %c0_84] : memref<256x128xf32, #tpu.memory_space<vmem>>, vector<256x128xf32>
    %c7 = arith.constant 7 : index
    %c0_85 = arith.constant 0 : index
    %c0_86 = arith.constant 0 : index
    %69 = vector.load %arg2[%c7, %c0_85, %c0_86] : memref<9x128x128xbf16, #tpu.memory_space<vmem>>, vector<1x128x128xbf16>
    %70 = vector.shape_cast %69 : vector<1x128x128xbf16> to vector<128x128xbf16>
    %cst_87 = arith.constant dense<0.000000e+00> : vector<256x128xf32>
    %71 = tpu.matmul %67, %70, %cst_87 {dimension_numbers = #tpu.dot_dimension_numbers<[1], [0], [0], [1], [0, 0, 1, 1], [], []>} : vector<256x128xbf16>, vector<128x128xbf16>, vector<256x128xf32> -> vector<256x128xf32>
    %72 = arith.addf %68, %71 : vector<256x128xf32>
    %c0_88 = arith.constant 0 : index
    %c0_89 = arith.constant 0 : index
    %73 = vector.load %arg5[%c0_88, %c0_89] : memref<256x128xf32, #tpu.memory_space<vmem>>, vector<256x128xf32>
    tpu.vector_store %arg5[%c0_88, %c0_89], %72 {strides = array<i32>} : memref<256x128xf32, #tpu.memory_space<vmem>>, vector<256x128xf32>,
    %c0_90 = arith.constant 0 : index
    %c2_91 = arith.constant 2 : index
    %c2_92 = arith.constant 2 : index
    %c0_93 = arith.constant 0 : index
    %74 = vector.load %arg1[%c0_90, %c2_91, %c2_92, %c0_93] : memref<1x18x18x128xbf16, #tpu.memory_space<vmem>>, vector<1x16x16x128xbf16>
    %75 = vector.shape_cast %74 : vector<1x16x16x128xbf16> to vector<16x16x128xbf16>
    %76 = vector.shape_cast %75 : vector<16x16x128xbf16> to vector<256x128xbf16>
    %c0_94 = arith.constant 0 : index
    %c0_95 = arith.constant 0 : index
    %77 = vector.load %arg5[%c0_94, %c0_95] : memref<256x128xf32, #tpu.memory_space<vmem>>, vector<256x128xf32>
    %c8 = arith.constant 8 : index
    %c0_96 = arith.constant 0 : index
    %c0_97 = arith.constant 0 : index
    %78 = vector.load %arg2[%c8, %c0_96, %c0_97] : memref<9x128x128xbf16, #tpu.memory_space<vmem>>, vector<1x128x128xbf16>
    %79 = vector.shape_cast %78 : vector<1x128x128xbf16> to vector<128x128xbf16>
    %cst_98 = arith.constant dense<0.000000e+00> : vector<256x128xf32>
    %80 = tpu.matmul %76, %79, %cst_98 {dimension_numbers = #tpu.dot_dimension_numbers<[1], [0], [0], [1], [0, 0, 1, 1], [], []>} : vector<256x128xbf16>, vector<128x128xbf16>, vector<256x128xf32> -> vector<256x128xf32>
    %81 = arith.addf %77, %80 : vector<256x128xf32>
    %c0_99 = arith.constant 0 : index
    %c0_100 = arith.constant 0 : index
    %82 = vector.load %arg5[%c0_99, %c0_100] : memref<256x128xf32, #tpu.memory_space<vmem>>, vector<256x128xf32>
    tpu.vector_store %arg5[%c0_99, %c0_100], %81 {strides = array<i32>} : memref<256x128xf32, #tpu.memory_space<vmem>>, vector<256x128xf32>,
    %c0_101 = arith.constant 0 : index
    %c0_102 = arith.constant 0 : index
    %83 = vector.load %arg5[%c0_101, %c0_102] : memref<256x128xf32, #tpu.memory_space<vmem>>, vector<256x128xf32>
    %c0_103 = arith.constant 0 : index
    %c0_104 = arith.constant 0 : index
    %84 = vector.load %arg3[%c0_103, %c0_104] : memref<1x128xf32, #tpu.memory_space<vmem>>, vector<1x128xf32>
    %85 = vector.broadcast %84 : vector<1x128xf32> to vector<256x128xf32>
    %86 = arith.addf %83, %85 : vector<256x128xf32>
    %cst_105 = arith.constant 0.000000e+00 : f32
    %87 = vector.broadcast %cst_105 : f32 to vector<256x128xf32>
    %88 = arith.maximumf %86, %87 : vector<256x128xf32>
    %cst_106 = arith.constant 0.000000e+00 : bf16
    %89 = vector.broadcast %cst_106 : bf16 to vector<1x18x18x128xbf16>
    %c0_107 = arith.constant 0 : index
    %c0_108 = arith.constant 0 : index
    %c0_109 = arith.constant 0 : index
    %c0_110 = arith.constant 0 : index
    %90 = vector.load %arg4[%c0_107, %c0_108, %c0_109, %c0_110] : memref<1x18x18x128xbf16, #tpu.memory_space<vmem>>, vector<1x18x18x128xbf16>
    tpu.vector_store %arg4[%c0_107, %c0_108, %c0_109, %c0_110], %89 {strides = array<i32>} : memref<1x18x18x128xbf16, #tpu.memory_space<vmem>>, vector<1x18x18x128xbf16>,
    %91 = vector.shape_cast %88 : vector<256x128xf32> to vector<16x16x128xf32>
    %92 = arith.truncf %91 : vector<16x16x128xf32> to vector<16x16x128xbf16>
    %c0_111 = arith.constant 0 : index
    %c1_112 = arith.constant 1 : index
    %c1_113 = arith.constant 1 : index
    %c0_114 = arith.constant 0 : index
    %93 = vector.load %arg4[%c0_111, %c1_112, %c1_113, %c0_114] : memref<1x18x18x128xbf16, #tpu.memory_space<vmem>>, vector<1x16x16x128xbf16>
    %94 = vector.shape_cast %93 : vector<1x16x16x128xbf16> to vector<16x16x128xbf16>
    %95 = vector.shape_cast %92 : vector<16x16x128xbf16> to vector<1x16x16x128xbf16>
    tpu.vector_store %arg4[%c0_111, %c1_112, %c1_113, %c0_114], %95 {strides = array<i32>} : memref<1x18x18x128xbf16, #tpu.memory_space<vmem>>, vector<1x16x16x128xbf16>,
    return
  }
  func.func @transform_0(%arg0: i32) -> (i32, i32, i32, i32) {
    %c0_i32 = arith.constant 0 : i32
    %c0_i32_0 = arith.constant 0 : i32
    %c0_i32_1 = arith.constant 0 : i32
    %c0_i32_2 = arith.constant 0 : i32
    return %arg0, %c0_i32, %c0_i32_0, %c0_i32_1 : i32, i32, i32, i32
  }
  func.func @transform_1(%arg0: i32) -> (i32, i32, i32) {
    %c0_i32 = arith.constant 0 : i32
    %c0_i32_0 = arith.constant 0 : i32
    %c0_i32_1 = arith.constant 0 : i32
    %c0_i32_2 = arith.constant 0 : i32
    return %c0_i32, %c0_i32_0, %c0_i32_1 : i32, i32, i32
  }
  func.func @transform_2(%arg0: i32) -> (i32, i32) {
    %c0_i32 = arith.constant 0 : i32
    %c0_i32_0 = arith.constant 0 : i32
    %c0_i32_1 = arith.constant 0 : i32
    return %c0_i32, %c0_i32_0 : i32, i32
  }
  func.func @transform_3(%arg0: i32) -> (i32, i32, i32, i32) {
    %c0_i32 = arith.constant 0 : i32
    %c0_i32_0 = arith.constant 0 : i32
    %c0_i32_1 = arith.constant 0 : i32
    %c0_i32_2 = arith.constant 0 : i32
    return %arg0, %c0_i32, %c0_i32_0, %c0_i32_1 : i32, i32, i32, i32
  }
}

</mosaic_0001>

<bundles_post_ra>
// kernel: tpu_custom_call.1
= control target key start
LH: loop header
LB: loop body
LE: loop exit
PB: predicated region body
PF: predicated region fallthrough
CT: control target
= control target key end

     0   :  { %s8435_s12 = smov 0   ;;  %s9954_s0 = inlined_call_operand.vmem [shape: bf16[2,18,18,128], index: 0, kind: input, shape index: {}]   ;;  %s9955_s1 = inlined_call_operand.vmem [shape: bf16[9,128,128], index: 1, kind: input, shape index: {}]   ;;  %s9956_s2 = inlined_call_operand.vmem [shape: f32[1,128], index: 2, kind: input, shape index: {}]   ;;  %s9957_s3 = inlined_call_operand.vmem [shape: bf16[2,18,18,128], index: 3, kind: output, shape index: {}]  }
   0x1 LB: > { %s6546_s13 = sadd.s32 4294967295, %s8412_s12   ;;  %p6550_p0 = scmp.ge.s32.totalorder %s8412_s12, 1  ;;  %s8412_s12 = sphi %s8435_s12, %s13_s12  }
   0x2   : > { %p137_p1 = scmp.lt.s32.totalorder %s8412_s12, 3 }
   0x4   : > { %p138_p2 = pnand %p6550_p0, %p137_p1 }
   0x5   : > { %v8278_v0 = vld [vmem:[%s9955_s1] sm:$0xff] (!%p138_p2)   ;;  %v8280_v2 = vld [vmem:[%s9955_s1 + $0x8] sm:$0xff] (!%p138_p2)   ;;  %p161_p3 = scmp.lt.s32.totalorder (!%p138_p2), %s6546_s13, 1  ;;  %v8282_v4 = vld [vmem:[%s9955_s1 + $0x10] sm:$0xff] (!%p138_p2)   ;;  %vm701_vm0 = vsmask.f32 (!%p138_p2), 3328 }
   0x6   : > { %141 = sbr.rel (%p138_p2) target bundleno = 584 (0x248), region = 32  ;;  %v8279_v1 = vld [vmem:[%s9955_s1 + $0x100] sm:$0xff] (!%p138_p2)   ;;  %7564 = vmatprep.subr.bf16.mxu1 (!%p138_p2), %v8278_v0  ;;  %v8281_v3 = vld [vmem:[%s9955_s1 + $0x108] sm:$0xff] (!%p138_p2)   ;;  %v8283_v5 = vld [vmem:[%s9955_s1 + $0x110] sm:$0xff] (!%p138_p2)   ;;  %vm702_vm1 = vsmask.f32 (!%p138_p2), 7440 }
   0x7   : > { %7756 = vmatprep.subr.bf16.mxu0 (!%p138_p2), %v8279_v1  ;;  %7565 = vmatpush3.bf16.msra.mxu1 (!%p138_p2), %v8278_v0  ;;  %v8284_v6 = vld [vmem:[%s9955_s1 + $0x18] sm:$0xff] (!%p138_p2)   ;;  %v8286_v8 = vld [vmem:[%s9955_s1 + $0x20] sm:$0xff] (!%p138_p2)   ;;  %v8288_v10 = vld [vmem:[%s9955_s1 + $0x28] sm:$0xff] (!%p138_p2)   ;;  %vm1570_vm3 = vcmask (!%p138_p2), 1042432   ;;  %vm1571_vm4 = vcmask (!%p138_p2), 1046532   ;;  %v8414_v33 = vmov (!%p138_p2), 0  }
   0x8   : > { %7757 = vmatpush3.bf16.msra.mxu0 (!%p138_p2), %v8279_v1  ;;  %7566 = vmatprep.subr.bf16.mxu1 (!%p138_p2), %v8280_v2  ;;  %v8285_v7 = vld [vmem:[%s9955_s1 + $0x118] sm:$0xff] (!%p138_p2)   ;;  %v8287_v9 = vld [vmem:[%s9955_s1 + $0x120] sm:$0xff] (!%p138_p2)   ;;  %v8289_v11 = vld [vmem:[%s9955_s1 + $0x128] sm:$0xff] (!%p138_p2)   ;;  %vm6374_vm6 = vcmask (!%p138_p2), 1043456   ;;  %vm6375_vm7 = vsmask.f32 (!%p138_p2), 7938 }
   0x9   : > { %7758 = vmatprep.subr.bf16.mxu0 (!%p138_p2), %v8281_v3  ;;  %v8290_v18 = vld [vmem:[%s9955_s1 + $0x30] sm:$0xff] (!%p138_p2)   ;;  %v8292_v32 = vld [vmem:[%s9955_s1 + $0x38] sm:$0xff] (!%p138_p2)   ;;  %vm8507_vm2 = vmor (!%p138_p2), %vm701_vm0, %vm702_vm1  ;;  %vm6050_vm8 = vsmask.f32 (!%p138_p2), 256  ;;  %vm6051_vm9 = vsmask.f32 (!%p138_p2), 4368 }
   0xa   : > { %v8291_v24 = vld [vmem:[%s9955_s1 + $0x130] sm:$0xff] (!%p138_p2)   ;;  %v8293_v38 = vld [vmem:[%s9955_s1 + $0x138] sm:$0xff] (!%p138_p2)   ;;  %v8296_v47 = vld [vmem:[%s9955_s1 + $0x40] sm:$0xff] (!%p138_p2)   ;;  %vm6381_vm10 = vcmask (!%p138_p2), 1040384  }
   0xb   : > { %7567 = vmatpush3.bf16.msra.mxu1 (!%p138_p2), %v8280_v2  ;;  %v8297_v52 = vld [vmem:[%s9955_s1 + $0x140] sm:$0xff] (!%p138_p2)   ;;  %vm8607_vm5 = vmor (!%p138_p2), %vm1570_vm3, %vm1571_vm4 }
   0xc   : > { %7759 = vmatpush3.bf16.msra.mxu0 (!%p138_p2), %v8281_v3  ;;  %7568 = vmatprep.subr.bf16.mxu1 (!%p138_p2), %v8282_v4  ;;  %vm9619_vm11 = vmand (!%p138_p2), %vm6374_vm6, %vm6375_vm7 }
   0xd   : > { %s9969_s13 = smov (!%p161_p3, %s6546_s13), 1  ;;  %7760 = vmatprep.subr.bf16.mxu0 %v8283_v5  ;;  %vm9628_vm12 = vmor %vm6050_vm8, %vm6051_vm9 }
   0xe   : > { %s8268_s30 = smul.u32 216, %s9969_s13  ;;  %vm9634_vm13 = vmand %vm6381_vm10, %vm6050_vm8 }
   0xf   : > { %7569 = vmatpush3.bf16.msra.mxu1 %v8282_v4 }
  0x10   : > { %7761 = vmatpush3.bf16.msra.mxu0 %v8283_v5  ;;  %7570 = vmatprep.subr.bf16.mxu1 %v8284_v6  ;;  %s8484_s14 = scalar_lea.vmem %s9954_s0, %s8268_s30  ;;  %s9531_s16 = scalar_lea.vmem %s9957_s3, %s8268_s30 }
  0x11   : > { %7762 = vmatprep.subr.bf16.mxu0 %v8285_v7  ;;  %v8294_v12 = vld [vmem:[%s8484_s14] sm:$0xff]   ;;  %v6745_v13 = vld [vmem:[%s8484_s14 + $0xc] sm:$0xf]  ;;  %v6746_v14 = vld [vmem:[%s8484_s14 + $0x10] sm:$0xf]  ;;  %5900 = vst [vmem:[%s9531_s16] sm:$0xf] %v8414_v33 }
  0x12   : > { %7580 = vmatprep.mubr.bf16.mxu1 %v8294_v12  ;;  %v6747_v15 = vld [vmem:[%s8484_s14 + $0x14] sm:$0x1]  ;;  %v2571_v16 = vshrl.u32 %v6745_v13, 16  ;;  %v2574_v17 = vshll.u32 %v6745_v13, 16  ;;  %v2580_v19 = vshll.u32 %v6746_v14, 16  ;;  %v2584_v20 = vshrl.u32 %v6746_v14, 16 }
  0x13   : > { %7571 = vmatpush3.bf16.msra.mxu1 %v8284_v6  ;;  %v2590_v21 = vshll.u32 %v6747_v15, 16  ;;  %v6748_v29 = vld [vmem:[%s8484_s14 + $0x18] sm:$0xf]  ;;  %v6749_v30 = vld [vmem:[%s8484_s14 + $0x1c] sm:$0xf]  ;;  %v8295_v55 = vld [vmem:[%s8484_s14 + $0xc] sm:$0xff]  }
  0x14   : > { %7763 = vmatpush3.bf16.msra.mxu0 %v8285_v7  ;;  %7572 = vmatprep.subr.bf16.mxu1 %v8286_v8  ;;  %v2573_v22 = vrot.slane %v2571_v16, 4  ;;  %v2576_v23 = vrot.slane %v2574_v17, 5  ;;  %v2582_v25 = vrot.slane %v2580_v19, 5  ;;  %v2586_v26 = vrot.slane %v2584_v20, 4  ;;  %v6750_v31 = vld [vmem:[%s8484_s14 + $0x20] sm:$0x1] }
  0x15   : > { %7764 = vmatprep.subr.bf16.mxu0 %v8287_v9  ;;  %v2592_v27 = vrot.slane %v2590_v21, 5  ;;  %v2595_v35 = vshrl.u32 %v6748_v29, 16  ;;  %v2598_v36 = vshll.u32 %v6748_v29, 16  ;;  %v2604_v37 = vshll.u32 %v6749_v30, 16  ;;  %v6751_v53 = vld [vmem:[%s8484_s14 + $0x24] sm:$0xf] }
  0x16   : > { %v2577_v28 = vor.u32 %v2576_v23, %v2573_v22  ;;  %v2587_v34 = vor.u32 %v2586_v26, %v2582_v25  ;;  %v2608_v40 = vshrl.u32 %v6749_v30, 16  ;;  %v2614_v41 = vshll.u32 %v6750_v31, 16  ;;  %v6752_v57 = vld [vmem:[%s8484_s14 + $0x28] sm:$0xf]  ;;  %v6753_v58 = vld [vmem:[%s8484_s14 + $0x2c] sm:$0x1] }
  0x17   : > { %7573 = vmatpush3.bf16.msra.mxu1 %v8286_v8  ;;  %v2597_v43 = vrot.slane %v2595_v35, 4  ;;  %v2600_v44 = vrot.slane %v2598_v36, 5  ;;  %v2606_v45 = vrot.slane %v2604_v37, 5  ;;  %v2619_v59 = vshrl.u32 %v6751_v53, 16  ;;  %v8299_v2 = vld [vmem:[%s8484_s14 + $0x18] sm:$0xff]   ;;  %v8298_v6 = vld [vmem:[%s9955_s1 + $0x148] sm:$0xff]  }
  0x18   : > { %7765 = vmatpush3.bf16.msra.mxu0 %v8287_v9  ;;  %7574 = vmatprep.subr.bf16.mxu1 %v8288_v10  ;;  %v2578_v39 = vrot.slane %v2577_v28, 4  ;;  %v2588_v42 = vrot.slane %v2587_v34, 4  ;;  %v2610_v48 = vrot.slane %v2608_v40, 4  ;;  %v2616_v51 = vrot.slane %v2614_v41, 5  ;;  %v6754_v13 = vld [vmem:[%s8484_s14 + $0x30] sm:$0xf] }
  0x19   : > { %7766 = vmatprep.subr.bf16.mxu0 %v8289_v11  ;;  %v2601_v50 = vor.u32 %v2600_v44, %v2597_v43  ;;  %v2622_v60 = vshll.u32 %v6751_v53, 16  ;;  %v2628_v62 = vshll.u32 %v6752_v57, 16  ;;  %v2632_v63 = vshrl.u32 %v6752_v57, 16  ;;  %v6755_v14 = vld [vmem:[%s8484_s14 + $0x34] sm:$0xf]  ;;  %v8300_v28 = vld [vmem:[%s8484_s14 + $0x24] sm:$0xff]  }
  0x1a   : > { %v2583_v46 = vsel %vm8507_vm2, %v2578_v39, %v2582_v25  ;;  %v2593_v49 = vsel %vm8507_vm2, %v2588_v42, %v2592_v27  ;;  %v2611_v56 = vor.u32 %v2610_v48, %v2606_v45  ;;  %v2638_v0 = vshll.u32 %v6753_v58, 16  ;;  %v6756_v17 = vld [vmem:[%s8484_s14 + $0x38] sm:$0x1]  ;;  %v8302_v31 = vld [vmem:[%s9955_s1 + $0x150] sm:$0xff]   ;;  %v6757_v39 = vld [vmem:[%s8484_s14 + $0x3c] sm:$0xf] }
  0x1b   : > { %7575 = vmatpush3.bf16.msra.mxu1 %v8288_v10  ;;  %v6809_v54 = vcombine.low %v2583_v46, %v2593_v49  ;;  %v2602_v61 = vrot.slane %v2601_v50, 4  ;;  %v2621_v3 = vrot.slane %v2619_v59, 4  ;;  %v2624_v4 = vrot.slane %v2622_v60, 5  ;;  %v8301_v10 = vld [vmem:[%s9955_s1 + $0x48] sm:$0xff]   ;;  %v8304_v36 = vld [vmem:[%s8484_s14 + $0x30] sm:$0xff]  }
  0x1c   : > { %7767 = vmatpush3.bf16.msra.mxu0 %v8289_v11  ;;  %7576 = vmatprep.subr.bf16.mxu1 %v8290_v18  ;;  %v2612_v1 = vrot.slane %v2611_v56, 4  ;;  %v2630_v7 = vrot.slane %v2628_v62, 5  ;;  %v2634_v8 = vrot.slane %v2632_v63, 4  ;;  %v2640_v9 = vrot.slane %v2638_v0, 5  ;;  %v6758_v40 = vld [vmem:[%s8484_s14 + $0x40] sm:$0xf] }
  0x1d   : > { %7768 = vmatprep.subr.bf16.mxu0 %v8291_v24  ;;  %7772 = vmatprep.mubr.bf16.mxu0 %v6809_v54  ;;  %v2607_v5 = vsel %vm8507_vm2, %v2602_v61, %v2606_v45  ;;  %v2625_v12 = vor.u32 %v2624_v4, %v2621_v3  ;;  %v2646_v19 = vshll.u32 %v6754_v13, 16  ;;  %v2652_v21 = vshll.u32 %v6755_v14, 16  ;;  %v6759_v41 = vld [vmem:[%s8484_s14 + $0x44] sm:$0x1]  ;;  %v8306_v54 = vld [vmem:[%s9955_s1 + $0x50] sm:$0xff]  }
  0x1e   : > { %v2617_v11 = vsel %vm8507_vm2, %v2612_v1, %v2616_v51  ;;  %v2635_v16 = vor.u32 %v2634_v8, %v2630_v7  ;;  %v2656_v22 = vshrl.u32 %v6755_v14, 16  ;;  %v2662_v23 = vshll.u32 %v6756_v17, 16  ;;  %v6760_v58 = vld [vmem:[%s8484_s14 + $0x48] sm:$0xf]  ;;  %v6761_v61 = vld [vmem:[%s8484_s14 + $0x4c] sm:$0xf] }
  0x1f   : > { %7577 = vmatpush3.bf16.msra.mxu1 %v8290_v18  ;;  %v6810_v15 = vcombine.low %v2607_v5, %v2617_v11  ;;  %v2643_v18 = vshrl.u32 %v6754_v13, 16  ;;  %v2626_v20 = vrot.slane %v2625_v12, 4  ;;  %v2648_v26 = vrot.slane %v2646_v19, 5  ;;  %v6762_v62 = vld [vmem:[%s8484_s14 + $0x50] sm:$0x1]  ;;  %v8307_v8 = vld [vmem:[%s9955_s1 + $0x160] sm:$0xff]  }
  0x20   : > { %7769 = vmatpush3.bf16.msra.mxu0 %v8291_v24  ;;  %7578 = vmatprep.subr.bf16.mxu1 %v8292_v32  ;;  %v2636_v24 = vrot.slane %v2635_v16, 4  ;;  %v2654_v29 = vrot.slane %v2652_v21, 5  ;;  %v2658_v30 = vrot.slane %v2656_v22, 4  ;;  %v2664_v35 = vrot.slane %v2662_v23, 5  ;;  %v6763_v19 = vld [vmem:[%s8484_s14 + $0x54] sm:$0xf] }
  0x21   : > { %7770 = vmatprep.subr.bf16.mxu0 %v8293_v38  ;;  %v2645_v25 = vrot.slane %v2643_v18, 4  ;;  %v2631_v27 = vsel %vm8507_vm2, %v2626_v20, %v2630_v7  ;;  %v2667_v43 = vshrl.u32 %v6757_v39, 16  ;;  %v2670_v44 = vshll.u32 %v6757_v39, 16  ;;  %v8309_v18 = vld [vmem:[%s8484_s14 + $0x48] sm:$0xff]   ;;  %v6764_v20 = vld [vmem:[%s8484_s14 + $0x58] sm:$0xf] }
  0x22   : > { %v2676_v45 = vshll.u32 %v6758_v40, 16  ;;  %v2680_v48 = vshrl.u32 %v6758_v40, 16  ;;  %v2686_v49 = vshll.u32 %v6759_v41, 16  ;;  %v2691_v63 = vshrl.u32 %v6760_v58, 16  ;;  %v8308_v23 = vld [vmem:[%s9955_s1 + $0x168] sm:$0xff]   ;;  %v8310_v39 = vld [vmem:[%s8484_s14 + $0x54] sm:$0xff]  }
  0x23   : > { %7579 = vmatpush3.bf16.msra.mxu1 %v8292_v32  ;;  %v2641_v32 = vsel %vm8507_vm2, %v2636_v24, %v2640_v9  ;;  %v2649_v34 = vor.u32 %v2648_v26, %v2645_v25  ;;  %v2669_v51 = vrot.slane %v2667_v43, 4  ;;  %v2694_v0 = vshll.u32 %v6760_v58, 16  ;;  %v6765_v24 = vld [vmem:[%s8484_s14 + $0x5c] sm:$0x1]  ;;  %v6766_v43 = vld [vmem:[%s8484_s14 + $0x60] sm:$0xf] }
  0x24   : > { %7771 = vmatpush3.bf16.msra.mxu0 %v8293_v38  ;;  %7612 = vmatprep.subr.bf16.mxu1 %v8296_v47  ;;  %v6811_v37 = vcombine.low %v2631_v27, %v2641_v32  ;;  %v2659_v38 = vor.u32 %v2658_v30, %v2654_v29  ;;  %v2678_v53 = vrot.slane %v2676_v45, 5  ;;  %v2682_v56 = vrot.slane %v2680_v48, 4  ;;  %v8311_v40 = vld [vmem:[%s9955_s1 + $0x58] sm:$0xff]   ;;  %v6768_v45 = vld [vmem:[%s8484_s14 + $0x68] sm:$0x1] }
  0x25   : > { %7804 = vmatprep.subr.bf16.mxu0 %v8297_v52  ;;  %v2650_v42 = vrot.slane %v2649_v34, 4  ;;  %v2688_v57 = vrot.slane %v2686_v49, 5  ;;  %v2704_v3 = vshrl.u32 %v6761_v61, 16  ;;  %v2710_v4 = vshll.u32 %v6762_v62, 16  ;;  %5906 = vst [vmem:[%s9531_s16 + $0x18] sm:$0xf] %v8414_v33 }
  0x26   : > { %7581 = vmatmul.mubr.bf16.vlgmr.msra.gmra.mrb[0].mxu1 %v8295_v55  ;;  %v2660_v46 = vrot.slane %v2659_v38, 4  ;;  %v2683_v1 = vor.u32 %v2682_v56, %v2678_v53  ;;  %v2696_v7 = vrot.slane %v2694_v0, 5  ;;  %v2715_v25 = vshrl.u32 %v6763_v19, 16  ;;  %v6833_v0 = vld [vmem:[%s8484_s14 + $0xc] sm:$0xe] }
  0x27   : > { %7773 = vmatmul.mubr.bf16.vlgmr.msra.gmra.mrb[0].mxu0 %v6810_v15  ;;  %7613 = vmatpush3.bf16.msra.mxu1 %v8296_v47  ;;  %v8303_v47 = vld [vmem:[%s9955_s1 + $0x158] sm:$0xff]   ;;  %v2655_v50 = vsel %vm8507_vm2, %v2650_v42, %v2654_v29  ;;  %v2706_v12 = vrot.slane %v2704_v3, 4  ;;  %v2712_v17 = vrot.slane %v2710_v4, 5  ;;  %v2718_v26 = vshll.u32 %v6763_v19, 16  ;;  %5901 = vst [vmem:[%s9531_s16 + $0x4] sm:$0xf] %v8414_v33 }
  0x28   : > { %7805 = vmatpush3.bf16.msra.mxu0 %v8297_v52  ;;  %7584 = vmatprep.mubr.bf16.mxu1 %v8299_v2  ;;  %v2672_v52 = vrot.slane %v2670_v44, 5  ;;  %v2665_v55 = vsel %vm8507_vm2, %v2660_v46, %v2664_v35  ;;  %v2700_v2 = vshll.u32 %v6761_v61, 16  ;;  %v2684_v9 = vrot.slane %v2683_v1, 4  ;;  %v6767_v44 = vld [vmem:[%s8484_s14 + $0x64] sm:$0xf] }
  0x29   : > { %7806 = vmatprep.subr.bf16.mxu0 %v8298_v6  ;;  %7614 = vmatprep.subr.bf16.mxu1 %v8301_v10  ;;  %v6812_v59 = vcombine.low %v2655_v50, %v2665_v55  ;;  %v2728_v29 = vshrl.u32 %v6764_v20, 16  ;;  %v2734_v30 = vshll.u32 %v6765_v24, 16  ;;  %v2717_v32 = vrot.slane %v2715_v25, 4  ;;  %v8312_v50 = vld [vmem:[%s9955_s1 + $0x170] sm:$0xff]   ;;  %5902 = vst [vmem:[%s9531_s16 + $0x8] sm:$0x1] %v8414_v33 }
  0x2a   : > { %7776 = vmatprep.mubr.bf16.mxu0 %v6811_v37  ;;  %v2673_v60 = vor.u32 %v2672_v52, %v2669_v51  ;;  %v2702_v11 = vrot.slane %v2700_v2, 5  ;;  %v2689_v15 = vsel %vm8507_vm2, %v2684_v9, %v2688_v57  ;;  %v2720_v34 = vrot.slane %v2718_v26, 5  ;;  %5903 = vst [vmem:[%s9531_s16 + $0xc] sm:$0xf] %v8414_v33  ;;  %5904 = vst [vmem:[%s9531_s16 + $0x10] sm:$0xf] %v8414_v33 }
  0x2b   : > { %7615 = vmatpush3.bf16.msra.mxu1 %v8301_v10  ;;  %v8305_v10 = vld [vmem:[%s8484_s14 + $0x3c] sm:$0xff]   ;;  %v2730_v37 = vrot.slane %v2728_v29, 4  ;;  %v2736_v38 = vrot.slane %v2734_v30, 5  ;;  %v2742_v48 = vshll.u32 %v6766_v43, 16  ;;  %v2748_v49 = vshll.u32 %v6767_v44, 16 }
  0x2c   : > { %7807 = vmatpush3.bf16.msra.mxu0 %v8298_v6  ;;  %7616 = vmatprep.subr.bf16.mxu1 %v8306_v54  ;;  %v2674_v5 = vrot.slane %v2673_v60, 4  ;;  %v2693_v6 = vrot.slane %v2691_v63, 4  ;;  %v2707_v16 = vor.u32 %v2706_v12, %v2702_v11  ;;  %v2721_v42 = vor.u32 %v2720_v34, %v2717_v32  ;;  %v8313_v60 = vld [vmem:[%s9955_s1 + $0x178] sm:$0xff]   ;;  %v8314_v63 = vld [vmem:[%s8484_s14 + $0x60] sm:$0xff]   ;;  %v6841_v32 = vld [vmem:[%s8484_s14 + $0x2c] sm:$0x1] }
  0x2d   : > { %7808 = vmatprep.subr.bf16.mxu0 %v8302_v31  ;;  %v2752_v52 = vshrl.u32 %v6767_v44, 16  ;;  %v2744_v56 = vrot.slane %v2742_v48, 5  ;;  %v2750_v57 = vrot.slane %v2748_v49, 5  ;;  %v6839_v29 = vld [vmem:[%s8484_s14 + $0x24] sm:$0xe]  ;;  %v8321_v48 = vld [vmem:[%s9955_s1 + $0x188] sm:$0xff]  }
  0x2e   : > { %7585 = vmatmul.mubr.bf16.gmra.mrb[4].mxu1 %v8300_v28  ;;  %v2679_v13 = vsel %vm8507_vm2, %v2674_v5, %v2678_v53  ;;  %v2697_v14 = vor.u32 %v2696_v7, %v2693_v6  ;;  %v2708_v27 = vrot.slane %v2707_v16, 4  ;;  %v2724_v28 = vshll.u32 %v6764_v20, 16  ;;  %v6834_v5 = vld [vmem:[%s8484_s14 + $0x10] sm:$0xf]  ;;  %v6835_v6 = vld [vmem:[%s8484_s14 + $0x14] sm:$0x1] }
  0x2f   : > { %7588 = vmatprep.mubr.bf16.mxu1 %v8304_v36  ;;  %7617 = vmatpush3.bf16.msra.mxu1 %v8306_v54  ;;  %v6813_v21 = vcombine.low %v2679_v13, %v2689_v15  ;;  %v2722_v51 = vrot.slane %v2721_v42, 4  ;;  %v2758_v53 = vshll.u32 %v6768_v45, 16  ;;  %v6881_v7 = vrot.slane %v6833_v0, 9  ;;  %v8317_v13 = vld [vmem:[%s9955_s1 + $0x180] sm:$0xff]   ;;  %v6837_v20 = vld [vmem:[%s8484_s14 + $0x1c] sm:$0xf] }
  0x30   : > { %7809 = vmatpush3.bf16.msra.mxu0 %v8302_v31  ;;  %v2698_v22 = vrot.slane %v2697_v14, 4  ;;  %v2713_v35 = vsel %vm8507_vm2, %v2708_v27, %v2712_v17  ;;  %v2726_v36 = vrot.slane %v2724_v28, 5  ;;  %7618 = vmatprep.subr.bf16.mxu1 %v8311_v40  ;;  %v3438_v9 = vrot.slane %v6834_v5, 5  ;;  %v8315_v17 = vld [vmem:[%s8484_s14 + $0x6c] sm:$0xff]   ;;  %v8319_v42 = vld [vmem:[%s8484_s14 + $0x84] sm:$0xff]  }
  0x31   : > { %7777 = vmatmul.mubr.bf16.gmra.mrb[4].mxu0 %v6812_v59  ;;  %7810 = vmatprep.subr.bf16.mxu0 %v8303_v47  ;;  %v2754_v59 = vrot.slane %v2752_v52, 4  ;;  %v2760_v3 = vrot.slane %v2758_v53, 5  ;;  %v3445_v26 = vrot.slane %v6837_v20, 5  ;;  %v6883_v34 = vrot.slane %v6839_v29, 9  ;;  %v6843_v44 = vld [vmem:[%s8484_s14 + $0x34] sm:$0xf] }
  0x32   : > { %7780 = vmatprep.mubr.bf16.mxu0 %v6813_v21  ;;  %v2703_v31 = vsel %vm8507_vm2, %v2698_v22, %v2702_v11  ;;  %v2731_v46 = vor.u32 %v2730_v37, %v2726_v36  ;;  %v2727_v58 = vsel %vm8507_vm2, %v2722_v51, %v2726_v36  ;;  %v8316_v11 = vld [vmem:[%s9955_s1 + $0x60] sm:$0xff]   ;;  %v3439_v15 = vsel %vm8607_vm5, %v6881_v7, %v3438_v9  ;;  %v6848_v0 = vld [vmem:[%s8484_s14 + $0x48] sm:$0xe]  ;;  %v6849_v5 = vld [vmem:[%s8484_s14 + $0x4c] sm:$0xf] }
  0x33   : > { %v6814_v41 = vcombine.low %v2703_v31, %v2713_v35  ;;  %7619 = vmatpush3.bf16.msra.mxu1 %v8311_v40  ;;  %v2755_v2 = vor.u32 %v2754_v59, %v2750_v57  ;;  %v3440_v16 = vrot.slane %v3438_v9, 4  ;;  %v6838_v21 = vld [vmem:[%s8484_s14 + $0x20] sm:$0x1]  ;;  %v3447_v30 = vrot.slane %v3445_v26, 4  ;;  %v6840_v31 = vld [vmem:[%s8484_s14 + $0x28] sm:$0xf] }
  0x34   : > { %7811 = vmatpush3.bf16.msra.mxu0 %v8303_v47  ;;  %v2739_v47 = vshrl.u32 %v6766_v43, 16  ;;  %v2732_v54 = vrot.slane %v2731_v46, 4  ;;  %7620 = vmatprep.subr.bf16.mxu1 %v8316_v11  ;;  %v3448_v27 = vrot.slane %v6838_v21, 5  ;;  %v3452_v36 = vrot.slane %v6840_v31, 5  ;;  %v6842_v43 = vld [vmem:[%s8484_s14 + $0x30] sm:$0xe] }
  0x35   : > { %7812 = vmatprep.subr.bf16.mxu0 %v8307_v8  ;;  %v2756_v12 = vrot.slane %v2755_v2, 4  ;;  %v3455_v37 = vrot.slane %v6841_v32, 5  ;;  %v6844_v46 = vld [vmem:[%s8484_s14 + $0x38] sm:$0x1]  ;;  %v8324_v59 = vld [vmem:[%s9955_s1 + $0x70] sm:$0xff]   ;;  %v6886_v7 = vrot.slane %v6848_v0, 9 }
  0x36   : > { %7589 = vmatmul.mubr.bf16.gmra.mrb[8].mxu1 %v8305_v10  ;;  %v2741_v55 = vrot.slane %v2739_v47, 4  ;;  %v2737_v61 = vsel %vm8507_vm2, %v2732_v54, %v2736_v38  ;;  %v3441_v10 = vrot.slane %v6835_v6, 5  ;;  %v3449_v38 = vsel %vm8607_vm5, %v3447_v30, %v3448_v27  ;;  %v8322_v54 = vld [vmem:[%s8484_s14 + $0x90] sm:$0xff]   ;;  %v6854_v27 = vld [vmem:[%s8484_s14 + $0x60] sm:$0xe]  ;;  %v8329_v31 = vld [vmem:[%s9955_s1 + $0x198] sm:$0xff]  }
  0x37   : > { %7592 = vmatprep.mubr.bf16.mxu1 %v8309_v18  ;;  %v6815_v1 = vcombine.low %v2727_v58, %v2737_v61  ;;  %v6836_v18 = vld [vmem:[%s8484_s14 + $0x18] sm:$0xe]  ;;  %v2761_v19 = vsel %vm8507_vm2, %v2756_v12, %v2760_v3  ;;  %7621 = vmatpush3.bf16.msra.mxu1 %v8316_v11  ;;  %v3453_v40 = vsel %vm8607_vm5, %v6883_v34, %v3452_v36  ;;  %v3459_v47 = vrot.slane %v6843_v44, 5  ;;  %v8323_v3 = vld [vmem:[%s8484_s14 + $0x9c] sm:$0xff]   ;;  %v6850_v6 = vld [vmem:[%s8484_s14 + $0x50] sm:$0x1] }
  0x38   : > { %7813 = vmatpush3.bf16.msra.mxu0 %v8307_v8  ;;  %v2745_v62 = vor.u32 %v2744_v56, %v2741_v55  ;;  %v6882_v22 = vrot.slane %v6836_v18, 9  ;;  %v3442_v25 = vsel %vm8607_vm5, %v3440_v16, %v3441_v10  ;;  %v3462_v51 = vrot.slane %v6844_v46, 5  ;;  %v6845_v55 = vld [vmem:[%s8484_s14 + $0x3c] sm:$0xe]  ;;  %v6846_v56 = vld [vmem:[%s8484_s14 + $0x40] sm:$0xf] }
  0x39   : > { %7814 = vmatprep.subr.bf16.mxu0 %v8308_v23  ;;  %7781 = vmatmul.mubr.bf16.gmra.mrb[8].mxu0 %v6814_v41  ;;  %v6913_v28 = vcombine.low %v3439_v15, %v3442_v25  ;;  %v3454_v41 = vrot.slane %v3452_v36, 4  ;;  %v3461_v53 = vrot.slane %v3459_v47, 4  ;;  %v6885_v58 = vrot.slane %v6845_v55, 9  ;;  %v8325_v12 = vld [vmem:[%s9955_s1 + $0x190] sm:$0xff]   ;;  %v8326_v15 = vld [vmem:[%s8484_s14 + $0xa8] sm:$0xff]  }
  0x3a   : > { %v2746_v8 = vrot.slane %v2745_v62, 4  ;;  %7784 = vmatprep.mubr.bf16.mxu0 %v6815_v1  ;;  %v3446_v35 = vsel %vm8607_vm5, %v6882_v22, %v3445_v26  ;;  %v3476_v11 = vrot.slane %v6850_v6, 5  ;;  %v6851_v16 = vld [vmem:[%s8484_s14 + $0x54] sm:$0xe]  ;;  %v6853_v18 = vld [vmem:[%s8484_s14 + $0x5c] sm:$0x1] }
  0x3b   : > { %v6914_v45 = vcombine.low %v3446_v35, %v3449_v38  ;;  %v3456_v49 = vsel %vm8607_vm5, %v3454_v41, %v3455_v37  ;;  %v3483_v21 = vrot.slane %v6853_v18, 5  ;;  %v8328_v26 = vld [vmem:[%s9955_s1 + $0x78] sm:$0xff]   ;;  %v6856_v29 = vld [vmem:[%s8484_s14 + $0x68] sm:$0x1]  ;;  %v6888_v30 = vrot.slane %v6854_v27, 9 }
  0x3c   : > { %7815 = vmatpush3.bf16.msra.mxu0 %v8308_v23  ;;  %v2751_v14 = vsel %vm8507_vm2, %v2746_v8, %v2750_v57  ;;  %v8318_v23 = vld [vmem:[%s8484_s14 + $0x78] sm:$0xff]   ;;  %v6915_v52 = vcombine.low %v3453_v40, %v3456_v49  ;;  %v6847_v57 = vld [vmem:[%s8484_s14 + $0x44] sm:$0x1]  ;;  %v3473_v8 = vrot.slane %v6849_v5, 5  ;;  %v3490_v36 = vrot.slane %v6856_v29, 5 }
  0x3d   : > { %7816 = vmatprep.subr.bf16.mxu0 %v8312_v50  ;;  %v6816_v24 = vcombine.low %v2751_v14, %v2761_v19  ;;  %v3469_v61 = vrot.slane %v6847_v57, 5  ;;  %v6887_v19 = vrot.slane %v6851_v16, 9  ;;  %v8327_v34 = vld [vmem:[%s8484_s14 + $0xb4] sm:$0xff]   ;;  %v654_v40 = vld [vmem:[%s8484_s14 + $0x4] sm:$0xf] }
  0x3e   : > { %7593 = vmatmul.mubr.bf16.gmra.mrb[12].mxu1 %v8310_v39  ;;  %v8320_v39 = vld [vmem:[%s9955_s1 + $0x68] sm:$0xff]   ;;  %v3475_v14 = vrot.slane %v3473_v8, 4  ;;  %v3474_v22 = vsel %vm8607_vm5, %v6886_v7, %v3473_v8  ;;  %v718_v49 = vshrl.u32 %v654_v40, 16  ;;  %v657_v5 = vld [vmem:[%s8484_s14 + $0x10] sm:$0xf] }
  0x3f   : > { %7596 = vmatprep.mubr.bf16.mxu1 %v8314_v63  ;;  %7622 = vmatprep.subr.bf16.mxu1 %v8320_v39  ;;  %v3463_v63 = vsel %vm8607_vm5, %v3461_v53, %v3462_v51  ;;  %v655_v41 = vld [vmem:[%s8484_s14 + $0x8] sm:$0x1]  ;;  %v6857_v46 = vld [vmem:[%s8484_s14 + $0x6c] sm:$0xe]  ;;  %v6858_v51 = vld [vmem:[%s8484_s14 + $0x70] sm:$0xf] }
  0x40   : > { %7817 = vmatpush3.bf16.msra.mxu0 %v8312_v50  ;;  %v6884_v50 = vrot.slane %v6842_v43, 9  ;;  %7623 = vmatpush3.bf16.msra.mxu1 %v8320_v39  ;;  %v653_v39 = vld [vmem:[%s8484_s14] sm:$0xf]  ;;  %v3494_v57 = vrot.slane %v6858_v51, 5  ;;  %v658_v6 = vld [vmem:[%s8484_s14 + $0x14] sm:$0x1] }
  0x41   : > { %7818 = vmatprep.subr.bf16.mxu0 %v8313_v60  ;;  %7785 = vmatmul.mubr.bf16.gmra.mrb[12].mxu0 %v6816_v24  ;;  %v705_v44 = vshrl.u32 %v653_v39, 16  ;;  %v6862_v29 = vld [vmem:[%s8484_s14 + $0x80] sm:$0x1]  ;;  %5905 = vst [vmem:[%s9531_s16 + $0x14] sm:$0x1] %v8414_v33 }
  0x42   : > { %7820 = vmatprep.mubr.bf16.mxu0 %v6913_v28  ;;  %v3460_v62 = vsel %vm8607_vm5, %v6884_v50, %v3459_v47  ;;  %7624 = vmatprep.subr.bf16.mxu1 %v8324_v59  ;;  %v6855_v28 = vld [vmem:[%s8484_s14 + $0x64] sm:$0xf]  ;;  %v724_v50 = vshll.u32 %v655_v41, 16  ;;  %v660_v41 = vld [vmem:[%s8484_s14 + $0x1c] sm:$0xf] }
  0x43   : > { %v6916_v9 = vcombine.low %v3460_v62, %v3463_v63  ;;  %v3487_v35 = vrot.slane %v6855_v28, 5  ;;  %v8708_v47 = vld [vmem:[%s9955_s1 + $0x80] sm:$0xff]   ;;  %v656_v63 = vld [vmem:[%s8484_s14 + $0xc] sm:$0xf]  ;;  %v766_v51 = vshrl.u32 %v660_v41, 16 }
  0x44   : > { %7819 = vmatpush3.bf16.msra.mxu0 %v8313_v60  ;;  %v3466_v60 = vrot.slane %v6846_v56, 5  ;;  %7625 = vmatpush3.bf16.msra.mxu1 %v8324_v59  ;;  %v6859_v56 = vld [vmem:[%s8484_s14 + $0x74] sm:$0x1]  ;;  %v726_v62 = vrot.slane %v724_v50, 5  ;;  %v729_v8 = vshrl.u32 %v656_v63, 16 }
  0x45   : > { %7852 = vmatprep.subr.bf16.mxu0 %v8317_v13  ;;  %7626 = vmatprep.subr.bf16.mxu1 %v8328_v26  ;;  %v3489_v43 = vrot.slane %v3487_v35, 4  ;;  %5907 = vst [vmem:[%s9531_s16 + $0x1c] sm:$0xf] %v8414_v33  ;;  %5908 = vst [vmem:[%s9531_s16 + $0x20] sm:$0x1] %v8414_v33 }
  0x46   : > { %7597 = vmatmul.mubr.bf16.gmra.mrb[16].mxu1 %v8315_v17  ;;  %v3467_v1 = vsel %vm8607_vm5, %v6885_v58, %v3466_v60  ;;  %v3468_v2 = vrot.slane %v3466_v60, 4  ;;  %v6852_v17 = vld [vmem:[%s8484_s14 + $0x58] sm:$0xf]  ;;  %v8331_v58 = vld [vmem:[%s9955_s1 + $0x1a0] sm:$0xff]   ;;  %v731_v18 = vrot.slane %v729_v8, 4 }
  0x47   : > { %7600 = vmatprep.mubr.bf16.mxu1 %v8318_v23  ;;  %v3480_v20 = vrot.slane %v6852_v17, 5  ;;  %v3477_v23 = vsel %vm8607_vm5, %v3475_v14, %v3476_v11  ;;  %v3491_v53 = vsel %vm8607_vm5, %v3489_v43, %v3490_v36  ;;  %v8333_v11 = vld [vmem:[%s9955_s1 + $0x1a8] sm:$0xff]   ;;  %v742_v14 = vshrl.u32 %v657_v5, 16  ;;  %v659_v36 = vld [vmem:[%s8484_s14 + $0x18] sm:$0xf] }
  0x48   : > { %v3470_v10 = vsel %vm8607_vm5, %v3468_v2, %v3469_v61  ;;  %v6918_v37 = vcombine.low %v3474_v22, %v3477_v23  ;;  %7627 = vmatpush3.bf16.msra.mxu1 %v8328_v26  ;;  %v720_v61 = vrot.slane %v718_v49, 4  ;;  %v3496_v2 = vrot.slane %v3494_v57, 4  ;;  %v6861_v26 = vld [vmem:[%s8484_s14 + $0x7c] sm:$0xf]  ;;  %5909 = vst [vmem:[%s9531_s16 + $0x24] sm:$0xf] %v8414_v33 }
  0x49   : > { %7821 = vmatmul.mubr.bf16.vlgmr.msra.gmra.mrb[0].mxu0 %v6914_v45  ;;  %v3481_v24 = vsel %vm8607_vm5, %v6887_v19, %v3480_v20  ;;  %v3482_v25 = vrot.slane %v3480_v20, 4  ;;  %v708_v45 = vshll.u32 %v653_v39, 16  ;;  %7660 = vmatprep.subr.bf16.mxu1 %v8708_v47  ;;  %v6860_v20 = vld [vmem:[%s8484_s14 + $0x78] sm:$0xe]  ;;  %5910 = vst [vmem:[%s9531_s16 + $0x28] sm:$0xf] %v8414_v33 }
  0x4a   : > { %7853 = vmatpush3.bf16.msra.mxu0 %v8317_v13  ;;  %7824 = vmatprep.mubr.bf16.mxu0 %v6915_v52  ;;  %v6917_v13 = vcombine.low %v3467_v1, %v3470_v10  ;;  %v6889_v52 = vrot.slane %v6857_v46, 9  ;;  %v738_v10 = vshll.u32 %v657_v5, 16  ;;  %v762_v46 = vshll.u32 %v660_v41, 16  ;;  %5911 = vst [vmem:[%s9531_s16 + $0x2c] sm:$0x1] %v8414_v33 }
  0x4b   : > { %7854 = vmatprep.subr.bf16.mxu0 %v8321_v48  ;;  %v3484_v32 = vsel %vm8607_vm5, %v3482_v25, %v3483_v21  ;;  %v710_v55 = vrot.slane %v708_v45, 5  ;;  %v8335_v21 = vld [vmem:[%s9955_s1 + $0x1b0] sm:$0xff]   ;;  %v756_v45 = vshll.u32 %v659_v36, 16  ;;  %5912 = vst [vmem:[%s9531_s16 + $0x30] sm:$0xf] %v8414_v33 }
  0x4c   : > { %v6919_v38 = vcombine.low %v3481_v24, %v3484_v32  ;;  %v3495_v1 = vsel %vm8607_vm5, %v6889_v52, %v3494_v57  ;;  %v740_v23 = vrot.slane %v738_v10, 5  ;;  %v744_v24 = vrot.slane %v742_v14, 4  ;;  %5913 = vst [vmem:[%s9531_s16 + $0x34] sm:$0xf] %v8414_v33  ;;  %5914 = vst [vmem:[%s9531_s16 + $0x38] sm:$0x1] %v8414_v33 }
  0x4d   : > { %5915 = vst [vmem:[%s9531_s16 + $0x3c] sm:$0xf] %v8414_v33  ;;  %5916 = vst [vmem:[%s9531_s16 + $0x40] sm:$0xf] %v8414_v33 }
  0x4e   : > { %7601 = vmatmul.mubr.bf16.gmra.mrb[20].mxu1 %v8319_v42  ;;  %7855 = vmatpush3.bf16.msra.mxu0 %v8321_v48  ;;  %v8702_v42 = vsel %vm8607_vm5, %v6888_v30, %v3487_v35  ;;  %v714_v48 = vshll.u32 %v654_v40, 16  ;;  %v6890_v30 = vrot.slane %v6860_v20, 9  ;;  %v3504_v35 = vrot.slane %v6862_v29, 5  ;;  %5917 = vst [vmem:[%s9531_s16 + $0x44] sm:$0x1] %v8414_v33 }
  0x4f   : > { %7604 = vmatprep.mubr.bf16.mxu1 %v8322_v54  ;;  %7856 = vmatprep.subr.bf16.mxu0 %v8325_v12  ;;  %v707_v54 = vrot.slane %v705_v44, 4  ;;  %v6920_v59 = vcombine.low %v8702_v42, %v3491_v53  ;;  %v661_v42 = vld [vmem:[%s8484_s14 + $0x20] sm:$0x1]  ;;  %v753_v44 = vshrl.u32 %v659_v36, 16  ;;  %v6864_v53 = vld [vmem:[%s8484_s14 + $0x88] sm:$0xf] }
  0x50   : > { %v716_v60 = vrot.slane %v714_v48, 5  ;;  %v6863_v48 = vld [vmem:[%s8484_s14 + $0x84] sm:$0xe]  ;;  %v772_v52 = vshll.u32 %v661_v42, 16  ;;  %5918 = vst [vmem:[%s9531_s16 + $0x48] sm:$0xf] %v8414_v33 }
  0x51   : > { %7825 = vmatmul.mubr.bf16.gmra.mrb[4].mxu0 %v6916_v9  ;;  %v711_v0 = vor.u32 %v710_v55, %v707_v54  ;;  %v732_v9 = vshll.u32 %v656_v63, 16  ;;  %v6865_v54 = vld [vmem:[%s8484_s14 + $0x8c] sm:$0x1]  ;;  %v755_v57 = vrot.slane %v753_v44, 4  ;;  %v768_v63 = vrot.slane %v766_v51, 4 }
  0x52   : > { %7828 = vmatprep.mubr.bf16.mxu0 %v6917_v13  ;;  %7857 = vmatpush3.bf16.msra.mxu0 %v8325_v12  ;;  %v721_v7 = vor.u32 %v720_v61, %v716_v60  ;;  %v6891_v5 = vrot.slane %v6863_v48, 9  ;;  %v6870_v51 = vld [vmem:[%s8484_s14 + $0xa0] sm:$0xf]  ;;  %5919 = vst [vmem:[%s9531_s16 + $0x4c] sm:$0xf] %v8414_v33 }
  0x53   : > { %7858 = vmatprep.subr.bf16.mxu0 %v8329_v31  ;;  %v712_v12 = vrot.slane %v711_v0, 4  ;;  %v734_v19 = vrot.slane %v732_v9, 5  ;;  %v774_v0 = vrot.slane %v772_v52, 5  ;;  %5920 = vst [vmem:[%s9531_s16 + $0x50] sm:$0x1] %v8414_v33 }
  0x54   : > { %v722_v16 = vrot.slane %v721_v7, 4  ;;  %v3511_v7 = vrot.slane %v6865_v54, 5  ;;  %5921 = vst [vmem:[%s9531_s16 + $0x54] sm:$0xf] %v8414_v33  ;;  %5922 = vst [vmem:[%s9531_s16 + $0x58] sm:$0xf] %v8414_v33 }
  0x55   : > { %v717_v22 = vsel %vm8507_vm2, %v712_v12, %v716_v60  ;;  %v735_v28 = vor.u32 %v734_v19, %v731_v18  ;;  %v663_v60 = vld [vmem:[%s8484_s14 + $0x28] sm:$0xf]  ;;  %v8334_v12 = vld [vmem:[%s9955_s1 + $0x90] sm:$0xff]   ;;  %v8772_v18 = vld [vmem:[%s9955_s1 + $0x1c0] sm:$0xff]   ;;  %5923 = vst [vmem:[%s9531_s16 + $0x5c] sm:$0x1] %v8414_v33 }
  0x56   : > { %7605 = vmatmul.mubr.bf16.gmra.mrb[24].mxu1 %v8323_v3  ;;  %7859 = vmatpush3.bf16.msra.mxu0 %v8329_v31  ;;  %v3497_v3 = vrot.slane %v6859_v56, 5  ;;  %v727_v27 = vsel %vm8507_vm2, %v722_v16, %v726_v62  ;;  %v3501_v31 = vrot.slane %v6861_v26, 5  ;;  %v764_v62 = vrot.slane %v762_v46, 5  ;;  %5924 = vst [vmem:[%s9531_s16 + $0x60] sm:$0xf] %v8414_v33 }
  0x57   : > { %7608 = vmatprep.mubr.bf16.mxu1 %v8326_v15  ;;  %7860 = vmatprep.subr.bf16.mxu0 %v8331_v58  ;;  %v748_v15 = vshll.u32 %v658_v6, 16  ;;  %v6593_v32 = vcombine.low %v717_v22, %v727_v27  ;;  %v3508_v6 = vrot.slane %v6864_v53, 5  ;;  %v790_v16 = vshrl.u32 %v663_v60, 16  ;;  %v6868_v27 = vld [vmem:[%s8484_s14 + $0x98] sm:$0x1] }
  0x58   : > { %v3498_v13 = vsel %vm8607_vm5, %v3496_v2, %v3497_v3  ;;  %v3502_v39 = vsel %vm8607_vm5, %v6890_v30, %v3501_v31  ;;  %v3503_v40 = vrot.slane %v3501_v31, 4  ;;  %v8332_v2 = vld [vmem:[%s9955_s1 + $0x88] sm:$0xff]   ;;  %v769_v8 = vor.u32 %v768_v63, %v764_v62  ;;  %5925 = vst [vmem:[%s9531_s16 + $0x64] sm:$0xf] %v8414_v33  ;;  %5926 = vst [vmem:[%s9531_s16 + $0x68] sm:$0x1] %v8414_v33 }
  0x59   : > { %7829 = vmatmul.mubr.bf16.gmra.mrb[8].mxu0 %v6918_v37  ;;  %v6921_v17 = vcombine.low %v3495_v1, %v3498_v13  ;;  %v750_v25 = vrot.slane %v748_v15, 5  ;;  %v8337_v37 = vld [vmem:[%s9955_s1 + $0x1b8] sm:$0xff]   ;;  %v664_v1 = vld [vmem:[%s8484_s14 + $0x2c] sm:$0x1]  ;;  %v3509_v14 = vsel %vm8607_vm5, %v6891_v5, %v3508_v6  ;;  %v3510_v15 = vrot.slane %v3508_v6, 4  ;;  %v8339_v5 = vld [vmem:[%s9955_s1 + $0xa0] sm:$0xff]  }
  0x5a   : > { %7832 = vmatprep.mubr.bf16.mxu0 %v6919_v38  ;;  %7861 = vmatpush3.bf16.msra.mxu0 %v8331_v58  ;;  %v736_v38 = vrot.slane %v735_v28, 4  ;;  %v3505_v50 = vsel %vm8607_vm5, %v3503_v40, %v3504_v35  ;;  %v758_v58 = vrot.slane %v756_v45, 5  ;;  %v770_v19 = vrot.slane %v769_v8, 4  ;;  %v667_v40 = vld [vmem:[%s8484_s14 + $0x38] sm:$0x1] }
  0x5b   : > { %7862 = vmatprep.subr.bf16.mxu0 %v8333_v11  ;;  %v6922_v56 = vcombine.low %v3502_v39, %v3505_v50  ;;  %v796_v26 = vshll.u32 %v664_v1, 16  ;;  %v666_v39 = vld [vmem:[%s8484_s14 + $0x34] sm:$0xf]  ;;  %v3518_v42 = vrot.slane %v6868_v27, 5  ;;  %v6869_v45 = vld [vmem:[%s8484_s14 + $0x9c] sm:$0xe] }
  0x5c   : > { %v741_v49 = vsel %vm8507_vm2, %v736_v38, %v740_v23  ;;  %v759_v3 = vor.u32 %v758_v58, %v755_v57  ;;  %v775_v28 = vsel %vm8507_vm2, %v770_v19, %v774_v0  ;;  %v810_v50 = vshll.u32 %v666_v39, 16  ;;  %5927 = vst [vmem:[%s9531_s16 + $0x6c] sm:$0xf] %v8414_v33  ;;  %5928 = vst [vmem:[%s9531_s16 + $0x70] sm:$0xf] %v8414_v33 }
  0x5d   : > { %v3522_v8 = vrot.slane %v6870_v51, 5  ;;  %5929 = vst [vmem:[%s9531_s16 + $0x74] sm:$0x1] %v8414_v33  ;;  %5930 = vst [vmem:[%s9531_s16 + $0x78] sm:$0xf] %v8414_v33 }
  0x5e   : > { %7609 = vmatmul.mubr.bf16.gmra.mrb[28].mxu1 %v8327_v34  ;;  %v745_v34 = vor.u32 %v744_v24, %v740_v23  ;;  %7863 = vmatpush3.bf16.msra.mxu0 %v8333_v11  ;;  %v786_v11 = vshll.u32 %v663_v60, 16  ;;  %v760_v13 = vrot.slane %v759_v3, 4  ;;  %v3512_v24 = vsel %vm8607_vm5, %v3510_v15, %v3511_v7  ;;  %v670_v3 = vld [vmem:[%s8484_s14 + $0x44] sm:$0x1]  ;;  %5931 = vst [vmem:[%s9531_s16 + $0x7c] sm:$0xf] %v8414_v33 }
  0x5f   : > { %7864 = vmatprep.subr.bf16.mxu0 %v8335_v21  ;;  %7628 = vmatprep.mubr.bf16.mxu1 %v6593_v32  ;;  %v6923_v29 = vcombine.low %v3509_v14, %v3512_v24  ;;  %v665_v32 = vld [vmem:[%s8484_s14 + $0x30] sm:$0xf]  ;;  %v820_v60 = vshll.u32 %v667_v40, 16  ;;  %v6893_v7 = vrot.slane %v6869_v45, 9  ;;  %v6872_v14 = vld [vmem:[%s8484_s14 + $0xa8] sm:$0xe] }
  0x60   : > { %v746_v43 = vrot.slane %v745_v34, 4  ;;  %v788_v22 = vrot.slane %v786_v11, 5  ;;  %v765_v23 = vsel %vm8507_vm2, %v760_v13, %v764_v62  ;;  %v8336_v34 = vld [vmem:[%s9955_s1 + $0x98] sm:$0xff]   ;;  %v804_v44 = vshll.u32 %v665_v32, 16  ;;  %v669_v62 = vld [vmem:[%s8484_s14 + $0x40] sm:$0xf] }
  0x61   : > { %7833 = vmatmul.mubr.bf16.gmra.mrb[12].mxu0 %v6920_v59  ;;  %v662_v59 = vld [vmem:[%s8484_s14 + $0x24] sm:$0xf]  ;;  %v6595_v35 = vcombine.low %v765_v23, %v775_v28  ;;  %v822_v6 = vrot.slane %v820_v60, 5  ;;  %v3523_v15 = vsel %vm8607_vm5, %v6893_v7, %v3522_v8  ;;  %v838_v19 = vshrl.u32 %v669_v62, 16  ;;  %v6874_v24 = vld [vmem:[%s8484_s14 + $0xb0] sm:$0x1] }
  0x62   : > { %7836 = vmatprep.mubr.bf16.mxu0 %v6921_v17  ;;  %v751_v55 = vsel %vm8507_vm2, %v746_v43, %v750_v25  ;;  %7865 = vmatpush3.bf16.msra.mxu0 %v8335_v21  ;;  %v777_v9 = vshrl.u32 %v662_v59, 16  ;;  %v780_v10 = vshll.u32 %v662_v59, 16  ;;  %v6866_v17 = vld [vmem:[%s8484_s14 + $0x90] sm:$0xe]  ;;  %v792_v25 = vrot.slane %v790_v16, 4  ;;  %v8351_v7 = vld [vmem:[%s9955_s1 + $0xb8] sm:$0xff]  }
  0x63   : > { %v6594_v61 = vcombine.low %v741_v49, %v751_v55  ;;  %7866 = vmatprep.subr.bf16.mxu0 %v8337_v37  ;;  %v6892_v31 = vrot.slane %v6866_v17, 9  ;;  %v801_v43 = vshrl.u32 %v665_v32, 16  ;;  %v806_v54 = vrot.slane %v804_v44, 5  ;;  %5932 = vst [vmem:[%s9531_s16 + $0x80] sm:$0x1] %v8414_v33 }
  0x64   : > { %v779_v20 = vrot.slane %v777_v9, 4  ;;  %v782_v21 = vrot.slane %v780_v10, 5  ;;  %v793_v36 = vor.u32 %v792_v25, %v788_v22  ;;  %v814_v55 = vshrl.u32 %v666_v39, 16  ;;  %v8343_v25 = vld [vmem:[%s9955_s1 + $0xa8] sm:$0xff]   ;;  %5933 = vst [vmem:[%s9531_s16 + $0x84] sm:$0xf] %v8414_v33 }
  0x65   : > { %v803_v53 = vrot.slane %v801_v43, 4  ;;  %v812_v59 = vrot.slane %v810_v50, 5  ;;  %v3524_v16 = vrot.slane %v3522_v8, 4  ;;  %v834_v17 = vshll.u32 %v669_v62, 16  ;;  %5934 = vst [vmem:[%s9531_s16 + $0x88] sm:$0xf] %v8414_v33 }
  0x66   : > { %7629 = vmatmul.mubr.bf16.vlgmr.msra.gmra.mrb[0].mxu1 %v6594_v61  ;;  %7867 = vmatpush3.bf16.msra.mxu0 %v8337_v37  ;;  %v783_v30 = vor.u32 %v782_v21, %v779_v20  ;;  %v798_v37 = vrot.slane %v796_v26, 5  ;;  %v794_v46 = vrot.slane %v793_v36, 4  ;;  %v668_v61 = vld [vmem:[%s8484_s14 + $0x3c] sm:$0xf]  ;;  %v6873_v20 = vld [vmem:[%s8484_s14 + $0xac] sm:$0xf] }
  0x67   : > { %7661 = vmatpush3.bf16.msra.mxu1 %v8708_v47  ;;  %v6867_v47 = vld [vmem:[%s8484_s14 + $0x94] sm:$0xf]  ;;  %7900 = vmatprep.subr.bf16.mxu0 %v8772_v18  ;;  %v807_v1 = vor.u32 %v806_v54, %v803_v53  ;;  %v828_v13 = vshll.u32 %v668_v61, 16  ;;  %v836_v27 = vrot.slane %v834_v17, 5  ;;  %v840_v28 = vrot.slane %v838_v19, 4 }
  0x68   : > { %7662 = vmatprep.subr.bf16.mxu1 %v8332_v2  ;;  %v3515_v38 = vrot.slane %v6867_v47, 5  ;;  %v784_v41 = vrot.slane %v783_v30, 4  ;;  %7632 = vmatprep.mubr.bf16.mxu1 %v6595_v35  ;;  %v799_v57 = vsel %vm8507_vm2, %v794_v46, %v798_v37  ;;  %v671_v35 = vld [vmem:[%s8484_s14 + $0x48] sm:$0xf]  ;;  %v8347_v36 = vld [vmem:[%s9955_s1 + $0xb0] sm:$0xff]   ;;  %v3529_v40 = vrot.slane %v6873_v20, 5 }
  0x69   : > { %7837 = vmatmul.mubr.bf16.gmra.mrb[16].mxu0 %v6922_v56  ;;  %v6871_v56 = vld [vmem:[%s8484_s14 + $0xa4] sm:$0x1]  ;;  %v808_v10 = vrot.slane %v807_v1, 4  ;;  %v830_v23 = vrot.slane %v828_v13, 5  ;;  %v3532_v44 = vrot.slane %v6874_v24, 5  ;;  %v849_v45 = vshrl.u32 %v671_v35, 16 }
  0x6a   : > { %7840 = vmatprep.mubr.bf16.mxu0 %v6923_v29  ;;  %v3516_v48 = vsel %vm8607_vm5, %v6892_v31, %v3515_v38  ;;  %v3517_v49 = vrot.slane %v3515_v38, 4  ;;  %v789_v52 = vsel %vm8507_vm2, %v784_v41, %v788_v22  ;;  %v3525_v9 = vrot.slane %v6871_v56, 5  ;;  %v672_v41 = vld [vmem:[%s8484_s14 + $0x4c] sm:$0xf]  ;;  %v6876_v53 = vld [vmem:[%s8484_s14 + $0xb8] sm:$0xf] }
  0x6b   : > { %7663 = vmatpush3.bf16.msra.mxu1 %v8332_v2  ;;  %v6596_v63 = vcombine.low %v789_v52, %v799_v57  ;;  %v816_v2 = vrot.slane %v814_v55, 4  ;;  %v813_v21 = vsel %vm8507_vm2, %v808_v10, %v812_v59  ;;  %v844_v29 = vshll.u32 %v670_v3, 16  ;;  %5935 = vst [vmem:[%s9531_s16 + $0x8c] sm:$0x1] %v8414_v33  ;;  %5936 = vst [vmem:[%s9531_s16 + $0x90] sm:$0xf] %v8414_v33 }
  0x6c   : > { %7664 = vmatprep.subr.bf16.mxu1 %v8334_v12  ;;  %v3519_v58 = vsel %vm8607_vm5, %v3517_v49, %v3518_v42  ;;  %v3526_v26 = vsel %vm8607_vm5, %v3524_v16, %v3525_v9  ;;  %v841_v38 = vor.u32 %v840_v28, %v836_v27  ;;  %v673_v42 = vld [vmem:[%s8484_s14 + $0x50] sm:$0x1]  ;;  %v852_v46 = vshll.u32 %v671_v35, 16  ;;  %v6878_v16 = vld [vmem:[%s8484_s14 + $0xc0] sm:$0xe] }
  0x6d   : > { %v6924_v0 = vcombine.low %v3516_v48, %v3519_v58  ;;  %v817_v11 = vor.u32 %v816_v2, %v812_v59  ;;  %v6925_v31 = vcombine.low %v3523_v15, %v3526_v26  ;;  %v846_v39 = vrot.slane %v844_v29, 5  ;;  %v6875_v48 = vld [vmem:[%s8484_s14 + $0xb4] sm:$0xe]  ;;  %v6877_v58 = vld [vmem:[%s8484_s14 + $0xbc] sm:$0x1] }
  0x6e   : > { %7633 = vmatmul.mubr.bf16.gmra.mrb[4].mxu1 %v6596_v63  ;;  %v842_v49 = vrot.slane %v841_v38, 4  ;;  %v3531_v51 = vrot.slane %v3529_v40, 4  ;;  %v858_v52 = vshll.u32 %v672_v41, 16  ;;  %v851_v55 = vrot.slane %v849_v45, 4  ;;  %v674_v63 = vld [vmem:[%s8484_s14 + $0x54] sm:$0xf] }
  0x6f   : > { %7665 = vmatpush3.bf16.msra.mxu1 %v8334_v12  ;;  %v825_v12 = vshrl.u32 %v668_v61, 16  ;;  %v818_v22 = vrot.slane %v817_v11, 4  ;;  %v854_v56 = vrot.slane %v852_v46, 5  ;;  %v862_v57 = vshrl.u32 %v672_v41, 16  ;;  %v6880_v26 = vld [vmem:[%s8484_s14 + $0xc8] sm:$0x1] }
  0x70   : > { %7666 = vmatprep.subr.bf16.mxu1 %v8336_v34  ;;  %v847_v59 = vsel %vm8507_vm2, %v842_v49, %v846_v39  ;;  %v3533_v60 = vsel %vm8607_vm5, %v3531_v51, %v3532_v44  ;;  %v860_v61 = vrot.slane %v858_v52, 5  ;;  %v868_v62 = vshll.u32 %v673_v42, 16  ;;  %v678_v42 = vld [vmem:[%s8484_s14 + $0x64] sm:$0xf]  ;;  %5937 = vst [vmem:[%s9531_s16 + $0x94] sm:$0xf] %v8414_v33 }
  0x71   : > { %7841 = vmatmul.mubr.bf16.gmra.mrb[20].mxu0 %v6924_v0  ;;  %v827_v47 = vrot.slane %v825_v12, 4  ;;  %v823_v30 = vsel %vm8507_vm2, %v818_v22, %v822_v6  ;;  %v675_v0 = vld [vmem:[%s8484_s14 + $0x58] sm:$0xf]  ;;  %v855_v3 = vor.u32 %v854_v56, %v851_v55  ;;  %v676_v6 = vld [vmem:[%s8484_s14 + $0x5c] sm:$0x1]  ;;  %v6895_v9 = vrot.slane %v6875_v48, 9 }
  0x72   : > { %v6597_v37 = vcombine.low %v813_v21, %v823_v30  ;;  %7844 = vmatprep.mubr.bf16.mxu0 %v6925_v31  ;;  %v870_v8 = vrot.slane %v868_v62, 5  ;;  %v3536_v10 = vrot.slane %v6876_v53, 5  ;;  %v3539_v11 = vrot.slane %v6877_v58, 5  ;;  %v6879_v22 = vld [vmem:[%s8484_s14 + $0xc4] sm:$0xf] }
  0x73   : > { %7667 = vmatpush3.bf16.msra.mxu1 %v8336_v34  ;;  %v831_v32 = vor.u32 %v830_v23, %v827_v47  ;;  %v6894_v34 = vrot.slane %v6872_v14, 9  ;;  %v856_v12 = vrot.slane %v855_v3, 4  ;;  %v873_v14 = vshrl.u32 %v674_v63, 16  ;;  %v680_v58 = vld [vmem:[%s8484_s14 + $0x6c] sm:$0xf] }
  0x74   : > { %7668 = vmatprep.subr.bf16.mxu1 %v8339_v5  ;;  %7636 = vmatprep.mubr.bf16.mxu1 %v6597_v37  ;;  %v876_v15 = vshll.u32 %v674_v63, 16  ;;  %v3537_v17 = vsel %vm8607_vm5, %v6895_v9, %v3536_v10  ;;  %v3538_v19 = vrot.slane %v3536_v10, 4  ;;  %v882_v20 = vshll.u32 %v675_v0, 16  ;;  %v677_v37 = vld [vmem:[%s8484_s14 + $0x60] sm:$0xf] }
  0x75   : > { %v832_v43 = vrot.slane %v831_v32, 4  ;;  %v3530_v50 = vsel %vm8607_vm5, %v6894_v34, %v3529_v40  ;;  %v886_v21 = vshrl.u32 %v675_v0, 16  ;;  %v861_v47 = vsel %vm8507_vm2, %v856_v12, %v860_v61  ;;  %v681_v63 = vld [vmem:[%s8484_s14 + $0x70] sm:$0xf]  ;;  %v682_v0 = vld [vmem:[%s8484_s14 + $0x74] sm:$0x1] }
  0x76   : > { %v6926_v2 = vcombine.low %v3530_v50, %v3533_v60  ;;  %v875_v24 = vrot.slane %v873_v14, 4  ;;  %v3540_v28 = vsel %vm8607_vm5, %v3538_v19, %v3539_v11  ;;  %v884_v29 = vrot.slane %v882_v20, 5  ;;  %5938 = vst [vmem:[%s9531_s16 + $0x98] sm:$0x1] %v8414_v33  ;;  %5939 = vst [vmem:[%s9531_s16 + $0x9c] sm:$0xf] %v8414_v33 }
  0x77   : > { %7669 = vmatpush3.bf16.msra.mxu1 %v8339_v5  ;;  %v837_v54 = vsel %vm8507_vm2, %v832_v43, %v836_v27  ;;  %v864_v5 = vrot.slane %v862_v57, 4  ;;  %v8853_v27 = vld [vmem:[%s9955_s1 + $0xc0] sm:$0xff]   ;;  %v888_v30 = vrot.slane %v886_v21, 4  ;;  %v892_v31 = vshll.u32 %v676_v6, 16  ;;  %v679_v43 = vld [vmem:[%s8484_s14 + $0x68] sm:$0x1] }
  0x78   : > { %7670 = vmatprep.subr.bf16.mxu1 %v8343_v25  ;;  %v6598_v1 = vcombine.low %v837_v54, %v847_v59  ;;  %v6927_v34 = vcombine.low %v3537_v17, %v3540_v28  ;;  %v3543_v41 = vrot.slane %v6879_v22, 5  ;;  %v3546_v45 = vrot.slane %v6880_v26, 5  ;;  %v8338_v57 = vld [vmem:[%s8484_s14 + $0x18] sm:$0xff]   ;;  %v8340_v22 = vld [vmem:[%s8484_s14 + $0x24] sm:$0xff]   ;;  %v8342_v26 = vld [vmem:[%s8484_s14 + $0x30] sm:$0xff]  }
  0x79   : > { %7845 = vmatmul.mubr.bf16.gmra.mrb[24].mxu0 %v6926_v2  ;;  %v865_v13 = vor.u32 %v864_v5, %v860_v61  ;;  %v889_v39 = vor.u32 %v888_v30, %v884_v29  ;;  %v894_v40 = vrot.slane %v892_v31, 5  ;;  %v897_v46 = vshrl.u32 %v677_v37, 16  ;;  %5940 = vst [vmem:[%s9531_s16 + $0xa0] sm:$0xf] %v8414_v33  ;;  %5941 = vst [vmem:[%s9531_s16 + $0xa4] sm:$0x1] %v8414_v33 }
  0x7a   : > { %7637 = vmatmul.mubr.bf16.gmra.mrb[8].mxu1 %v6598_v1  ;;  %7848 = vmatprep.mubr.bf16.mxu0 %v6927_v34  ;;  %v900_v48 = vshll.u32 %v677_v37, 16  ;;  %v3545_v51 = vrot.slane %v3543_v41, 4  ;;  %v906_v52 = vshll.u32 %v678_v42, 16  ;;  %v910_v56 = vshrl.u32 %v678_v42, 16  ;;  %v686_v37 = vld [vmem:[%s8484_s14 + $0x84] sm:$0xf] }
  0x7b   : > { %7671 = vmatpush3.bf16.msra.mxu1 %v8343_v25  ;;  %v866_v23 = vrot.slane %v865_v13, 4  ;;  %v878_v25 = vrot.slane %v876_v15, 5  ;;  %v890_v49 = vrot.slane %v889_v39, 4  ;;  %v899_v54 = vrot.slane %v897_v46, 4  ;;  %5942 = vst [vmem:[%s9531_s16 + $0xa8] sm:$0xf] %v8414_v33 }
  0x7c   : > { %7672 = vmatprep.subr.bf16.mxu1 %v8347_v36  ;;  %v902_v55 = vrot.slane %v900_v48, 5  ;;  %v3547_v60 = vsel %vm8607_vm5, %v3545_v51, %v3546_v45  ;;  %v908_v61 = vrot.slane %v906_v52, 5  ;;  %v916_v62 = vshll.u32 %v679_v43, 16  ;;  %v687_v43 = vld [vmem:[%s8484_s14 + $0x88] sm:$0xf] }
  0x7d   : > { %v871_v32 = vsel %vm8507_vm2, %v866_v23, %v870_v8  ;;  %v879_v35 = vor.u32 %v878_v25, %v875_v24  ;;  %v895_v59 = vsel %vm8507_vm2, %v890_v49, %v894_v40  ;;  %v912_v5 = vrot.slane %v910_v56, 4  ;;  %v683_v23 = vld [vmem:[%s8484_s14 + $0x78] sm:$0xf]  ;;  %v684_v24 = vld [vmem:[%s8484_s14 + $0x7c] sm:$0xf] }
  0x7e   : > { %v6599_v38 = vcombine.low %v861_v47, %v871_v32  ;;  %v903_v3 = vor.u32 %v902_v55, %v899_v54  ;;  %v918_v6 = vrot.slane %v916_v62, 5  ;;  %v924_v8 = vshll.u32 %v680_v58, 16  ;;  %v685_v25 = vld [vmem:[%s8484_s14 + $0x80] sm:$0x1]  ;;  %v688_v48 = vld [vmem:[%s8484_s14 + $0x8c] sm:$0x1] }
  0x7f   : > { %7673 = vmatpush3.bf16.msra.mxu1 %v8347_v36  ;;  %v6896_v36 = vrot.slane %v6878_v16, 9  ;;  %v880_v44 = vrot.slane %v879_v35, 4  ;;  %v930_v9 = vshll.u32 %v681_v63, 16  ;;  %v913_v11 = vor.u32 %v912_v5, %v908_v61  ;;  %v8349_v54 = vld [vmem:[%s9955_s1 + $0x1d0] sm:$0xff]   ;;  %5943 = vst [vmem:[%s9531_s16 + $0xac] sm:$0xf] %v8414_v33 }
  0x80   : > { %7674 = vmatprep.subr.bf16.mxu1 %v8351_v7  ;;  %7640 = vmatprep.mubr.bf16.mxu1 %v6599_v38  ;;  %v904_v10 = vrot.slane %v903_v3, 4  ;;  %v934_v12 = vshrl.u32 %v681_v63, 16  ;;  %v940_v13 = vshll.u32 %v682_v0, 16  ;;  %v926_v15 = vrot.slane %v924_v8, 5  ;;  %v8345_v38 = vld [vmem:[%s9955_s1 + $0x1c8] sm:$0xff]   ;;  %v8344_v63 = vld [vmem:[%s8484_s14 + $0x3c] sm:$0xff]  }
  0x81   : > { %v3544_v50 = vsel %vm8607_vm5, %v6896_v36, %v3543_v41  ;;  %v885_v53 = vsel %vm8507_vm2, %v880_v44, %v884_v29  ;;  %v932_v16 = vrot.slane %v930_v9, 5  ;;  %v914_v19 = vrot.slane %v913_v11, 4  ;;  %v8346_v3 = vld [vmem:[%s8484_s14 + $0x48] sm:$0xff]   ;;  %v690_v8 = vld [vmem:[%s8484_s14 + $0x94] sm:$0xf] }
  0x82   : > { %v6600_v1 = vcombine.low %v885_v53, %v895_v59  ;;  %v6928_v2 = vcombine.low %v3544_v50, %v3547_v60  ;;  %v909_v17 = vsel %vm8507_vm2, %v904_v10, %v908_v61  ;;  %v936_v20 = vrot.slane %v934_v12, 4  ;;  %v691_v9 = vld [vmem:[%s8484_s14 + $0x98] sm:$0x1]  ;;  %5944 = vst [vmem:[%s9531_s16 + $0xb0] sm:$0x1] %v8414_v33 }
  0x83   : > { %7675 = vmatpush3.bf16.msra.mxu1 %v8351_v7  ;;  %v921_v7 = vshrl.u32 %v680_v58, 16  ;;  %v942_v21 = vrot.slane %v940_v13, 5  ;;  %v919_v28 = vsel %vm8507_vm2, %v914_v19, %v918_v6  ;;  %v945_v30 = vshrl.u32 %v683_v23, 16  ;;  %5945 = vst [vmem:[%s9531_s16 + $0xb4] sm:$0xf] %v8414_v33 }
  0x84   : > { %7708 = vmatprep.subr.bf16.mxu1 %v8853_v27  ;;  %7641 = vmatmul.mubr.bf16.gmra.mrb[12].mxu1 %v6600_v1  ;;  %v937_v29 = vor.u32 %v936_v20, %v932_v16  ;;  %v948_v31 = vshll.u32 %v683_v23, 16  ;;  %v6601_v32 = vcombine.low %v909_v17, %v919_v28  ;;  %v954_v35 = vshll.u32 %v684_v24, 16  ;;  %v692_v20 = vld [vmem:[%s8484_s14 + $0x9c] sm:$0xf]  ;;  %5946 = vst [vmem:[%s9531_s16 + $0xb8] sm:$0xf] %v8414_v33 }
  0x85   : > { %7849 = vmatmul.mubr.bf16.gmra.mrb[28].mxu0 %v6928_v2  ;;  %v923_v14 = vrot.slane %v921_v7, 4  ;;  %v958_v36 = vshrl.u32 %v684_v24, 16  ;;  %v947_v40 = vrot.slane %v945_v30, 4  ;;  %v964_v42 = vshll.u32 %v685_v25, 16  ;;  %v689_v2 = vld [vmem:[%s8484_s14 + $0x90] sm:$0xf] }
  0x86   : > { %7868 = vmatprep.mubr.bf16.mxu0 %v8338_v57  ;;  %v938_v39 = vrot.slane %v937_v29, 4  ;;  %v950_v41 = vrot.slane %v948_v31, 5  ;;  %7644 = vmatprep.mubr.bf16.mxu1 %v6601_v32  ;;  %v956_v45 = vrot.slane %v954_v35, 5  ;;  %v969_v49 = vshrl.u32 %v686_v37, 16  ;;  %v693_v24 = vld [vmem:[%s8484_s14 + $0xa0] sm:$0xf] }
  0x87   : > { %v927_v47 = vor.u32 %v926_v15, %v923_v14  ;;  %v960_v46 = vrot.slane %v958_v36, 4  ;;  %v966_v52 = vrot.slane %v964_v42, 5  ;;  %v972_v53 = vshll.u32 %v686_v37, 16  ;;  %v8353_v14 = vld [vmem:[%s9955_s1 + $0x1d8] sm:$0xff]   ;;  %v694_v29 = vld [vmem:[%s8484_s14 + $0xa4] sm:$0x1] }
  0x88   : > { %v943_v50 = vsel %vm8507_vm2, %v938_v39, %v942_v21  ;;  %v951_v51 = vor.u32 %v950_v41, %v947_v40  ;;  %v971_v57 = vrot.slane %v969_v49, 4  ;;  %v978_v58 = vshll.u32 %v687_v43, 16  ;;  %v8357_v36 = vld [vmem:[%s9955_s1 + $0x1e0] sm:$0xff]   ;;  %5947 = vst [vmem:[%s9531_s16 + $0xbc] sm:$0x1] %v8414_v33 }
  0x89   : > { %v928_v34 = vrot.slane %v927_v47, 4  ;;  %v961_v56 = vor.u32 %v960_v46, %v956_v45  ;;  %v974_v60 = vrot.slane %v972_v53, 5  ;;  %v982_v61 = vshrl.u32 %v687_v43, 16  ;;  %v695_v53 = vld [vmem:[%s8484_s14 + $0xa8] sm:$0xf] }
  0x8a   : > { %v952_v59 = vrot.slane %v951_v51, 4  ;;  %v988_v62 = vshll.u32 %v688_v48, 16  ;;  %v980_v1 = vrot.slane %v978_v58, 5  ;;  %v993_v11 = vshrl.u32 %v689_v2, 16  ;;  %v697_v58 = vld [vmem:[%s8484_s14 + $0xb0] sm:$0x1] }
  0x8b   : > { %v933_v44 = vsel %vm8507_vm2, %v928_v34, %v932_v16  ;;  %v962_v0 = vrot.slane %v961_v56, 4  ;;  %v975_v5 = vor.u32 %v974_v60, %v971_v57  ;;  %v984_v6 = vrot.slane %v982_v61, 4  ;;  %5948 = vst [vmem:[%s9531_s16 + $0xc0] sm:$0xf] %v8414_v33  ;;  %5949 = vst [vmem:[%s9531_s16 + $0xc4] sm:$0xf] %v8414_v33 }
  0x8c   : > { %v6602_v55 = vcombine.low %v933_v44, %v943_v50  ;;  %v990_v7 = vrot.slane %v988_v62, 5  ;;  %v996_v12 = vshll.u32 %v689_v2, 16  ;;  %v1002_v13 = vshll.u32 %v690_v8, 16  ;;  %v8350_v50 = vld [vmem:[%s8484_s14 + $0x60] sm:$0xff]   ;;  %5950 = vst [vmem:[%s9531_s16 + $0xc8] sm:$0x1] %v8414_v33 }
  0x8d   : > { %7869 = vmatmul.mubr.bf16.vlgmr.msra.gmra.mrb[0].mxu0 %v8340_v22  ;;  %v967_v10 = vsel %vm8507_vm2, %v962_v0, %v966_v52  ;;  %v976_v16 = vrot.slane %v975_v5, 4  ;;  %v985_v17 = vor.u32 %v984_v6, %v980_v1  ;;  %v1006_v19 = vshrl.u32 %v690_v8, 16  ;;  %v8361_v0 = vld [vmem:[%s9955_s1 + $0x1e8] sm:$0xff]   ;;  %v698_v5 = vld [vmem:[%s8484_s14 + $0xb4] sm:$0xf] }
  0x8e   : > { %7901 = vmatpush3.bf16.msra.mxu0 %v8772_v18  ;;  %7872 = vmatprep.mubr.bf16.mxu0 %v8342_v26  ;;  %v957_v18 = vsel %vm8507_vm2, %v952_v59, %v956_v45  ;;  %v995_v21 = vrot.slane %v993_v11, 4  ;;  %v998_v22 = vrot.slane %v996_v12, 5  ;;  %v1004_v47 = vrot.slane %v1002_v13, 5  ;;  %v8348_v45 = vld [vmem:[%s8484_s14 + $0x54] sm:$0xff]   ;;  %5951 = vst [vmem:[%s9531_s16 + $0xcc] sm:$0xf] %v8414_v33 }
  0x8f   : > { %7902 = vmatprep.subr.bf16.mxu0 %v8345_v38  ;;  %7645 = vmatmul.mubr.bf16.gmra.mrb[16].mxu1 %v6602_v55  ;;  %v6603_v15 = vcombine.low %v957_v18, %v967_v10  ;;  %v1012_v23 = vshll.u32 %v691_v9, 16  ;;  %v981_v25 = vsel %vm8507_vm2, %v976_v16, %v980_v1  ;;  %v986_v26 = vrot.slane %v985_v17, 4  ;;  %v699_v9 = vld [vmem:[%s8484_s14 + $0xb8] sm:$0xf]  ;;  %v700_v10 = vld [vmem:[%s8484_s14 + $0xbc] sm:$0x1] }
  0x90   : > { %v1008_v28 = vrot.slane %v1006_v19, 4  ;;  %v1017_v30 = vshrl.u32 %v692_v20, 16  ;;  %v999_v31 = vor.u32 %v998_v22, %v995_v21  ;;  %v1020_v34 = vshll.u32 %v692_v20, 16  ;;  %5952 = vst [vmem:[%s9531_s16 + $0xd0] sm:$0xf] %v8414_v33 }
  0x91   : > { %7648 = vmatprep.mubr.bf16.mxu1 %v6603_v15  ;;  %v1014_v32 = vrot.slane %v1012_v23, 5  ;;  %v1026_v35 = vshll.u32 %v693_v24, 16  ;;  %v991_v37 = vsel %vm8507_vm2, %v986_v26, %v990_v7  ;;  %v1030_v40 = vshrl.u32 %v693_v24, 16  ;;  %v8365_v15 = vld [vmem:[%s9955_s1 + $0x1f0] sm:$0xff]   ;;  %5953 = vst [vmem:[%s9531_s16 + $0xd4] sm:$0x1] %v8414_v33 }
  0x92   : > { %7903 = vmatpush3.bf16.msra.mxu0 %v8345_v38  ;;  %v1009_v38 = vor.u32 %v1008_v28, %v1004_v47  ;;  %v1019_v39 = vrot.slane %v1017_v30, 4  ;;  %v6604_v41 = vcombine.low %v981_v25, %v991_v37  ;;  %v1000_v42 = vrot.slane %v999_v31, 4  ;;  %v8352_v24 = vld [vmem:[%s8484_s14 + $0x6c] sm:$0xff]   ;;  %v1474_v37 = vld [vmem:[%s8484_s14] sm:$0xe] }
  0x93   : > { %7904 = vmatprep.subr.bf16.mxu0 %v8349_v54  ;;  %v1022_v43 = vrot.slane %v1020_v34, 5  ;;  %v1028_v44 = vrot.slane %v1026_v35, 5  ;;  %v1032_v48 = vrot.slane %v1030_v40, 4  ;;  %v1036_v49 = vshll.u32 %v694_v29, 16  ;;  %v8354_v29 = vld [vmem:[%s8484_s14 + $0x78] sm:$0xff]  }
  0x94   : > { %v1010_v46 = vrot.slane %v1009_v38, 4  ;;  %v1005_v51 = vsel %vm8507_vm2, %v1000_v42, %v1004_v47  ;;  %v1041_v59 = vshrl.u32 %v695_v53, 16  ;;  %v1044_v62 = vshll.u32 %v695_v53, 16  ;;  %v8369_v34 = vld [vmem:[%s9955_s1 + $0x1f8] sm:$0xff]   ;;  %v1475_v38 = vld [vmem:[%s8484_s14 + $0x4] sm:$0xf] }
  0x95   : > { %7873 = vmatmul.mubr.bf16.gmra.mrb[4].mxu0 %v8344_v63  ;;  %v1023_v52 = vor.u32 %v1022_v43, %v1019_v39  ;;  %v1033_v56 = vor.u32 %v1032_v48, %v1028_v44  ;;  %v1038_v57 = vrot.slane %v1036_v49, 5  ;;  %v1060_v18 = vshll.u32 %v697_v58, 16  ;;  %v1476_v39 = vld [vmem:[%s8484_s14 + $0x8] sm:$0x1]  ;;  %v1477_v48 = vld [vmem:[%s8484_s14 + $0xc] sm:$0xe] }
  0x96   : > { %7876 = vmatprep.mubr.bf16.mxu0 %v8346_v3  ;;  %7905 = vmatpush3.bf16.msra.mxu0 %v8349_v54  ;;  %v696_v54 = vld [vmem:[%s8484_s14 + $0xac] sm:$0xf]  ;;  %v1015_v55 = vsel %vm8507_vm2, %v1010_v46, %v1014_v32  ;;  %v1043_v2 = vrot.slane %v1041_v59, 4  ;;  %v1046_v7 = vrot.slane %v1044_v62, 5  ;;  %v1068_v19 = vshll.u32 %v698_v5, 16 }
  0x97   : > { %7906 = vmatprep.subr.bf16.mxu0 %v8353_v14  ;;  %7649 = vmatmul.mubr.bf16.gmra.mrb[20].mxu1 %v6604_v41  ;;  %v6605_v60 = vcombine.low %v1005_v51, %v1015_v55  ;;  %v1024_v61 = vrot.slane %v1023_v52, 4  ;;  %v1050_v63 = vshll.u32 %v696_v54, 16  ;;  %v1034_v1 = vrot.slane %v1033_v56, 4  ;;  %v1478_v49 = vld [vmem:[%s8484_s14 + $0x10] sm:$0xf]  ;;  %v8356_v55 = vld [vmem:[%s8484_s14 + $0x84] sm:$0xff]  }
  0x98   : > { %v1054_v3 = vshrl.u32 %v696_v54, 16  ;;  %v1062_v13 = vrot.slane %v1060_v18, 5  ;;  %v1047_v17 = vor.u32 %v1046_v7, %v1043_v2  ;;  %v1074_v20 = vshll.u32 %v699_v9, 16  ;;  %v1479_v53 = vld [vmem:[%s8484_s14 + $0x14] sm:$0x1]  ;;  %v8963_v56 = vld [vmem:[%s9955_s1 + $0x200] sm:$0xff]  }
  0x99   : > { %7652 = vmatprep.mubr.bf16.mxu1 %v6605_v60  ;;  %v1029_v6 = vsel %vm8507_vm2, %v1024_v61, %v1028_v44  ;;  %v1052_v8 = vrot.slane %v1050_v63, 5  ;;  %v1039_v11 = vsel %vm8507_vm2, %v1034_v1, %v1038_v57  ;;  %v1078_v47 = vshrl.u32 %v699_v9, 16  ;;  %v1480_v1 = vld [vmem:[%s8484_s14 + $0x18] sm:$0xe]  ;;  %v8358_v2 = vld [vmem:[%s8484_s14 + $0x90] sm:$0xff]  }
  0x9a   : > { %7907 = vmatpush3.bf16.msra.mxu0 %v8353_v14  ;;  %v1056_v12 = vrot.slane %v1054_v3, 4  ;;  %v1065_v14 = vshrl.u32 %v698_v5, 16  ;;  %v6606_v16 = vcombine.low %v1029_v6, %v1039_v11  ;;  %v1084_v23 = vshll.u32 %v700_v10, 16  ;;  %v1481_v3 = vld [vmem:[%s8484_s14 + $0x1c] sm:$0xf] }
  0x9b   : > { %7908 = vmatprep.subr.bf16.mxu0 %v8357_v36  ;;  %v1048_v25 = vrot.slane %v1047_v17, 4  ;;  %v1070_v26 = vrot.slane %v1068_v19, 5  ;;  %v1076_v28 = vrot.slane %v1074_v20, 5  ;;  %v1080_v31 = vrot.slane %v1078_v47, 4  ;;  %v1482_v18 = vld [vmem:[%s8484_s14 + $0x20] sm:$0x1] }
  0x9c   : > { %v1057_v21 = vor.u32 %v1056_v12, %v1052_v8  ;;  %v1067_v22 = vrot.slane %v1065_v14, 4  ;;  %v1086_v32 = vrot.slane %v1084_v23, 5  ;;  %v6617_v42 = vrot.slane %v1474_v37, 9  ;;  %v1483_v10 = vld [vmem:[%s8484_s14 + $0x24] sm:$0xe]  ;;  %v8360_v47 = vld [vmem:[%s8484_s14 + $0x9c] sm:$0xff]  }
  0x9d   : > { %7877 = vmatmul.mubr.bf16.gmra.mrb[8].mxu0 %v8348_v45  ;;  %v1053_v35 = vsel %vm8507_vm2, %v1048_v25, %v1052_v8  ;;  %v1081_v41 = vor.u32 %v1080_v31, %v1076_v28  ;;  %v1575_v43 = vrot.slane %v1475_v38, 5  ;;  %v1578_v46 = vrot.slane %v1476_v39, 5  ;;  %v1484_v11 = vld [vmem:[%s8484_s14 + $0x28] sm:$0xf]  ;;  %v1485_v12 = vld [vmem:[%s8484_s14 + $0x2c] sm:$0x1] }
  0x9e   : > { %7880 = vmatprep.mubr.bf16.mxu0 %v8350_v50  ;;  %7909 = vmatpush3.bf16.msra.mxu0 %v8357_v36  ;;  %v1058_v30 = vrot.slane %v1057_v21, 4  ;;  %v1071_v36 = vor.u32 %v1070_v26, %v1067_v22  ;;  %v6618_v54 = vrot.slane %v1477_v48, 9  ;;  %v1582_v58 = vrot.slane %v1478_v49, 5  ;;  %v8359_v22 = vld [vmem:[%s9955_s1 + $0xc8] sm:$0xff]   ;;  %v1487_v25 = vld [vmem:[%s8484_s14 + $0x34] sm:$0xf] }
  0x9f   : > { %7910 = vmatprep.subr.bf16.mxu0 %v8361_v0  ;;  %7653 = vmatmul.mubr.bf16.gmra.mrb[24].mxu1 %v6606_v16  ;;  %v1082_v50 = vrot.slane %v1081_v41, 4  ;;  %v1576_v51 = vsel %vm8607_vm5, %v6617_v42, %v1575_v43  ;;  %v1577_v52 = vrot.slane %v1575_v43, 4  ;;  %v1585_v59 = vrot.slane %v1479_v53, 5  ;;  %v1488_v26 = vld [vmem:[%s8484_s14 + $0x38] sm:$0x1]  ;;  %v8362_v31 = vld [vmem:[%s8484_s14 + $0xa8] sm:$0xff]  }
  0xa0   : > { %v1063_v40 = vsel %vm8507_vm2, %v1058_v30, %v1062_v13  ;;  %v1072_v45 = vrot.slane %v1071_v36, 4  ;;  %v6619_v5 = vrot.slane %v1480_v1, 9  ;;  %v1589_v6 = vrot.slane %v1481_v3, 5  ;;  %v1491_v36 = vld [vmem:[%s8484_s14 + $0x44] sm:$0x1]  ;;  %v8364_v48 = vld [vmem:[%s8484_s14 + $0xb4] sm:$0xff]  }
  0xa1   : > { %v6607_v44 = vcombine.low %v1053_v35, %v1063_v40  ;;  %v1087_v60 = vsel %vm8507_vm2, %v1082_v50, %v1086_v32  ;;  %v1579_v61 = vsel %vm8607_vm5, %v1577_v52, %v1578_v46  ;;  %v1592_v7 = vrot.slane %v1482_v18, 5  ;;  %v1489_v32 = vld [vmem:[%s8484_s14 + $0x3c] sm:$0xe]  ;;  %v1490_v35 = vld [vmem:[%s8484_s14 + $0x40] sm:$0xf]  ;;  %v8363_v40 = vld [vmem:[%s9955_s1 + $0xd0] sm:$0xff]  }
  0xa2   : > { %7911 = vmatpush3.bf16.msra.mxu0 %v8361_v0  ;;  %v1077_v57 = vsel %vm8507_vm2, %v1072_v45, %v1076_v28  ;;  %v6649_v63 = vcombine.low %v1576_v51, %v1579_v61  ;;  %v1584_v0 = vrot.slane %v1582_v58, 4  ;;  %v1583_v8 = vsel %vm8607_vm5, %v6618_v54, %v1582_v58  ;;  %v1493_v49 = vld [vmem:[%s8484_s14 + $0x4c] sm:$0xf]  ;;  %v1494_v50 = vld [vmem:[%s8484_s14 + $0x50] sm:$0x1]  ;;  %v8367_v52 = vld [vmem:[%s9955_s1 + $0xd8] sm:$0xff]  }
  0xa3   : > { %7912 = vmatprep.subr.bf16.mxu0 %v8365_v15  ;;  %7656 = vmatprep.mubr.bf16.mxu1 %v6607_v44  ;;  %v6608_v62 = vcombine.low %v1077_v57, %v1087_v60  ;;  %v1590_v13 = vsel %vm8607_vm5, %v6619_v5, %v1589_v6  ;;  %v1591_v14 = vrot.slane %v1589_v6, 4  ;;  %v6620_v16 = vrot.slane %v1483_v10, 9  ;;  %v1492_v44 = vld [vmem:[%s8484_s14 + $0x48] sm:$0xe]  ;;  %v1495_v57 = vld [vmem:[%s8484_s14 + $0x54] sm:$0xe] }
  0xa4   : > { %v1586_v9 = vsel %vm8607_vm5, %v1584_v0, %v1585_v59  ;;  %v1599_v21 = vrot.slane %v1485_v12, 5  ;;  %v1606_v30 = vrot.slane %v1488_v26, 5  ;;  %v1610_v39 = vrot.slane %v1490_v35, 5  ;;  %v1496_v58 = vld [vmem:[%s8484_s14 + $0x58] sm:$0xf]  ;;  %v8366_v61 = vld [vmem:[%s8484_s14 + $0xc0] sm:$0xff]  }
  0xa5   : > { %7881 = vmatmul.mubr.bf16.gmra.mrb[12].mxu0 %v8352_v24  ;;  %v6650_v17 = vcombine.low %v1583_v8, %v1586_v9  ;;  %v1593_v19 = vsel %vm8607_vm5, %v1591_v14, %v1592_v7  ;;  %v1486_v24 = vld [vmem:[%s8484_s14 + $0x30] sm:$0xe]  ;;  %v6622_v42 = vrot.slane %v1489_v32, 9  ;;  %v1613_v43 = vrot.slane %v1491_v36, 5  ;;  %v1497_v59 = vld [vmem:[%s8484_s14 + $0x5c] sm:$0x1] }
  0xa6   : > { %7884 = vmatprep.mubr.bf16.mxu0 %v8354_v29  ;;  %7913 = vmatpush3.bf16.msra.mxu0 %v8365_v15  ;;  %v1596_v15 = vrot.slane %v1484_v11, 5  ;;  %v6651_v23 = vcombine.low %v1590_v13, %v1593_v19  ;;  %v6621_v28 = vrot.slane %v1486_v24, 9  ;;  %v1603_v29 = vrot.slane %v1487_v25, 5  ;;  %v8370_v6 = vld [vmem:[%s9955_s1 + $0xe0] sm:$0xff]   ;;  %v1500_v11 = vld [vmem:[%s8484_s14 + $0x68] sm:$0x1] }
  0xa7   : > { %7914 = vmatprep.subr.bf16.mxu0 %v8369_v34  ;;  %7657 = vmatmul.mubr.bf16.gmra.mrb[28].mxu1 %v6608_v62  ;;  %v1612_v46 = vrot.slane %v1610_v39, 4  ;;  %v6623_v51 = vrot.slane %v1492_v44, 9  ;;  %v1617_v54 = vrot.slane %v1493_v49, 5  ;;  %v6624_v62 = vrot.slane %v1495_v57, 9  ;;  %v1498_v7 = vld [vmem:[%s8484_s14 + $0x60] sm:$0xe] }
  0xa8   : > { %7676 = vmatprep.mubr.bf16.mxu1 %v6649_v63  ;;  %v1598_v20 = vrot.slane %v1596_v15, 4  ;;  %v1597_v37 = vsel %vm8607_vm5, %v6620_v16, %v1596_v15  ;;  %v1624_v63 = vrot.slane %v1496_v58, 5  ;;  %v1611_v0 = vsel %vm8607_vm5, %v6622_v42, %v1610_v39  ;;  %v1499_v8 = vld [vmem:[%s8484_s14 + $0x64] sm:$0xf]  ;;  %v7009_v13 = vld [vmem:[%s8484_s14 + $0x18] sm:$0xf] }
  0xa9   : > { %v1619_v60 = vrot.slane %v1617_v54, 4  ;;  %v1614_v1 = vsel %vm8607_vm5, %v1612_v46, %v1613_v43  ;;  %v1618_v3 = vsel %vm8607_vm5, %v6623_v51, %v1617_v54  ;;  %v1631_v12 = vrot.slane %v1499_v8, 5  ;;  %v8368_v16 = vld [vmem:[%s8484_s14 + $0xcc] sm:$0xff]   ;;  %v7010_v19 = vld [vmem:[%s8484_s14 + $0x1c] sm:$0xf] }
  0xaa   : > { %7915 = vmatpush3.bf16.msra.mxu0 %v8369_v34  ;;  %v1605_v34 = vrot.slane %v1603_v29, 4  ;;  %v1600_v38 = vsel %vm8607_vm5, %v1598_v20, %v1599_v21  ;;  %v1626_v5 = vrot.slane %v1624_v63, 4  ;;  %v6654_v9 = vcombine.low %v1611_v0, %v1614_v1  ;;  %v7011_v20 = vld [vmem:[%s8484_s14 + $0x20] sm:$0x1]  ;;  %v1501_v26 = vld [vmem:[%s8484_s14 + $0x6c] sm:$0xe] }
  0xab   : > { %7948 = vmatprep.subr.bf16.mxu0 %v8963_v56  ;;  %v6652_v45 = vcombine.low %v1597_v37, %v1600_v38  ;;  %v9036_v10 = vsel %vm8607_vm5, %v6624_v62, %v1624_v63  ;;  %v4434_v21 = vshrl.u32 %v7009_v13, 16  ;;  %v4437_v24 = vshll.u32 %v7009_v13, 16  ;;  %v1503_v36 = vld [vmem:[%s8484_s14 + $0x74] sm:$0x1]  ;;  %v7012_v46 = vld [vmem:[%s8484_s14 + $0x24] sm:$0xf] }
  0xac   : > { %v1607_v41 = vsel %vm8607_vm5, %v1605_v34, %v1606_v30  ;;  %v4443_v25 = vshll.u32 %v7010_v19, 16  ;;  %v4453_v30 = vshll.u32 %v7011_v20, 16  ;;  %v6626_v32 = vrot.slane %v1501_v26, 9  ;;  %v7014_v51 = vld [vmem:[%s8484_s14 + $0x2c] sm:$0x1] }
  0xad   : > { %7885 = vmatmul.mubr.bf16.gmra.mrb[16].mxu0 %v8356_v55  ;;  %v1620_v55 = vrot.slane %v1494_v50, 5  ;;  %v4439_v34 = vrot.slane %v4437_v24, 5  ;;  %v7013_v50 = vld [vmem:[%s8484_s14 + $0x28] sm:$0xf]  ;;  %v1506_v8 = vld [vmem:[%s8484_s14 + $0x80] sm:$0x1] }
  0xae   : > { %7888 = vmatprep.mubr.bf16.mxu0 %v8358_v2  ;;  %v1627_v2 = vrot.slane %v1497_v59, 5  ;;  %v4445_v35 = vrot.slane %v4443_v25, 5  ;;  %v4455_v44 = vrot.slane %v4453_v30, 5  ;;  %v4467_v57 = vshll.u32 %v7013_v50, 16  ;;  %v7017_v20 = vld [vmem:[%s8484_s14 + $0x38] sm:$0x1] }
  0xaf   : > { %7677 = vmatmul.mubr.bf16.vlgmr.msra.gmra.mrb[0].mxu1 %v6650_v17  ;;  %v1621_v18 = vsel %vm8607_vm5, %v1619_v60, %v1620_v55  ;;  %v6625_v17 = vrot.slane %v1498_v7, 9  ;;  %v4471_v58 = vshrl.u32 %v7013_v50, 16  ;;  %v1505_v7 = vld [vmem:[%s8484_s14 + $0x7c] sm:$0xf]  ;;  %v1507_v26 = vld [vmem:[%s8484_s14 + $0x84] sm:$0xe] }
  0xb0   : > { %7709 = vmatpush3.bf16.msra.mxu1 %v8853_v27  ;;  %7680 = vmatprep.mubr.bf16.mxu1 %v6651_v23  ;;  %v1604_v27 = vsel %vm8607_vm5, %v6621_v28, %v1603_v29  ;;  %v6655_v14 = vcombine.low %v1618_v3, %v1621_v18  ;;  %v9042_v15 = vsel %vm8607_vm5, %v1626_v5, %v1627_v2  ;;  %v1634_v23 = vrot.slane %v1500_v11, 5  ;;  %v1504_v3 = vld [vmem:[%s8484_s14 + $0x78] sm:$0xe] }
  0xb1   : > { %7710 = vmatprep.subr.bf16.mxu1 %v8359_v22  ;;  %v6653_v53 = vcombine.low %v1604_v27, %v1607_v41  ;;  %v4436_v28 = vrot.slane %v4434_v21, 4  ;;  %v4447_v29 = vshrl.u32 %v7010_v19, 16  ;;  %v6656_v38 = vcombine.low %v9036_v10, %v9042_v15  ;;  %v8374_v41 = vld [vmem:[%s9955_s1 + $0xf0] sm:$0xff]   ;;  %v8376_v10 = vld [vmem:[%s9955_s1 + $0xf8] sm:$0xff]  }
  0xb2   : > { %v1632_v39 = vsel %vm8607_vm5, %v6625_v17, %v1631_v12  ;;  %v1641_v27 = vrot.slane %v1503_v36, 5  ;;  %v4469_v0 = vrot.slane %v4467_v57, 5  ;;  %v4473_v1 = vrot.slane %v4471_v58, 4  ;;  %v7015_v15 = vld [vmem:[%s8484_s14 + $0x30] sm:$0xf] }
  0xb3   : > { %v4440_v43 = vor.u32 %v4439_v34, %v4436_v28  ;;  %v4477_v2 = vshll.u32 %v7014_v51, 16  ;;  %v1648_v19 = vrot.slane %v1506_v8, 5  ;;  %v4482_v21 = vshrl.u32 %v7015_v15, 16 }
  0xb4   : > { %7711 = vmatpush3.bf16.msra.mxu1 %v8359_v22  ;;  %v8372_v22 = vld [vmem:[%s9955_s1 + $0xe8] sm:$0xff]  }
  0xb5   : > { %7889 = vmatmul.mubr.bf16.gmra.mrb[20].mxu0 %v8360_v47  ;;  %7712 = vmatprep.subr.bf16.mxu1 %v8363_v40  ;;  %v1633_v47 = vrot.slane %v1631_v12, 4  ;;  %v4441_v54 = vrot.slane %v4440_v43, 4  ;;  %v4474_v12 = vor.u32 %v4473_v1, %v4469_v0  ;;  %v4479_v13 = vrot.slane %v4477_v2, 5  ;;  %v7018_v43 = vld [vmem:[%s8484_s14 + $0x3c] sm:$0xf] }
  0xb6   : > { %7892 = vmatprep.mubr.bf16.mxu0 %v8362_v31  ;;  %v1502_v31 = vld [vmem:[%s8484_s14 + $0x70] sm:$0xf] }
  0xb7   : > { %7681 = vmatmul.mubr.bf16.gmra.mrb[4].mxu1 %v6652_v45  ;;  %v1638_v37 = vrot.slane %v1502_v31, 5  ;;  %v1635_v42 = vsel %vm8607_vm5, %v1633_v47, %v1634_v23  ;;  %v4446_v63 = vsel %vm8507_vm2, %v4441_v54, %v4445_v35  ;;  %v4475_v47 = vrot.slane %v4474_v12, 4  ;;  %v8377_v12 = vld [vmem:[%s9955_s1 + $0x218] sm:$0xff]  }
  0xb8   : > { %7684 = vmatprep.mubr.bf16.mxu1 %v6653_v53  ;;  %7713 = vmatpush3.bf16.msra.mxu1 %v8363_v40  ;;  %v4449_v40 = vrot.slane %v4447_v29, 4  ;;  %v4461_v53 = vshll.u32 %v7012_v46, 16  ;;  %v6657_v59 = vcombine.low %v1632_v39, %v1635_v42  ;;  %v4484_v29 = vrot.slane %v4482_v21, 4 }
  0xb9   : > { %7714 = vmatprep.subr.bf16.mxu1 %v8367_v52  ;;  %v1640_v45 = vrot.slane %v1638_v37, 4  ;;  %v9065_v49 = vsel %vm8607_vm5, %v6626_v32, %v1638_v37  ;;  %v1508_v32 = vld [vmem:[%s8484_s14 + $0x88] sm:$0xf]  ;;  %v4480_v34 = vsel %vm8507_vm2, %v4475_v47, %v4479_v13  ;;  %v4501_v37 = vshll.u32 %v7017_v20, 16 }
  0xba   : > { %v4463_v62 = vrot.slane %v4461_v53, 5  ;;  %v4506_v53 = vshrl.u32 %v7018_v43, 16  ;;  %v4509_v54 = vshll.u32 %v7018_v43, 16 }
  0xbb   : > { %v9071_v55 = vsel %vm8607_vm5, %v1640_v45, %v1641_v27  ;;  %v6628_v45 = vrot.slane %v1507_v26, 9 }
  0xbc   : > { %7715 = vmatpush3.bf16.msra.mxu1 %v8367_v52  ;;  %v4458_v52 = vshrl.u32 %v7012_v46, 16  ;;  %v6658_v5 = vcombine.low %v9065_v49, %v9071_v55  ;;  %v1652_v46 = vrot.slane %v1508_v32, 5  ;;  %v7019_v49 = vld [vmem:[%s8484_s14 + $0x40] sm:$0xf] }
  0xbd   : > { %7893 = vmatmul.mubr.bf16.gmra.mrb[24].mxu0 %v8364_v48  ;;  %7716 = vmatprep.subr.bf16.mxu1 %v8370_v6  ;;  %v4450_v48 = vor.u32 %v4449_v40, %v4445_v35  ;;  %v4515_v58 = vshll.u32 %v7019_v49, 16 }
  0xbe   : > { %7896 = vmatprep.mubr.bf16.mxu0 %v8366_v61  ;;  %v4460_v61 = vrot.slane %v4458_v52, 4  ;;  %v7020_v52 = vld [vmem:[%s8484_s14 + $0x44] sm:$0x1]  ;;  %v1653_v55 = vsel %vm8607_vm5, %v6628_v45, %v1652_v46  ;;  %v1654_v57 = vrot.slane %v1652_v46, 4 }
  0xbf   : > { %7685 = vmatmul.mubr.bf16.gmra.mrb[8].mxu1 %v6654_v9  ;;  %v4451_v60 = vrot.slane %v4450_v48, 4  ;;  %v6627_v9 = vrot.slane %v1504_v3, 9  ;;  %v4517_v2 = vrot.slane %v4515_v58, 5  ;;  %v8380_v45 = vld [vmem:[%s9955_s1 + $0x220] sm:$0xff]  }
  0xc0   : > { %7688 = vmatprep.mubr.bf16.mxu1 %v6655_v14  ;;  %7717 = vmatpush3.bf16.msra.mxu1 %v8370_v6  ;;  %v4464_v6 = vor.u32 %v4463_v62, %v4460_v61  ;;  %v1645_v14 = vrot.slane %v1505_v7, 5  ;;  %v4508_v62 = vrot.slane %v4506_v53, 4 }
  0xc1   : > { %7718 = vmatprep.subr.bf16.mxu1 %v8372_v22  ;;  %v4456_v18 = vsel %vm8507_vm2, %v4451_v60, %v4455_v44  ;;  %v4503_v44 = vrot.slane %v4501_v37, 5  ;;  %v9111_v60 = vld [vmem:[%s9955_s1 + $0x100] sm:$0xff]  }
  0xc2   : > { %v7073_v11 = vcombine.low %v4446_v63, %v4456_v18  ;;  %v4465_v17 = vrot.slane %v4464_v6, 4  ;;  %v1646_v23 = vsel %vm8607_vm5, %v6627_v9, %v1645_v14  ;;  %v1647_v24 = vrot.slane %v1645_v14, 4  ;;  %v1511_v9 = vld [vmem:[%s8484_s14 + $0x94] sm:$0xf] }
  0xc3   : > { %v4511_v63 = vrot.slane %v4509_v54, 5  ;;  %v4525_v18 = vshll.u32 %v7020_v52, 16  ;;  %v7026_v54 = vld [vmem:[%s8484_s14 + $0x5c] sm:$0x1] }
  0xc4   : > { %7719 = vmatpush3.bf16.msra.mxu1 %v8372_v22  ;;  %v4485_v22 = vshll.u32 %v7015_v15, 16  ;;  %v4470_v28 = vsel %vm8507_vm2, %v4465_v17, %v4469_v0  ;;  %v1649_v35 = vsel %vm8607_vm5, %v1647_v24, %v1648_v19  ;;  %v8375_v0 = vld [vmem:[%s9955_s1 + $0x210] sm:$0xff]   ;;  %v7021_v17 = vld [vmem:[%s8484_s14 + $0x48] sm:$0xf]  ;;  %v7022_v19 = vld [vmem:[%s8484_s14 + $0x4c] sm:$0xf] }
  0xc5   : > { %7897 = vmatmul.mubr.bf16.gmra.mrb[28].mxu0 %v8368_v16  ;;  %7720 = vmatprep.subr.bf16.mxu1 %v8374_v41  ;;  %v7016_v16 = vld [vmem:[%s8484_s14 + $0x34] sm:$0xf]  ;;  %v7074_v39 = vcombine.low %v4470_v28, %v4480_v34  ;;  %v6659_v40 = vcombine.low %v1646_v23, %v1649_v35  ;;  %v4512_v8 = vor.u32 %v4511_v63, %v4508_v62  ;;  %v4527_v15 = vrot.slane %v4525_v18, 5  ;;  %v1514_v35 = vld [vmem:[%s8484_s14 + $0xa0] sm:$0xf] }
  0xc6   : > { %7916 = vmatprep.mubr.bf16.mxu0 %v7073_v11  ;;  %v4491_v25 = vshll.u32 %v7016_v16, 16  ;;  %v4487_v30 = vrot.slane %v4485_v22, 5  ;;  %v4495_v31 = vshrl.u32 %v7016_v16, 16  ;;  %v1659_v16 = vrot.slane %v1511_v9, 5  ;;  %v7023_v22 = vld [vmem:[%s8484_s14 + $0x50] sm:$0x1] }
  0xc7   : > { %7689 = vmatmul.mubr.bf16.gmra.mrb[12].mxu1 %v6656_v38  ;;  %v1509_v38 = vld [vmem:[%s8484_s14 + $0x8c] sm:$0x1]  ;;  %v4513_v20 = vrot.slane %v4512_v8, 4  ;;  %v4530_v47 = vshrl.u32 %v7021_v17, 16  ;;  %v4533_v23 = vshll.u32 %v7021_v17, 16  ;;  %v4539_v28 = vshll.u32 %v7022_v19, 16 }
  0xc8   : > { %7692 = vmatprep.mubr.bf16.mxu1 %v6657_v59  ;;  %7721 = vmatpush3.bf16.msra.mxu1 %v8374_v41  ;;  %v4493_v36 = vrot.slane %v4491_v25, 5  ;;  %v4488_v27 = vor.u32 %v4487_v30, %v4484_v29  ;;  %v4497_v42 = vrot.slane %v4495_v31, 4  ;;  %v8373_v41 = vld [vmem:[%s9955_s1 + $0x208] sm:$0xff]   ;;  %v1655_v48 = vrot.slane %v1509_v38, 5  ;;  %v1513_v29 = vld [vmem:[%s8484_s14 + $0x9c] sm:$0xe] }
  0xc9   : > { %7722 = vmatprep.subr.bf16.mxu1 %v8376_v10  ;;  %v4519_v59 = vshrl.u32 %v7019_v49, 16  ;;  %v1661_v26 = vrot.slane %v1659_v16, 4  ;;  %v4518_v30 = vsel %vm8507_vm2, %v4513_v20, %v4517_v2  ;;  %v4532_v31 = vrot.slane %v4530_v47, 4  ;;  %v7027_v20 = vld [vmem:[%s8484_s14 + $0x60] sm:$0xf] }
  0xca   : > { %v4489_v50 = vrot.slane %v4488_v27, 4  ;;  %v4498_v51 = vor.u32 %v4497_v42, %v4493_v36  ;;  %v1656_v1 = vsel %vm8607_vm5, %v1654_v57, %v1655_v48  ;;  %v4535_v32 = vrot.slane %v4533_v23, 5  ;;  %v7029_v23 = vld [vmem:[%s8484_s14 + $0x68] sm:$0x1] }
  0xcb   : > { %v4521_v3 = vrot.slane %v4519_v59, 4  ;;  %v6660_v7 = vcombine.low %v1653_v55, %v1656_v1  ;;  %v4543_v34 = vshrl.u32 %v7022_v19, 16  ;;  %v4541_v38 = vrot.slane %v4539_v28, 5 }
  0xcc   : > { %7723 = vmatpush3.bf16.msra.mxu1 %v8376_v10  ;;  %v4494_v61 = vsel %vm8507_vm2, %v4489_v50, %v4493_v36  ;;  %v1512_v10 = vld [vmem:[%s8484_s14 + $0x98] sm:$0x1]  ;;  %v4536_v43 = vor.u32 %v4535_v32, %v4532_v31  ;;  %v6630_v48 = vrot.slane %v1513_v29, 9  ;;  %v1666_v49 = vrot.slane %v1514_v35, 5  ;;  %v1519_v31 = vld [vmem:[%s8484_s14 + $0xb4] sm:$0xe] }
  0xcd   : > { %7917 = vmatmul.mubr.bf16.vlgmr.msra.gmra.mrb[0].mxu0 %v7074_v39  ;;  %7996 = vmatprep.subr.bf16.mxu1 %v9111_v60  ;;  %v4522_v14 = vor.u32 %v4521_v3, %v4517_v2  ;;  %v1662_v21 = vrot.slane %v1512_v10, 5  ;;  %v4549_v39 = vshll.u32 %v7023_v22, 16  ;;  %v8383_v2 = vld [vmem:[%s9955_s1 + $0x228] sm:$0xff]  }
  0xce   : > { %7949 = vmatpush3.bf16.msra.mxu0 %v8963_v56  ;;  %v4499_v56 = vrot.slane %v4498_v51, 4  ;;  %v7025_v51 = vld [vmem:[%s8484_s14 + $0x58] sm:$0xf]  ;;  %v4537_v52 = vrot.slane %v4536_v43, 4  ;;  %v1667_v58 = vsel %vm8607_vm5, %v6630_v48, %v1666_v49  ;;  %v1668_v59 = vrot.slane %v1666_v49, 4 }
  0xcf   : > { %7693 = vmatmul.mubr.bf16.gmra.mrb[16].mxu1 %v6658_v5  ;;  %7950 = vmatprep.subr.bf16.mxu0 %v8373_v41  ;;  %v1510_v5 = vld [vmem:[%s8484_s14 + $0x90] sm:$0xe]  ;;  %v4523_v24 = vrot.slane %v4522_v14, 4  ;;  %v1663_v37 = vsel %vm8607_vm5, %v1661_v26, %v1662_v21  ;;  %v4551_v46 = vrot.slane %v4549_v39, 5  ;;  %v7028_v21 = vld [vmem:[%s8484_s14 + $0x64] sm:$0xf] }
  0xd0   : > { %7696 = vmatprep.mubr.bf16.mxu1 %v6659_v40  ;;  %v4504_v6 = vsel %vm8507_vm2, %v4499_v56, %v4503_v44  ;;  %v6629_v11 = vrot.slane %v1510_v5, 9  ;;  %v1515_v40 = vld [vmem:[%s8484_s14 + $0xa4] sm:$0x1]  ;;  %v7024_v44 = vld [vmem:[%s8484_s14 + $0x54] sm:$0xf]  ;;  %v4567_v56 = vshrl.u32 %v7025_v51, 16  ;;  %v4542_v62 = vsel %vm8507_vm2, %v4537_v52, %v4541_v38 }
  0xd1   : > { %v7075_v13 = vcombine.low %v4494_v61, %v4504_v6  ;;  %v4528_v36 = vsel %vm8507_vm2, %v4523_v24, %v4527_v15  ;;  %v1669_v50 = vrot.slane %v1515_v40, 5  ;;  %v4554_v55 = vshrl.u32 %v7024_v44, 16  ;;  %v8386_v14 = vld [vmem:[%s9955_s1 + $0x230] sm:$0xff]   ;;  %v8389_v48 = vld [vmem:[%s9955_s1 + $0x238] sm:$0xff]  }
  0xd2   : > { %7951 = vmatpush3.bf16.msra.mxu0 %v8373_v41  ;;  %v1660_v25 = vsel %vm8607_vm5, %v6629_v11, %v1659_v16  ;;  %v7076_v27 = vcombine.low %v4518_v30, %v4528_v36  ;;  %v4545_v41 = vrot.slane %v4543_v34, 4  ;;  %v4557_v57 = vshll.u32 %v7024_v44, 16  ;;  %v1517_v11 = vld [vmem:[%s8484_s14 + $0xac] sm:$0xf] }
  0xd3   : > { %7952 = vmatprep.subr.bf16.mxu0 %v8375_v0  ;;  %7920 = vmatprep.mubr.bf16.mxu0 %v7075_v13  ;;  %v6661_v42 = vcombine.low %v1660_v25, %v1663_v37  ;;  %v4563_v61 = vshll.u32 %v7025_v51, 16  ;;  %v1670_v3 = vsel %vm8607_vm5, %v1668_v59, %v1669_v50  ;;  %v4569_v5 = vrot.slane %v4567_v56, 4  ;;  %v1520_v37 = vld [vmem:[%s8484_s14 + $0xb8] sm:$0xf] }
  0xd4   : > { %v4546_v53 = vor.u32 %v4545_v41, %v4541_v38  ;;  %v4559_v1 = vrot.slane %v4557_v57, 5  ;;  %v4573_v6 = vshll.u32 %v7026_v54, 16  ;;  %v6662_v9 = vcombine.low %v1667_v58, %v1670_v3  ;;  %v7032_v57 = vld [vmem:[%s8484_s14 + $0x74] sm:$0x1] }
  0xd5   : > { %7921 = vmatmul.mubr.bf16.gmra.mrb[4].mxu0 %v7076_v27  ;;  %v4565_v18 = vrot.slane %v4563_v61, 5  ;;  %v1673_v19 = vrot.slane %v1517_v11, 5  ;;  %v4578_v24 = vshrl.u32 %v7027_v20, 16  ;;  %v4581_v25 = vshll.u32 %v7027_v20, 16 }
  0xd6   : > { %7953 = vmatpush3.bf16.msra.mxu0 %v8375_v0  ;;  %v4547_v63 = vrot.slane %v4546_v53, 4  ;;  %v4556_v0 = vrot.slane %v4554_v55, 4  ;;  %v4575_v17 = vrot.slane %v4573_v6, 5  ;;  %v4587_v30 = vshll.u32 %v7028_v21, 16  ;;  %v7031_v53 = vld [vmem:[%s8484_s14 + $0x70] sm:$0xf] }
  0xd7   : > { %7697 = vmatmul.mubr.bf16.gmra.mrb[20].mxu1 %v6660_v7  ;;  %7954 = vmatprep.subr.bf16.mxu0 %v8377_v12  ;;  %v1516_v7 = vld [vmem:[%s8484_s14 + $0xa8] sm:$0xe]  ;;  %v4570_v16 = vor.u32 %v4569_v5, %v4565_v18  ;;  %v1675_v29 = vrot.slane %v1673_v19, 4  ;;  %v4580_v34 = vrot.slane %v4578_v24, 4  ;;  %v4583_v35 = vrot.slane %v4581_v25, 5 }
  0xd8   : > { %7700 = vmatprep.mubr.bf16.mxu1 %v6661_v42  ;;  %v4552_v8 = vsel %vm8507_vm2, %v4547_v63, %v4551_v46  ;;  %v4560_v10 = vor.u32 %v4559_v1, %v4556_v0  ;;  %v6631_v13 = vrot.slane %v1516_v7, 9  ;;  %v4591_v36 = vshrl.u32 %v7028_v21, 16  ;;  %v1521_v42 = vld [vmem:[%s8484_s14 + $0xbc] sm:$0x1]  ;;  %v7030_v46 = vld [vmem:[%s8484_s14 + $0x6c] sm:$0xf] }
  0xd9   : > { %v7077_v15 = vcombine.low %v4542_v62, %v4552_v8  ;;  %v4571_v26 = vrot.slane %v4570_v16, 4  ;;  %v4589_v40 = vrot.slane %v4587_v30, 5  ;;  %v4597_v27 = vshll.u32 %v7029_v23, 16  ;;  %v8378_v8 = vld [vmem:[%s8484_s14 + $0xc] sm:$0xff]  }
  0xda   : > { %7955 = vmatpush3.bf16.msra.mxu0 %v8377_v12  ;;  %v1518_v12 = vld [vmem:[%s8484_s14 + $0xb0] sm:$0x1]  ;;  %v4561_v22 = vrot.slane %v4560_v10, 4  ;;  %v1674_v28 = vsel %vm8607_vm5, %v6631_v13, %v1673_v19  ;;  %v4584_v44 = vor.u32 %v4583_v35, %v4580_v34  ;;  %v6632_v50 = vrot.slane %v1519_v31, 9  ;;  %v7034_v13 = vld [vmem:[%s8484_s14 + $0x7c] sm:$0xf] }
  0xdb   : > { %7956 = vmatprep.subr.bf16.mxu0 %v8380_v45  ;;  %v1676_v47 = vrot.slane %v1518_v12, 5  ;;  %7924 = vmatprep.mubr.bf16.mxu0 %v7077_v15  ;;  %v4576_v38 = vsel %vm8507_vm2, %v4571_v26, %v4575_v17  ;;  %v4599_v49 = vrot.slane %v4597_v27, 5  ;;  %v1680_v51 = vrot.slane %v1520_v37, 5  ;;  %v7033_v12 = vld [vmem:[%s8484_s14 + $0x78] sm:$0xf] }
  0xdc   : > { %v4566_v32 = vsel %vm8507_vm2, %v4561_v22, %v4565_v18  ;;  %v1683_v52 = vrot.slane %v1521_v42, 5  ;;  %v4585_v54 = vrot.slane %v4584_v44, 4  ;;  %v4602_v58 = vshrl.u32 %v7030_v46, 16  ;;  %v7035_v17 = vld [vmem:[%s8484_s14 + $0x80] sm:$0x1] }
  0xdd   : > { %v1677_v39 = vsel %vm8607_vm5, %v1675_v29, %v1676_v47  ;;  %v7078_v43 = vcombine.low %v4566_v32, %v4576_v38  ;;  %v4605_v59 = vshll.u32 %v7030_v46, 16  ;;  %v1681_v61 = vsel %vm8607_vm5, %v6632_v50, %v1680_v51  ;;  %v7036_v26 = vld [vmem:[%s8484_s14 + $0x84] sm:$0xf]  ;;  %v7037_v32 = vld [vmem:[%s8484_s14 + $0x88] sm:$0xf] }
  0xde   : > { %7957 = vmatpush3.bf16.msra.mxu0 %v8380_v45  ;;  %v6663_v41 = vcombine.low %v1674_v28, %v1677_v39  ;;  %v4593_v45 = vrot.slane %v4591_v36, 4  ;;  %v1682_v56 = vrot.slane %v1680_v51, 4  ;;  %v4611_v62 = vshll.u32 %v7031_v53, 16  ;;  %v8379_v36 = vld [vmem:[%s8484_s14 + $0x18] sm:$0xff]   ;;  %v7038_v37 = vld [vmem:[%s8484_s14 + $0x8c] sm:$0x1] }
  0xdf   : > { %7701 = vmatmul.mubr.bf16.gmra.mrb[24].mxu1 %v6662_v9  ;;  %7958 = vmatprep.subr.bf16.mxu0 %v8383_v2  ;;  %v4615_v63 = vshrl.u32 %v7031_v53, 16  ;;  %v4590_v0 = vsel %vm8507_vm2, %v4585_v54, %v4589_v40  ;;  %v4607_v3 = vrot.slane %v4605_v59, 5  ;;  %v4621_v7 = vshll.u32 %v7032_v57, 16  ;;  %v7040_v57 = vld [vmem:[%s8484_s14 + $0x94] sm:$0xf] }
  0xe0   : > { %7925 = vmatmul.mubr.bf16.gmra.mrb[8].mxu0 %v7078_v43  ;;  %7704 = vmatprep.mubr.bf16.mxu1 %v6663_v41  ;;  %v4594_v55 = vor.u32 %v4593_v45, %v4589_v40  ;;  %v1684_v18 = vsel %vm8607_vm5, %v1682_v56, %v1683_v52  ;;  %v4613_v5 = vrot.slane %v4611_v62, 5  ;;  %v4626_v19 = vshrl.u32 %v7033_v12, 16  ;;  %v8381_v41 = vld [vmem:[%s8484_s14 + $0x24] sm:$0xff]  }
  0xe1   : > { %v4617_v6 = vrot.slane %v4615_v63, 4  ;;  %v6664_v10 = vcombine.low %v1681_v61, %v1684_v18  ;;  %v4623_v16 = vrot.slane %v4621_v7, 5  ;;  %v4629_v21 = vshll.u32 %v7033_v12, 16  ;;  %v7041_v61 = vld [vmem:[%s8484_s14 + $0x98] sm:$0x1] }
  0xe2   : > { %7959 = vmatpush3.bf16.msra.mxu0 %v8383_v2  ;;  %v4595_v1 = vrot.slane %v4594_v55, 4  ;;  %v4604_v2 = vrot.slane %v4602_v58, 4  ;;  %v4635_v22 = vshll.u32 %v7034_v13, 16  ;;  %v4639_v47 = vshrl.u32 %v7034_v13, 16  ;;  %v7039_v55 = vld [vmem:[%s8484_s14 + $0x90] sm:$0xf] }
  0xe3   : > { %7960 = vmatprep.subr.bf16.mxu0 %v8386_v14  ;;  %v4618_v15 = vor.u32 %v4617_v6, %v4613_v5  ;;  %v4628_v24 = vrot.slane %v4626_v19, 4  ;;  %v4645_v25 = vshll.u32 %v7035_v17, 16  ;;  %v4631_v29 = vrot.slane %v4629_v21, 5  ;;  %v7044_v12 = vld [vmem:[%s8484_s14 + $0xa4] sm:$0x1]  ;;  %v8382_v17 = vld [vmem:[%s8484_s14 + $0x30] sm:$0xff]  }
  0xe4   : > { %v4600_v9 = vsel %vm8507_vm2, %v4595_v1, %v4599_v49  ;;  %v4608_v11 = vor.u32 %v4607_v3, %v4604_v2  ;;  %v4637_v30 = vrot.slane %v4635_v22, 5  ;;  %v4641_v31 = vrot.slane %v4639_v47, 4  ;;  %v7042_v3 = vld [vmem:[%s8484_s14 + $0x9c] sm:$0xf] }
  0xe5   : > { %v4619_v23 = vrot.slane %v4618_v15, 4  ;;  %v4647_v35 = vrot.slane %v4645_v25, 5  ;;  %v4650_v38 = vshrl.u32 %v7036_v26, 16  ;;  %v4653_v39 = vshll.u32 %v7036_v26, 16 }
  0xe6   : > { %7961 = vmatpush3.bf16.msra.mxu0 %v8386_v14  ;;  %v7079_v14 = vcombine.low %v4590_v0, %v4600_v9  ;;  %v4609_v20 = vrot.slane %v4608_v11, 4  ;;  %v4632_v27 = vor.u32 %v4631_v29, %v4628_v24  ;;  %v4642_v42 = vor.u32 %v4641_v31, %v4637_v30  ;;  %v7043_v9 = vld [vmem:[%s8484_s14 + $0xa0] sm:$0xf]  ;;  %v8400_v29 = vld [vmem:[%s9955_s1 + $0x110] sm:$0xff]  }
  0xe7   : > { %7962 = vmatprep.subr.bf16.mxu0 %v8389_v48  ;;  %7705 = vmatmul.mubr.bf16.gmra.mrb[28].mxu1 %v6664_v10  ;;  %v4624_v34 = vsel %vm8507_vm2, %v4619_v23, %v4623_v16  ;;  %v4659_v43 = vshll.u32 %v7037_v32, 16  ;;  %v4652_v44 = vrot.slane %v4650_v38, 4  ;;  %v4655_v45 = vrot.slane %v4653_v39, 5  ;;  %v8384_v23 = vld [vmem:[%s8484_s14 + $0x3c] sm:$0xff]   ;;  %v7046_v38 = vld [vmem:[%s8484_s14 + $0xac] sm:$0xf] }
  0xe8   : > { %7928 = vmatprep.mubr.bf16.mxu0 %v7079_v14  ;;  %7724 = vmatprep.mubr.bf16.mxu1 %v8378_v8  ;;  %v4614_v28 = vsel %vm8507_vm2, %v4609_v20, %v4613_v5  ;;  %v4663_v46 = vshrl.u32 %v7037_v32, 16  ;;  %v4633_v49 = vrot.slane %v4632_v27, 4  ;;  %v4643_v50 = vrot.slane %v4642_v42, 4  ;;  %v8399_v8 = vld [vmem:[%s9955_s1 + $0x108] sm:$0xff]   ;;  %v7047_v39 = vld [vmem:[%s8484_s14 + $0xb0] sm:$0x1] }
  0xe9   : > { %v7080_v40 = vcombine.low %v4614_v28, %v4624_v34  ;;  %v4661_v51 = vrot.slane %v4659_v43, 5  ;;  %v4656_v52 = vor.u32 %v4655_v45, %v4652_v44  ;;  %v4674_v56 = vshrl.u32 %v7039_v55, 16  ;;  %v7045_v34 = vld [vmem:[%s8484_s14 + $0xa8] sm:$0xf] }
  0xea   : > { %7963 = vmatpush3.bf16.msra.mxu0 %v8389_v48  ;;  %v4669_v48 = vshll.u32 %v7038_v37, 16  ;;  %v4665_v53 = vrot.slane %v4663_v46, 4  ;;  %v4638_v58 = vsel %vm8507_vm2, %v4633_v49, %v4637_v30  ;;  %v4648_v59 = vsel %vm8507_vm2, %v4643_v50, %v4647_v35  ;;  %v8385_v49 = vld [vmem:[%s8484_s14 + $0x48] sm:$0xff]   ;;  %v8401_v50 = vld [vmem:[%s9955_s1 + $0x118] sm:$0xff]  }
  0xeb   : > { %7929 = vmatmul.mubr.bf16.gmra.mrb[12].mxu0 %v7080_v40  ;;  %v4677_v62 = vshll.u32 %v7039_v55, 16  ;;  %v7081_v63 = vcombine.low %v4638_v58, %v4648_v59  ;;  %v4657_v0 = vrot.slane %v4656_v52, 4  ;;  %v4683_v2 = vshll.u32 %v7040_v57, 16  ;;  %v7048_v55 = vld [vmem:[%s8484_s14 + $0xb4] sm:$0xf] }
  0xec   : > { %v4671_v54 = vrot.slane %v4669_v48, 5  ;;  %v4666_v1 = vor.u32 %v4665_v53, %v4661_v51  ;;  %v4676_v18 = vrot.slane %v4674_v56, 4  ;;  %v4687_v6 = vshrl.u32 %v7040_v57, 16  ;;  %v8387_v57 = vld [vmem:[%s8484_s14 + $0x54] sm:$0xff]  }
  0xed   : > { %v4679_v5 = vrot.slane %v4677_v62, 5  ;;  %v4693_v7 = vshll.u32 %v7041_v61, 16  ;;  %7932 = vmatprep.mubr.bf16.mxu0 %v7081_v63  ;;  %v4662_v10 = vsel %vm8507_vm2, %v4657_v0, %v4661_v51  ;;  %v4685_v11 = vrot.slane %v4683_v2, 5  ;;  %v7049_v56 = vld [vmem:[%s8484_s14 + $0xb8] sm:$0xf] }
  0xee   : > { %v4698_v13 = vshrl.u32 %v7042_v3, 16  ;;  %v4689_v15 = vrot.slane %v4687_v6, 4  ;;  %v4701_v19 = vshll.u32 %v7042_v3, 16  ;;  %v4707_v22 = vshll.u32 %v7043_v9, 16  ;;  %v7050_v62 = vld [vmem:[%s8484_s14 + $0xbc] sm:$0x1] }
  0xef   : > { %7725 = vmatmul.mubr.bf16.vlgmr.msra.gmra.mrb[0].mxu1 %v8379_v36  ;;  %v4680_v14 = vor.u32 %v4679_v5, %v4676_v18  ;;  %v4695_v16 = vrot.slane %v4693_v7, 5  ;;  %v4711_v47 = vshrl.u32 %v7043_v9, 16  ;;  %v4717_v32 = vshll.u32 %v7044_v12, 16  ;;  %v8402_v7 = vld [vmem:[%s9955_s1 + $0x120] sm:$0xff]  }
  0xf0   : > { %8004 = vmatpush3.bf16.msra.mxu1 %v9111_v60  ;;  %7728 = vmatprep.mubr.bf16.mxu1 %v8381_v41  ;;  %v4667_v60 = vrot.slane %v4666_v1, 4  ;;  %v4700_v21 = vrot.slane %v4698_v13, 4  ;;  %v4690_v26 = vor.u32 %v4689_v15, %v4685_v11  ;;  %v4703_v28 = vrot.slane %v4701_v19, 5  ;;  %v7052_v15 = vld [vmem:[%s8484_s14 + $0xc4] sm:$0xf] }
  0xf1   : > { %7997 = vmatprep.subr.bf16.mxu1 %v8399_v8  ;;  %v4681_v25 = vrot.slane %v4680_v14, 4  ;;  %v4709_v30 = vrot.slane %v4707_v22, 5  ;;  %v4713_v31 = vrot.slane %v4711_v47, 4  ;;  %v4722_v40 = vshrl.u32 %v7045_v34, 16 }
  0xf2   : > { %v4672_v20 = vsel %vm8507_vm2, %v4667_v60, %v4671_v54  ;;  %v4691_v36 = vrot.slane %v4690_v26, 4  ;;  %v4704_v37 = vor.u32 %v4703_v28, %v4700_v21  ;;  %v4719_v42 = vrot.slane %v4717_v32, 5  ;;  %v7053_v21 = vld [vmem:[%s8484_s14 + $0xc8] sm:$0x1]  ;;  %v8388_v26 = vld [vmem:[%s8484_s14 + $0x60] sm:$0xff]  }
  0xf3   : > { %v7082_v24 = vcombine.low %v4662_v10, %v4672_v20  ;;  %v4686_v35 = vsel %vm8507_vm2, %v4681_v25, %v4685_v11  ;;  %v4714_v27 = vor.u32 %v4713_v31, %v4709_v30  ;;  %v4725_v43 = vshll.u32 %v7045_v34, 16  ;;  %v7051_v11 = vld [vmem:[%s8484_s14 + $0xc0] sm:$0xf]  ;;  %v8403_v28 = vld [vmem:[%s9955_s1 + $0x128] sm:$0xff]  }
  0xf4   : > { %8005 = vmatpush3.bf16.msra.mxu1 %v8399_v8  ;;  %v4731_v41 = vshll.u32 %v7046_v38, 16  ;;  %v4696_v44 = vsel %vm8507_vm2, %v4691_v36, %v4695_v16  ;;  %v4705_v45 = vrot.slane %v4704_v37, 4  ;;  %v4724_v46 = vrot.slane %v4722_v40, 4  ;;  %v7054_v34 = vld [vmem:[%s8484_s14 + $0xcc] sm:$0xf] }
  0xf5   : > { %7998 = vmatprep.subr.bf16.mxu1 %v8400_v29  ;;  %7933 = vmatmul.mubr.bf16.gmra.mrb[16].mxu0 %v7082_v24  ;;  %v4735_v48 = vshrl.u32 %v7046_v38, 16  ;;  %v7083_v51 = vcombine.low %v4686_v35, %v4696_v44  ;;  %v4715_v52 = vrot.slane %v4714_v27, 4  ;;  %v4727_v53 = vrot.slane %v4725_v43, 5  ;;  %v7055_v35 = vld [vmem:[%s8484_s14 + $0xd0] sm:$0xf] }
  0xf6   : > { %v4733_v54 = vrot.slane %v4731_v41, 5  ;;  %v4710_v58 = vsel %vm8507_vm2, %v4705_v45, %v4709_v30  ;;  %v4741_v61 = vshll.u32 %v7047_v39, 16  ;;  %v4746_v1 = vshrl.u32 %v7048_v55, 16  ;;  %v8390_v36 = vld [vmem:[%s8484_s14 + $0x6c] sm:$0xff]   ;;  %v7056_v40 = vld [vmem:[%s8484_s14 + $0xd4] sm:$0x1] }
  0xf7   : > { %7729 = vmatmul.mubr.bf16.gmra.mrb[4].mxu1 %v8382_v17  ;;  %v4737_v59 = vrot.slane %v4735_v48, 4  ;;  %7936 = vmatprep.mubr.bf16.mxu0 %v7083_v51  ;;  %v4720_v63 = vsel %vm8507_vm2, %v4715_v52, %v4719_v42  ;;  %v4728_v0 = vor.u32 %v4727_v53, %v4724_v46  ;;  %v4749_v2 = vshll.u32 %v7048_v55, 16 }
  0xf8   : > { %7732 = vmatprep.mubr.bf16.mxu1 %v8384_v23  ;;  %8006 = vmatpush3.bf16.msra.mxu1 %v8400_v29  ;;  %v7084_v3 = vcombine.low %v4710_v58, %v4720_v63  ;;  %v4743_v5 = vrot.slane %v4741_v61, 5  ;;  %v4755_v6 = vshll.u32 %v7049_v56, 16  ;;  %v4748_v9 = vrot.slane %v4746_v1, 4  ;;  %v7097_v61 = vld [vmem:[%s8484_s14 + $0x18] sm:$0xe] }
  0xf9   : > { %7999 = vmatprep.subr.bf16.mxu1 %v8401_v50  ;;  %v4738_v18 = vor.u32 %v4737_v59, %v4733_v54  ;;  %v4729_v8 = vrot.slane %v4728_v0, 4  ;;  %v4751_v10 = vrot.slane %v4749_v2, 5  ;;  %v4759_v60 = vshrl.u32 %v7049_v56, 16  ;;  %v7098_v56 = vld [vmem:[%s8484_s14 + $0x1c] sm:$0xf] }
  0xfa   : > { %v4757_v13 = vrot.slane %v4755_v6, 5  ;;  %v4765_v14 = vshll.u32 %v7050_v62, 16  ;;  %v4770_v16 = vshrl.u32 %v7051_v11, 16  ;;  %v4773_v22 = vshll.u32 %v7051_v11, 16  ;;  %v7099_v0 = vld [vmem:[%s8484_s14 + $0x20] sm:$0x1] }
  0xfb   : > { %v4739_v12 = vrot.slane %v4738_v18, 4  ;;  %v4734_v17 = vsel %vm8507_vm2, %v4729_v8, %v4733_v54  ;;  %v4752_v19 = vor.u32 %v4751_v10, %v4748_v9  ;;  %v4761_v20 = vrot.slane %v4759_v60, 4  ;;  %v8391_v6 = vld [vmem:[%s8484_s14 + $0x78] sm:$0xff]   ;;  %v7100_v60 = vld [vmem:[%s8484_s14 + $0x24] sm:$0xe] }
  0xfc   : > { %8007 = vmatpush3.bf16.msra.mxu1 %v8401_v50  ;;  %v4767_v23 = vrot.slane %v4765_v14, 5  ;;  %v4772_v24 = vrot.slane %v4770_v16, 4  ;;  %v4779_v25 = vshll.u32 %v7052_v15, 16  ;;  %v4775_v32 = vrot.slane %v4773_v22, 5  ;;  %v8404_v50 = vld [vmem:[%s9955_s1 + $0x130] sm:$0xff]   ;;  %v8392_v16 = vld [vmem:[%s8484_s14 + $0x84] sm:$0xff]  }
  0xfd   : > { %8000 = vmatprep.subr.bf16.mxu1 %v8402_v7  ;;  %7937 = vmatmul.mubr.bf16.gmra.mrb[20].mxu0 %v7084_v3  ;;  %v4744_v47 = vsel %vm8507_vm2, %v4739_v12, %v4743_v5  ;;  %v4753_v30 = vrot.slane %v4752_v19, 4  ;;  %v4762_v31 = vor.u32 %v4761_v20, %v4757_v13  ;;  %v4783_v38 = vshrl.u32 %v7052_v15, 16  ;;  %v7101_v11 = vld [vmem:[%s8484_s14 + $0x28] sm:$0xf]  ;;  %v7102_v15 = vld [vmem:[%s8484_s14 + $0x2c] sm:$0x1] }
  0xfe   : > { %v7085_v29 = vcombine.low %v4734_v17, %v4744_v47  ;;  %v4781_v37 = vrot.slane %v4779_v25, 5  ;;  %v4789_v39 = vshll.u32 %v7053_v21, 16  ;;  %v4794_v27 = vshrl.u32 %v7054_v34, 16  ;;  %v7103_v22 = vld [vmem:[%s8484_s14 + $0x30] sm:$0xe] }
  0xff   : > { %7733 = vmatmul.mubr.bf16.gmra.mrb[8].mxu1 %v8385_v49  ;;  %v4758_v42 = vsel %vm8507_vm2, %v4753_v30, %v4757_v13  ;;  %v4763_v43 = vrot.slane %v4762_v31, 4  ;;  %v4776_v41 = vor.u32 %v4775_v32, %v4772_v24  ;;  %v4797_v44 = vshll.u32 %v7054_v34, 16  ;;  %v7104_v25 = vld [vmem:[%s8484_s14 + $0x34] sm:$0xf] }
 0x100   : > { %7736 = vmatprep.mubr.bf16.mxu1 %v8387_v57  ;;  %8008 = vmatpush3.bf16.msra.mxu1 %v8402_v7  ;;  %v4785_v45 = vrot.slane %v4783_v38, 4  ;;  %v4791_v46 = vrot.slane %v4789_v39, 5  ;;  %v4796_v48 = vrot.slane %v4794_v27, 4  ;;  %v4803_v49 = vshll.u32 %v7055_v35, 16  ;;  %v8405_v7 = vld [vmem:[%s9955_s1 + $0x138] sm:$0xff]  }
 0x101   : > { %8001 = vmatprep.subr.bf16.mxu1 %v8403_v28  ;;  %7940 = vmatprep.mubr.bf16.mxu0 %v7085_v29  ;;  %v4768_v51 = vsel %vm8507_vm2, %v4763_v43, %v4767_v23  ;;  %v4777_v52 = vrot.slane %v4776_v41, 4  ;;  %v4799_v53 = vrot.slane %v4797_v44, 5  ;;  %v4807_v54 = vshrl.u32 %v7055_v35, 16  ;;  %v7108_v38 = vld [vmem:[%s8484_s14 + $0x44] sm:$0x1] }
 0x102   : > { %v7086_v55 = vcombine.low %v4758_v42, %v4768_v51  ;;  %v4786_v57 = vor.u32 %v4785_v45, %v4781_v37  ;;  %v4805_v58 = vrot.slane %v4803_v49, 5  ;;  %v4813_v59 = vshll.u32 %v7056_v40, 16  ;;  %v8393_v42 = vld [vmem:[%s8484_s14 + $0x90] sm:$0xff]   ;;  %v7109_v41 = vld [vmem:[%s8484_s14 + $0x48] sm:$0xe] }
 0x103   : > { %v4800_v62 = vor.u32 %v4799_v53, %v4796_v48  ;;  %v4809_v63 = vrot.slane %v4807_v54, 4  ;;  %v7145_v1 = vrot.slane %v7097_v61, 9  ;;  %v4782_v2 = vsel %vm8507_vm2, %v4777_v52, %v4781_v37  ;;  %v7107_v37 = vld [vmem:[%s8484_s14 + $0x40] sm:$0xf]  ;;  %v7110_v49 = vld [vmem:[%s8484_s14 + $0x4c] sm:$0xf] }
 0x104   : > { %8009 = vmatpush3.bf16.msra.mxu1 %v8403_v28  ;;  %v4787_v3 = vrot.slane %v4786_v57, 4  ;;  %v5301_v18 = vrot.slane %v7098_v56, 5  ;;  %v5304_v5 = vrot.slane %v7099_v0, 5  ;;  %v4815_v10 = vrot.slane %v4813_v59, 5  ;;  %v8394_v48 = vld [vmem:[%s8484_s14 + $0x9c] sm:$0xff]  }
 0x105   : > { %8002 = vmatprep.subr.bf16.mxu1 %v8404_v50  ;;  %7941 = vmatmul.mubr.bf16.gmra.mrb[24].mxu0 %v7086_v55  ;;  %v4801_v8 = vrot.slane %v4800_v62, 4  ;;  %v4810_v9 = vor.u32 %v4809_v63, %v4805_v58  ;;  %v5308_v21 = vrot.slane %v7101_v11, 5  ;;  %v7146_v23 = vrot.slane %v7100_v60, 9  ;;  %v7112_v57 = vld [vmem:[%s8484_s14 + $0x54] sm:$0xe] }
 0x106   : > { %v4792_v12 = vsel %vm8507_vm2, %v4787_v3, %v4791_v46  ;;  %v5302_v13 = vsel %vm8607_vm5, %v7145_v1, %v5301_v18  ;;  %v5303_v14 = vrot.slane %v5301_v18, 4  ;;  %v5311_v24 = vrot.slane %v7102_v15, 5  ;;  %v7114_v59 = vld [vmem:[%s8484_s14 + $0x5c] sm:$0x1]  ;;  %v7115_v18 = vld [vmem:[%s8484_s14 + $0x60] sm:$0xe] }
 0x107   : > { %7737 = vmatmul.mubr.bf16.gmra.mrb[12].mxu1 %v8388_v26  ;;  %v7087_v17 = vcombine.low %v4782_v2, %v4792_v12  ;;  %v4806_v19 = vsel %vm8507_vm2, %v4801_v8, %v4805_v58  ;;  %v4811_v20 = vrot.slane %v4810_v9, 4  ;;  %v7105_v26 = vld [vmem:[%s8484_s14 + $0x38] sm:$0x1]  ;;  %v5310_v30 = vrot.slane %v5308_v21, 4  ;;  %v7117_v8 = vld [vmem:[%s8484_s14 + $0x68] sm:$0x1] }
 0x108   : > { %7740 = vmatprep.mubr.bf16.mxu1 %v8390_v36  ;;  %8010 = vmatpush3.bf16.msra.mxu1 %v8404_v50  ;;  %v5305_v47 = vsel %vm8607_vm5, %v5303_v14, %v5304_v5  ;;  %v7147_v31 = vrot.slane %v7103_v22, 9  ;;  %v5315_v34 = vrot.slane %v7104_v25, 5  ;;  %v5318_v35 = vrot.slane %v7105_v26, 5  ;;  %v7106_v36 = vld [vmem:[%s8484_s14 + $0x3c] sm:$0xe]  ;;  %v8395_v15 = vld [vmem:[%s8484_s14 + $0xa8] sm:$0xff]  }
 0x109   : > { %8003 = vmatprep.subr.bf16.mxu1 %v8405_v7  ;;  %7944 = vmatprep.mubr.bf16.mxu0 %v7087_v17  ;;  %v4816_v28 = vsel %vm8507_vm2, %v4811_v20, %v4815_v10  ;;  %v7177_v29 = vcombine.low %v5302_v13, %v5305_v47  ;;  %v7148_v39 = vrot.slane %v7106_v36, 9  ;;  %v5322_v40 = vrot.slane %v7107_v37, 5  ;;  %v7111_v50 = vld [vmem:[%s8484_s14 + $0x50] sm:$0x1]  ;;  %v7113_v58 = vld [vmem:[%s8484_s14 + $0x58] sm:$0xf] }
 0x10a   : > { %v7088_v32 = vcombine.low %v4806_v19, %v4816_v28  ;;  %v5317_v27 = vrot.slane %v5315_v34, 4  ;;  %v5325_v43 = vrot.slane %v7108_v38, 5  ;;  %v5309_v44 = vsel %vm8607_vm5, %v7146_v23, %v5308_v21  ;;  %v7116_v5 = vld [vmem:[%s8484_s14 + $0x64] sm:$0xf]  ;;  %v7118_v13 = vld [vmem:[%s8484_s14 + $0x6c] sm:$0xe] }
 0x10b   : > { %v5312_v45 = vsel %vm8607_vm5, %v5310_v30, %v5311_v24  ;;  %v5324_v46 = vrot.slane %v5322_v40, 4  ;;  %v7149_v51 = vrot.slane %v7109_v41, 9  ;;  %v5316_v52 = vsel %vm8607_vm5, %v7147_v31, %v5315_v34  ;;  %v7119_v19 = vld [vmem:[%s8484_s14 + $0x70] sm:$0xf]  ;;  %v7120_v20 = vld [vmem:[%s8484_s14 + $0x74] sm:$0x1] }
 0x10c   : > { %8011 = vmatpush3.bf16.msra.mxu1 %v8405_v7  ;;  %v5319_v53 = vsel %vm8607_vm5, %v5317_v27, %v5318_v35  ;;  %v5329_v54 = vrot.slane %v7110_v49, 5  ;;  %v5332_v55 = vrot.slane %v7111_v50, 5  ;;  %v7178_v61 = vcombine.low %v5309_v44, %v5312_v45  ;;  %v8396_v23 = vld [vmem:[%s8484_s14 + $0xb4] sm:$0xff]   ;;  %v6769_v26 = vld [vmem:[%s8484_s14 + $0x6c] sm:$0xf] }
 0x10d   : > { %7945 = vmatmul.mubr.bf16.gmra.mrb[28].mxu0 %v7088_v32  ;;  %v9321_v56 = vsel %vm8607_vm5, %v7148_v39, %v5322_v40  ;;  %v7150_v63 = vrot.slane %v7112_v57, 9  ;;  %v7179_v0 = vcombine.low %v5316_v52, %v5319_v53  ;;  %v9325_v1 = vsel %vm8607_vm5, %v5324_v46, %v5325_v43  ;;  %v6770_v28 = vld [vmem:[%s8484_s14 + $0x70] sm:$0xf]  ;;  %v6771_v31 = vld [vmem:[%s8484_s14 + $0x74] sm:$0x1] }
 0x10e   : > { %7964 = vmatprep.mubr.bf16.mxu0 %v7177_v29  ;;  %v5331_v62 = vrot.slane %v5329_v54, 4  ;;  %v5336_v2 = vrot.slane %v7113_v58, 5  ;;  %v5339_v3 = vrot.slane %v7114_v59, 5  ;;  %v7151_v9 = vrot.slane %v7115_v18, 9  ;;  %v7121_v35 = vld [vmem:[%s8484_s14 + $0x78] sm:$0xe] }
 0x10f   : > { %7741 = vmatmul.mubr.bf16.gmra.mrb[16].mxu1 %v8391_v6  ;;  %v9331_v6 = vsel %vm8607_vm5, %v7149_v51, %v5329_v54  ;;  %v5343_v10 = vrot.slane %v7116_v5, 5  ;;  %v5346_v12 = vrot.slane %v7117_v8, 5  ;;  %v7180_v14 = vcombine.low %v9321_v56, %v9325_v1  ;;  %v7122_v40 = vld [vmem:[%s8484_s14 + $0x7c] sm:$0xf]  ;;  %v7123_v27 = vld [vmem:[%s8484_s14 + $0x80] sm:$0x1] }
 0x110   : > { %7744 = vmatprep.mubr.bf16.mxu1 %v8392_v16  ;;  %v9335_v7 = vsel %vm8607_vm5, %v5331_v62, %v5332_v55  ;;  %v9340_v60 = vsel %vm8607_vm5, %v7150_v63, %v5336_v2  ;;  %v5338_v11 = vrot.slane %v5336_v2, 4  ;;  %v7152_v21 = vrot.slane %v7118_v13, 9  ;;  %v6772_v45 = vld [vmem:[%s8484_s14 + $0x78] sm:$0xf]  ;;  %v6773_v51 = vld [vmem:[%s8484_s14 + $0x7c] sm:$0xf] }
 0x111   : > { %v9348_v16 = vsel %vm8607_vm5, %v7151_v9, %v5343_v10  ;;  %v5345_v17 = vrot.slane %v5343_v10, 4  ;;  %v7181_v22 = vcombine.low %v9331_v6, %v9335_v7  ;;  %v5350_v24 = vrot.slane %v7119_v19, 5  ;;  %v6774_v57 = vld [vmem:[%s8484_s14 + $0x80] sm:$0x1]  ;;  %v7124_v62 = vld [vmem:[%s8484_s14 + $0x84] sm:$0xe] }
 0x112   : > { %v9356_v47 = vsel %vm8607_vm5, %v5338_v11, %v5339_v3  ;;  %v5353_v25 = vrot.slane %v7120_v20, 5  ;;  %v2763_v32 = vshrl.u32 %v6769_v26, 16  ;;  %v2766_v34 = vshll.u32 %v6769_v26, 16  ;;  %v7125_v3 = vld [vmem:[%s8484_s14 + $0x88] sm:$0xf]  ;;  %v8397_v9 = vld [vmem:[%s8484_s14 + $0xc0] sm:$0xff]  }
 0x113   : > { %v7182_v29 = vcombine.low %v9340_v60, %v9356_v47  ;;  %v9365_v30 = vsel %vm8607_vm5, %v5345_v17, %v5346_v12  ;;  %v9373_v37 = vsel %vm8607_vm5, %v7152_v21, %v5350_v24  ;;  %v5352_v38 = vrot.slane %v5350_v24, 4  ;;  %v7126_v8 = vld [vmem:[%s8484_s14 + $0x8c] sm:$0x1]  ;;  %v6776_v21 = vld [vmem:[%s8484_s14 + $0x88] sm:$0xf] }
 0x114   : > { %v7183_v36 = vcombine.low %v9348_v16, %v9365_v30  ;;  %v2772_v39 = vshll.u32 %v6770_v28, 16  ;;  %v2768_v43 = vrot.slane %v2766_v34, 5  ;;  %v2776_v41 = vshrl.u32 %v6770_v28, 16 }
 0x115   : > { %7965 = vmatmul.mubr.bf16.vlgmr.msra.gmra.mrb[0].mxu0 %v7178_v61  ;;  %v2782_v44 = vshll.u32 %v6771_v31, 16  ;;  %v9380_v46 = vsel %vm8607_vm5, %v5352_v38, %v5353_v25  ;;  %v7153_v49 = vrot.slane %v7121_v35, 9  ;;  %v5357_v50 = vrot.slane %v7122_v40, 5  ;;  %v6777_v31 = vld [vmem:[%s8484_s14 + $0x8c] sm:$0x1] }
 0x116   : > { %7968 = vmatprep.mubr.bf16.mxu0 %v7179_v0  ;;  %v7184_v52 = vcombine.low %v9373_v37, %v9380_v46  ;;  %v2778_v54 = vrot.slane %v2776_v41, 4  ;;  %v5360_v61 = vrot.slane %v7123_v27, 5  ;;  %v2787_v56 = vshrl.u32 %v6772_v45, 16  ;;  %v7127_v27 = vld [vmem:[%s8484_s14 + $0x90] sm:$0xe] }
 0x117   : > { %7745 = vmatmul.mubr.bf16.gmra.mrb[20].mxu1 %v8393_v42  ;;  %v2765_v42 = vrot.slane %v2763_v32, 4  ;;  %v2784_v55 = vrot.slane %v2782_v44, 5  ;;  %v9388_v58 = vsel %vm8607_vm5, %v7153_v49, %v5357_v50  ;;  %v5359_v59 = vrot.slane %v5357_v50, 4 }
 0x118   : > { %7748 = vmatprep.mubr.bf16.mxu1 %v8394_v48  ;;  %v2774_v48 = vrot.slane %v2772_v39, 5  ;;  %v2790_v1 = vshll.u32 %v6772_v45, 16  ;;  %v2796_v2 = vshll.u32 %v6773_v51, 16  ;;  %v2789_v5 = vrot.slane %v2787_v56, 4  ;;  %v7128_v45 = vld [vmem:[%s8484_s14 + $0x94] sm:$0xf] }
 0x119   : > { %v2769_v53 = vor.u32 %v2768_v43, %v2765_v42  ;;  %v9394_v18 = vsel %vm8607_vm5, %v5359_v59, %v5360_v61  ;;  %v2800_v6 = vshrl.u32 %v6773_v51, 16  ;;  %v2806_v7 = vshll.u32 %v6774_v57, 16  ;;  %v6779_v57 = vld [vmem:[%s8484_s14 + $0x94] sm:$0xf] }
 0x11a   : > { %v2779_v0 = vor.u32 %v2778_v54, %v2774_v48  ;;  %v7185_v12 = vcombine.low %v9388_v58, %v9394_v18  ;;  %v2792_v13 = vrot.slane %v2790_v1, 5  ;;  %v7154_v20 = vrot.slane %v7124_v62, 9  ;;  %v6778_v54 = vld [vmem:[%s8484_s14 + $0x90] sm:$0xf]  ;;  %v7130_v1 = vld [vmem:[%s8484_s14 + $0x9c] sm:$0xe] }
 0x11b   : > { %v2770_v63 = vrot.slane %v2769_v53, 4  ;;  %v2802_v17 = vrot.slane %v2800_v6, 4  ;;  %v2808_v19 = vrot.slane %v2806_v7, 5  ;;  %v5364_v24 = vrot.slane %v7125_v3, 5  ;;  %v7129_v53 = vld [vmem:[%s8484_s14 + $0x98] sm:$0x1] }
 0x11c   : > { %v2780_v11 = vrot.slane %v2779_v0, 4  ;;  %v5367_v25 = vrot.slane %v7126_v8, 5  ;;  %v2820_v40 = vshll.u32 %v6776_v21, 16  ;;  %v2824_v44 = vshrl.u32 %v6776_v21, 16  ;;  %v7131_v7 = vld [vmem:[%s8484_s14 + $0xa0] sm:$0xf] }
 0x11d   : > { %7969 = vmatmul.mubr.bf16.gmra.mrb[4].mxu0 %v7180_v14  ;;  %v2775_v10 = vsel %vm8507_vm2, %v2770_v63, %v2774_v48  ;;  %v6775_v14 = vld [vmem:[%s8484_s14 + $0x84] sm:$0xf]  ;;  %v9409_v38 = vsel %vm8607_vm5, %v7154_v20, %v5364_v24  ;;  %v5366_v39 = vrot.slane %v5364_v24, 4  ;;  %v2830_v51 = vshll.u32 %v6777_v31, 16  ;;  %v6780_v63 = vld [vmem:[%s8484_s14 + $0x98] sm:$0x1] }
 0x11e   : > { %7972 = vmatprep.mubr.bf16.mxu0 %v7181_v22  ;;  %v2785_v22 = vsel %vm8507_vm2, %v2780_v11, %v2784_v55  ;;  %v2811_v32 = vshrl.u32 %v6775_v14, 16  ;;  %v2814_v34 = vshll.u32 %v6775_v14, 16  ;;  %v2822_v50 = vrot.slane %v2820_v40, 5  ;;  %v6781_v20 = vld [vmem:[%s8484_s14 + $0x9c] sm:$0xf] }
 0x11f   : > { %7749 = vmatmul.mubr.bf16.gmra.mrb[24].mxu1 %v8395_v15  ;;  %v2798_v15 = vrot.slane %v2796_v2, 5  ;;  %v6817_v26 = vcombine.low %v2775_v10, %v2785_v22  ;;  %v9420_v49 = vsel %vm8607_vm5, %v5366_v39, %v5367_v25  ;;  %v2826_v55 = vrot.slane %v2824_v44, 4  ;;  %v6782_v25 = vld [vmem:[%s8484_s14 + $0xa0] sm:$0xf]  ;;  %v6783_v39 = vld [vmem:[%s8484_s14 + $0xa4] sm:$0x1] }
 0x120   : > { %7752 = vmatprep.mubr.bf16.mxu1 %v8396_v23  ;;  %v2793_v23 = vor.u32 %v2792_v13, %v2789_v5  ;;  %v2813_v43 = vrot.slane %v2811_v32, 4  ;;  %v2816_v41 = vrot.slane %v2814_v34, 5  ;;  %v7186_v47 = vcombine.low %v9409_v38, %v9420_v49  ;;  %v7132_v13 = vld [vmem:[%s8484_s14 + $0xa4] sm:$0x1]  ;;  %v7134_v44 = vld [vmem:[%s8484_s14 + $0xac] sm:$0xf] }
 0x121   : > { %v2803_v28 = vor.u32 %v2802_v17, %v2798_v15  ;;  %v2832_v61 = vrot.slane %v2830_v51, 5  ;;  %v7155_v56 = vrot.slane %v7127_v27, 9  ;;  %v5371_v62 = vrot.slane %v7128_v45, 5 }
 0x122   : > { %v2794_v35 = vrot.slane %v2793_v23, 4  ;;  %v2827_v16 = vor.u32 %v2826_v55, %v2822_v50  ;;  %v5374_v30 = vrot.slane %v7129_v53, 5  ;;  %v2838_v5 = vshll.u32 %v6778_v54, 16  ;;  %v7135_v53 = vld [vmem:[%s8484_s14 + $0xb0] sm:$0x1] }
 0x123   : > { %v2804_v42 = vrot.slane %v2803_v28, 4  ;;  %v9436_v2 = vsel %vm8607_vm5, %v7155_v56, %v5371_v62  ;;  %v5373_v3 = vrot.slane %v5371_v62, 4  ;;  %v2844_v6 = vshll.u32 %v6779_v57, 16 }
 0x124   : > { %v2799_v48 = vsel %vm8507_vm2, %v2794_v35, %v2798_v15  ;;  %v2848_v11 = vshrl.u32 %v6779_v57, 16  ;;  %v2840_v15 = vrot.slane %v2838_v5, 5  ;;  %v7156_v24 = vrot.slane %v7130_v1, 9 }
 0x125   : > { %7973 = vmatmul.mubr.bf16.gmra.mrb[8].mxu0 %v7182_v29  ;;  %v2809_v60 = vsel %vm8507_vm2, %v2804_v42, %v2808_v19  ;;  %v2817_v29 = vor.u32 %v2816_v41, %v2813_v43  ;;  %v5375_v14 = vsel %vm8607_vm5, %v5373_v3, %v5374_v30  ;;  %v2846_v17 = vrot.slane %v2844_v6, 5  ;;  %v7133_v43 = vld [vmem:[%s8484_s14 + $0xa8] sm:$0xe] }
 0x126   : > { %7976 = vmatprep.mubr.bf16.mxu0 %v7183_v36  ;;  %v6818_v59 = vcombine.low %v2799_v48, %v2809_v60  ;;  %v2835_v36 = vshrl.u32 %v6778_v54, 16  ;;  %v2854_v19 = vshll.u32 %v6780_v63, 16  ;;  %v7187_v22 = vcombine.low %v9436_v2, %v5375_v14  ;;  %v6784_v54 = vld [vmem:[%s8484_s14 + $0xa8] sm:$0xf]  ;;  %v7136_v2 = vld [vmem:[%s8484_s14 + $0xb4] sm:$0xe] }
 0x127   : > { %7753 = vmatmul.mubr.bf16.gmra.mrb[28].mxu1 %v8397_v9  ;;  %v2818_v0 = vrot.slane %v2817_v29, 4  ;;  %v2828_v9 = vrot.slane %v2827_v16, 4  ;;  %v2850_v23 = vrot.slane %v2848_v11, 4  ;;  %v5378_v32 = vrot.slane %v7131_v7, 5  ;;  %v7138_v14 = vld [vmem:[%s8484_s14 + $0xbc] sm:$0x1] }
 0x128   : > { %7788 = vmatprep.mubr.bf16.mxu1 %v6817_v26  ;;  %v2837_v10 = vrot.slane %v2835_v36, 4  ;;  %v2856_v31 = vrot.slane %v2854_v19, 5  ;;  %v5381_v35 = vrot.slane %v7132_v13, 5  ;;  %v2859_v40 = vshrl.u32 %v6781_v20, 16 }
 0x129   : > { %v2823_v8 = vsel %vm8507_vm2, %v2818_v0, %v2822_v50  ;;  %v2833_v21 = vsel %vm8507_vm2, %v2828_v9, %v2832_v61  ;;  %v2851_v34 = vor.u32 %v2850_v23, %v2846_v17  ;;  %v2862_v27 = vshll.u32 %v6781_v20, 16  ;;  %v6786_v0 = vld [vmem:[%s8484_s14 + $0xb0] sm:$0x1]  ;;  %v6788_v23 = vld [vmem:[%s8484_s14 + $0xb8] sm:$0xf] }
 0x12a   : > { %v6819_v26 = vcombine.low %v2823_v8, %v2833_v21  ;;  %v2841_v28 = vor.u32 %v2840_v15, %v2837_v10  ;;  %v9458_v46 = vsel %vm8607_vm5, %v7156_v24, %v5378_v32  ;;  %v2868_v42 = vshll.u32 %v6782_v25, 16  ;;  %v7137_v8 = vld [vmem:[%s8484_s14 + $0xb8] sm:$0xf] }
 0x12b   : > { %v2852_v58 = vrot.slane %v2851_v34, 4  ;;  %v2861_v18 = vrot.slane %v2859_v40, 4  ;;  %v2872_v41 = vshrl.u32 %v6782_v25, 16  ;;  %v2878_v51 = vshll.u32 %v6783_v39, 16  ;;  %v6789_v34 = vld [vmem:[%s8484_s14 + $0xbc] sm:$0x1] }
 0x12c   : > { %v2842_v37 = vrot.slane %v2841_v28, 4  ;;  %v2870_v50 = vrot.slane %v2868_v42, 5  ;;  %v7157_v62 = vrot.slane %v7133_v43, 9  ;;  %v5385_v63 = vrot.slane %v7134_v44, 5 }
 0x12d   : > { %7977 = vmatmul.mubr.bf16.gmra.mrb[12].mxu0 %v7184_v52  ;;  %v5380_v52 = vrot.slane %v5378_v32, 4  ;;  %v2857_v60 = vsel %vm8507_vm2, %v2852_v58, %v2856_v31  ;;  %v2874_v57 = vrot.slane %v2872_v41, 4  ;;  %v2880_v56 = vrot.slane %v2878_v51, 5  ;;  %v6790_v51 = vld [vmem:[%s8484_s14 + $0xc0] sm:$0xf] }
 0x12e   : > { %7980 = vmatprep.mubr.bf16.mxu0 %v7185_v12  ;;  %v2864_v12 = vrot.slane %v2862_v27, 5  ;;  %v2847_v45 = vsel %vm8507_vm2, %v2842_v37, %v2846_v17  ;;  %v5388_v36 = vrot.slane %v7135_v53, 5  ;;  %v2883_v1 = vshrl.u32 %v6784_v54, 16  ;;  %v6787_v17 = vld [vmem:[%s8484_s14 + $0xb4] sm:$0xf] }
 0x12f   : > { %7789 = vmatmul.mubr.bf16.vlgmr.msra.gmra.mrb[16].mxu1 %v6818_v59  ;;  %v9466_v48 = vsel %vm8607_vm5, %v5380_v52, %v5381_v35  ;;  %v6785_v59 = vld [vmem:[%s8484_s14 + $0xac] sm:$0xf]  ;;  %v6820_v61 = vcombine.low %v2847_v45, %v2857_v60  ;;  %v2875_v30 = vor.u32 %v2874_v57, %v2870_v50  ;;  %v5386_v3 = vsel %vm8607_vm5, %v7157_v62, %v5385_v63  ;;  %v7139_v52 = vld [vmem:[%s8484_s14 + $0xc0] sm:$0xe] }
 0x130   : > { %7792 = vmatprep.mubr.bf16.mxu1 %v6819_v26  ;;  %v7188_v29 = vcombine.low %v9458_v46, %v9466_v48  ;;  %v2865_v55 = vor.u32 %v2864_v12, %v2861_v18  ;;  %v5387_v5 = vrot.slane %v5385_v63, 4  ;;  %v2886_v6 = vshll.u32 %v6784_v54, 16  ;;  %v7140_v12 = vld [vmem:[%s8484_s14 + $0xc4] sm:$0xf] }
 0x131   : > { %v2892_v7 = vshll.u32 %v6785_v59, 16  ;;  %v2876_v10 = vrot.slane %v2875_v30, 4  ;;  %v2885_v11 = vrot.slane %v2883_v1, 4  ;;  %v2896_v13 = vshrl.u32 %v6785_v59, 16 }
 0x132   : > { %v2866_v16 = vrot.slane %v2865_v55, 4  ;;  %v5389_v38 = vsel %vm8607_vm5, %v5387_v5, %v5388_v36  ;;  %v2888_v49 = vrot.slane %v2886_v6, 5  ;;  %v2902_v15 = vshll.u32 %v6786_v0, 16  ;;  %v7142_v5 = vld [vmem:[%s8484_s14 + $0xcc] sm:$0xe] }
 0x133   : > { %v2881_v19 = vsel %vm8507_vm2, %v2876_v10, %v2880_v56  ;;  %v7189_v20 = vcombine.low %v5386_v3, %v5389_v38  ;;  %v2898_v21 = vrot.slane %v2896_v13, 4  ;;  %v5392_v28 = vrot.slane %v7137_v8, 5  ;;  %v7143_v10 = vld [vmem:[%s8484_s14 + $0xd0] sm:$0xf] }
 0x134   : > { %v2871_v9 = vsel %vm8507_vm2, %v2866_v16, %v2870_v50  ;;  %v2889_v25 = vor.u32 %v2888_v49, %v2885_v11  ;;  %v2904_v26 = vrot.slane %v2902_v15, 5  ;;  %v5395_v32 = vrot.slane %v7138_v14, 5  ;;  %v7141_v50 = vld [vmem:[%s8484_s14 + $0xc8] sm:$0x1]  ;;  %v7144_v49 = vld [vmem:[%s8484_s14 + $0xd4] sm:$0x1] }
 0x135   : > { %7981 = vmatmul.mubr.bf16.gmra.mrb[16].mxu0 %v7186_v47  ;;  %v2894_v47 = vrot.slane %v2892_v7, 5  ;;  %v6821_v24 = vcombine.low %v2871_v9, %v2881_v19  ;;  %v2907_v35 = vshrl.u32 %v6787_v17, 16  ;;  %v2910_v39 = vshll.u32 %v6787_v17, 16  ;;  %v6792_v16 = vld [vmem:[%s8484_s14 + $0xc8] sm:$0x1] }
 0x136   : > { %7984 = vmatprep.mubr.bf16.mxu0 %v7187_v22  ;;  %v7158_v22 = vrot.slane %v7136_v2, 9  ;;  %v2890_v40 = vrot.slane %v2889_v25, 4  ;;  %v5394_v37 = vrot.slane %v5392_v28, 4  ;;  %v2916_v46 = vshll.u32 %v6788_v23, 16 }
 0x137   : > { %7793 = vmatmul.mubr.bf16.gmra.mrb[20].mxu1 %v6820_v61  ;;  %v2899_v31 = vor.u32 %v2898_v21, %v2894_v47  ;;  %v2909_v43 = vrot.slane %v2907_v35, 4  ;;  %v2912_v58 = vrot.slane %v2910_v39, 5  ;;  %v2920_v18 = vshrl.u32 %v6788_v23, 16 }
 0x138   : > { %7796 = vmatprep.mubr.bf16.mxu1 %v6821_v24  ;;  %v5393_v27 = vsel %vm8607_vm5, %v7158_v22, %v5392_v28  ;;  %v2895_v41 = vsel %vm8507_vm2, %v2890_v40, %v2894_v47  ;;  %v5396_v44 = vsel %vm8607_vm5, %v5394_v37, %v5395_v32  ;;  %v2918_v45 = vrot.slane %v2916_v46, 5 }
 0x139   : > { %v2900_v42 = vrot.slane %v2899_v31, 4  ;;  %v2926_v48 = vshll.u32 %v6789_v34, 16  ;;  %v7190_v54 = vcombine.low %v5393_v27, %v5396_v44  ;;  %v2913_v60 = vor.u32 %v2912_v58, %v2909_v43 }
 0x13a   : > { %v2922_v55 = vrot.slane %v2920_v18, 4  ;;  %v7159_v61 = vrot.slane %v7139_v52, 9  ;;  %v5399_v56 = vrot.slane %v7140_v12, 5  ;;  %v5402_v0 = vrot.slane %v7141_v50, 5 }
 0x13b   : > { %v2905_v53 = vsel %vm8507_vm2, %v2900_v42, %v2904_v26  ;;  %v2928_v59 = vrot.slane %v2926_v48, 5  ;;  %v2914_v62 = vrot.slane %v2913_v60, 4  ;;  %v2931_v30 = vshrl.u32 %v6790_v51, 16  ;;  %v9610_v60 = vld [vmem:[%s9956_s2] ss:$0 sm:$0xff] }
 0x13c   : > { %v6822_v57 = vcombine.low %v2895_v41, %v2905_v53  ;;  %v2923_v63 = vor.u32 %v2922_v55, %v2918_v45  ;;  %v5400_v36 = vsel %vm8607_vm5, %v7159_v61, %v5399_v56  ;;  %v5401_v1 = vrot.slane %v5399_v56, 4 }
 0x13d   : > { %7985 = vmatmul.mubr.bf16.gmra.mrb[20].mxu0 %v7188_v29  ;;  %v6791_v29 = vld [vmem:[%s8484_s14 + $0xc4] sm:$0xf]  ;;  %v2934_v2 = vshll.u32 %v6790_v51, 16  ;;  %v2919_v6 = vsel %vm8507_vm2, %v2914_v62, %v2918_v45  ;;  %v2933_v8 = vrot.slane %v2931_v30, 4  ;;  %v2950_v38 = vshll.u32 %v6792_v16, 16 }
 0x13e   : > { %7988 = vmatprep.mubr.bf16.mxu0 %v7189_v20  ;;  %v2940_v3 = vshll.u32 %v6791_v29, 16  ;;  %v2924_v7 = vrot.slane %v2923_v63, 4  ;;  %v2944_v9 = vshrl.u32 %v6791_v29, 16  ;;  %v5403_v11 = vsel %vm8607_vm5, %v5401_v1, %v5402_v0 }
 0x13f   : > { %7797 = vmatmul.mubr.bf16.gmra.mrb[24].mxu1 %v6822_v57  ;;  %v2936_v13 = vrot.slane %v2934_v2, 5  ;;  %v7191_v15 = vcombine.low %v5400_v36, %v5403_v11  ;;  %v7160_v19 = vrot.slane %v7142_v5, 9  ;;  %v5406_v22 = vrot.slane %v7143_v10, 5 }
 0x140   : > { %v2942_v14 = vrot.slane %v2940_v3, 5  ;;  %v2929_v47 = vsel %vm8507_vm2, %v2924_v7, %v2928_v59  ;;  %v2946_v17 = vrot.slane %v2944_v9, 4  ;;  %v2952_v24 = vrot.slane %v2950_v38, 5 }
 0x141   : > { %v6823_v20 = vcombine.low %v2919_v6, %v2929_v47  ;;  %v2937_v21 = vor.u32 %v2936_v13, %v2933_v8  ;;  %v5409_v25 = vrot.slane %v7144_v49, 5  ;;  %v5407_v28 = vsel %vm8607_vm5, %v7160_v19, %v5406_v22 }
 0x142   : > { %v2947_v23 = vor.u32 %v2946_v17, %v2942_v14  ;;  %v5408_v31 = vrot.slane %v5406_v22, 4 }
 0x143   : > { %7800 = vmatprep.mubr.bf16.mxu1 %v6823_v20  ;;  %v2938_v26 = vrot.slane %v2937_v21, 4 }
 0x144   : > { %v2948_v32 = vrot.slane %v2947_v23, 4  ;;  %v5410_v35 = vsel %vm8607_vm5, %v5408_v31, %v5409_v25 }
 0x145   : > { %7989 = vmatmul.mubr.bf16.gmra.mrb[24].mxu0 %v7190_v54  ;;  %v2943_v34 = vsel %vm8507_vm2, %v2938_v26, %v2942_v14  ;;  %v7192_v40 = vcombine.low %v5407_v28, %v5410_v35  ;;  %v7234_v35 = vld [vmem:[%s9531_s16 + $0xc] sm:$0xf] }
 0x146   : > { %7992 = vmatprep.mubr.bf16.mxu0 %v7191_v15  ;;  %v2953_v39 = vsel %vm8507_vm2, %v2948_v32, %v2952_v24  ;;  %v7239_v24 = vld [vmem:[%s9531_s16 + $0x18] sm:$0xf] }
 0x147   : > { %v6824_v27 = vcombine.low %v2943_v34, %v2953_v39 }
 0x149   : > { %7801 = vmatmul.mubr.bf16.gmra.mrb[28].mxu1 %v6824_v27 }
 0x14d   : > { %7993 = vmatmul.mubr.bf16.gmra.mrb[28].mxu0 %v7192_v40 }
 0x1c2   : > { %v7726_v4 = vpop.f32.mrb[0].mxu1 }
 0x1c3   : > { %v2331_v37 = vpop.f32.mrb[1].mxu1 }
 0x1c4   : > { %v7727_v46 = vpop.f32.mrb[2].mxu1 }
 0x1c5   : > { %v2334_v52 = vpop.f32.mrb[3].mxu1 }
 0x1ca   : > { %v7730_v42 = vpop.f32.mrb[4].mxu1 }
 0x1cb   : > { %v2347_v43 = vpop.f32.mrb[5].mxu1 }
 0x1cc   : > { %v9587_v58 = vpop.f32.mrb[6].mxu1 }
 0x1cd   : > { %v9589_v18 = vpop.f32.mrb[7].mxu1 }
 0x1d2   : > { %v9591_v12 = vpop.f32.mrb[8].mxu1 }
 0x1d3   : > { %v9593_v41 = vpop.f32.mrb[9].mxu1 }
 0x1d4   : > { %v9595_v44 = vpop.f32.mrb[10].mxu1 }
 0x1d5   : > { %v9597_v45 = vpop.f32.mrb[11].mxu1 }
 0x1da   : > { %v9599_v48 = vpop.f32.mrb[12].mxu1 }
 0x1db   : > { %v9601_v50 = vpop.f32.mrb[13].mxu1 }
 0x1dc   : > { %v9603_v51 = vpop.f32.mrb[14].mxu1 }
 0x1dd   : > { %v9605_v53 = vpop.f32.mrb[15].mxu1 }
 0x1e8   : > { %v7966_v54 = vpop.f32.mrb[0].mxu0 }
 0x1e9   : > { %v8012_v55 = vadd.f32 %v7966_v54, %v7726_v4  ;;  %v5606_v29 = vpop.f32.mrb[1].mxu0 }
 0x1ea   : > { %v8013_v57 = vadd.f32 %v5606_v29, %v2331_v37  ;;  %v7967_v59 = vpop.f32.mrb[2].mxu0  ;;  %v7237_v29 = vld [vmem:[%s9531_s16 + $0x14] sm:$0x1] }
 0x1eb   : > { %v5838_v61 = vadd.f32 %v8012_v55, %v9610_v60  ;;  %v8014_v56 = vadd.f32 %v7967_v59, %v7727_v46  ;;  %v5609_v62 = vpop.f32.mrb[3].mxu0  ;;  %v7242_v46 = vld [vmem:[%s9531_s16 + $0x20] sm:$0x1] }
 0x1ec   : > { %v5836_v63 = vadd.f32 %v8013_v57, %v9610_v60  ;;  %v8015_v0 = vadd.f32 %v5609_v62, %v2334_v52 }
 0x1ed   : > { %v5870_v16 = vmax.f32 %v5838_v61, 0.0  ;;  %v5839_v30 = vadd.f32 %v8014_v56, %v9610_v60 }
 0x1ee   : > { %v5868_v36 = vmax.f32 %v5836_v63, 0.0  ;;  %v5837_v1 = vadd.f32 %v8015_v0, %v9610_v60 }
 0x1ef   : > { %v7318_v2 = vpack.c.bf16 %v5870_v16, %v5870_v16  ;;  %v5871_v3 = vmax.f32 %v5839_v30, 0.0 }
 0x1f0   : > { %v7316_v5 = vpack.c.bf16 %v5868_v36, %v5868_v36  ;;  %v5869_v6 = vmax.f32 %v5837_v1, 0.0  ;;  %v7970_v7 = vpop.f32.mrb[4].mxu0 }
 0x1f1   : > { %v6071_v8 = vshrl.u32 %v7318_v2, 16  ;;  %v6074_v9 = vshll.u32 %v7318_v2, 16  ;;  %v7319_v10 = vpack.c.bf16 %v5871_v3, %v5871_v3  ;;  %v8016_v11 = vadd.f32 %v7970_v7, %v7730_v42  ;;  %v5622_v13 = vpop.f32.mrb[5].mxu0 }
 0x1f2   : > { %v6054_v14 = vshrl.u32 %v7316_v5, 16  ;;  %v6057_v38 = vshll.u32 %v7316_v5, 16  ;;  %v7317_v49 = vpack.c.bf16 %v5869_v6, %v5869_v6  ;;  %v8017_v47 = vadd.f32 %v5622_v13, %v2347_v43  ;;  %v7971_v15 = vpop.f32.mrb[6].mxu0 }
 0x1f3   : > { %v6073_v17 = vrot.slane %v6071_v8, 7  ;;  %v6079_v19 = vshrl.u32 %v7319_v10, 16  ;;  %v6082_v20 = vshll.u32 %v7319_v10, 16  ;;  %v5842_v21 = vadd.f32 %v8016_v11, %v9610_v60  ;;  %v5625_v22 = vpop.f32.mrb[7].mxu0 }
 0x1f4   : > { %v6056_v25 = vrot.slane %v6054_v14, 7  ;;  %v6062_v26 = vshrl.u32 %v7317_v49, 16  ;;  %v6065_v28 = vshll.u32 %v7317_v49, 16  ;;  %v5840_v31 = vadd.f32 %v8017_v47, %v9610_v60  ;;  %v7249_v14 = vld [vmem:[%s9531_s16 + $0x30] sm:$0xf] }
 0x1f5   : > { %v6076_v32 = vor.u32 %v6074_v9, %v6073_v17  ;;  %v6077_v34 = vrot.slane %v6073_v17, 4  ;;  %v6081_v40 = vrot.slane %v6079_v19, 7  ;;  %v5874_v27 = vmax.f32 %v5842_v21, 0.0 }
 0x1f6   : > { %v6059_v33 = vor.u32 %v6057_v38, %v6056_v25  ;;  %v6060_v4 = vrot.slane %v6056_v25, 4  ;;  %v6064_v52 = vrot.slane %v6062_v26, 7  ;;  %v5872_v42 = vmax.f32 %v5840_v31, 0.0 }
 0x1f7   : > { %v6387_v43 = vsel %vm9619_vm11, %v6076_v32, %v7239_v24  ;;  %v6084_v54 = vor.u32 %v6082_v20, %v6081_v40  ;;  %v6086_v55 = vrot.slane %v6081_v40, 4  ;;  %v7322_v57 = vpack.c.bf16 %v5874_v27, %v5874_v27 }
 0x1f8   : > { %7240 = vst [vmem:[%s9531_s16 + $0x18] sm:$0xf] %v6387_v43  ;;  %v6378_v59 = vsel %vm9619_vm11, %v6059_v33, %v7234_v35  ;;  %v6067_v61 = vor.u32 %v6065_v28, %v6064_v52  ;;  %v6069_v56 = vrot.slane %v6064_v52, 4  ;;  %v7320_v62 = vpack.c.bf16 %v5872_v42, %v5872_v42  ;;  %v7974_v63 = vpop.f32.mrb[8].mxu0 }
 0x1f9   : > { %7235 = vst [vmem:[%s9531_s16 + $0xc] sm:$0xf] %v6378_v59  ;;  %v6085_v0 = vsel %vm9628_vm12, %v6077_v34, %v6084_v54  ;;  %v6391_v16 = vsel %vm9634_vm13, %v6086_v55, %v7242_v46  ;;  %v6105_v30 = vshrl.u32 %v7322_v57, 16  ;;  %v6108_v36 = vshll.u32 %v7322_v57, 16  ;;  %v5638_v1 = vpop.f32.mrb[9].mxu0 }
 0x1fa   : > { %7241 = vst [vmem:[%s9531_s16 + $0x1c] sm:$0xf] %v6085_v0  ;;  %7243 = vst [vmem:[%s9531_s16 + $0x20] sm:$0x1] %v6391_v16  ;;  %v6068_v2 = vsel %vm9628_vm12, %v6060_v4, %v6067_v61  ;;  %v6384_v3 = vsel %vm9634_vm13, %v6069_v56, %v7237_v29  ;;  %v6088_v5 = vshrl.u32 %v7320_v62, 16  ;;  %v6091_v6 = vshll.u32 %v7320_v62, 16 }
 0x1fb   : > { %v7975_v7 = vpop.f32.mrb[10].mxu0  ;;  %7236 = vst [vmem:[%s9531_s16 + $0x10] sm:$0xf] %v6068_v2  ;;  %7238 = vst [vmem:[%s9531_s16 + $0x14] sm:$0x1] %v6384_v3  ;;  %v9658_v8 = vrot.slane %v6105_v30, 7  ;;  %v8018_v9 = vadd.f32 %v7971_v15, %v9587_v58  ;;  %v8019_v10 = vadd.f32 %v5625_v22, %v9589_v18  ;;  %v8020_v11 = vadd.f32 %v7974_v63, %v9591_v12 }
 0x1fc   : > { %v5641_v13 = vpop.f32.mrb[11].mxu0  ;;  %v9664_v38 = vrot.slane %v6088_v5, 7  ;;  %v8021_v49 = vadd.f32 %v5638_v1, %v9593_v41  ;;  %v8022_v47 = vadd.f32 %v7975_v7, %v9595_v44  ;;  %v7244_v58 = vld [vmem:[%s9531_s16 + $0x24] sm:$0xf]  ;;  %v7247_v7 = vld [vmem:[%s9531_s16 + $0x2c] sm:$0x1] }
 0x1fd   : > { %v8023_v17 = vadd.f32 %v5641_v13, %v9597_v45  ;;  %v6110_v19 = vor.u32 %v6108_v36, %v9658_v8  ;;  %v6111_v20 = vrot.slane %v9658_v8, 4  ;;  %v5843_v18 = vadd.f32 %v8018_v9, %v9610_v60 }
 0x1fe   : > { %v5841_v12 = vadd.f32 %v8019_v10, %v9610_v60  ;;  %v6093_v15 = vor.u32 %v6091_v6, %v9664_v38  ;;  %v6094_v21 = vrot.slane %v9664_v38, 4  ;;  %v5846_v41 = vadd.f32 %v8020_v11, %v9610_v60  ;;  %v7252_v6 = vld [vmem:[%s9531_s16 + $0x38] sm:$0x1] }
 0x1ff   : > { %v5844_v44 = vadd.f32 %v8021_v49, %v9610_v60  ;;  %v6401_v22 = vsel %vm9619_vm11, %v6110_v19, %v7249_v14  ;;  %v5875_v24 = vmax.f32 %v5843_v18, 0.0  ;;  %v5847_v26 = vadd.f32 %v8022_v47, %v9610_v60  ;;  %v7259_v47 = vld [vmem:[%s9531_s16 + $0x48] sm:$0xf] }
 0x200   : > { %v5873_v25 = vmax.f32 %v5841_v12, 0.0  ;;  %7250 = vst [vmem:[%s9531_s16 + $0x30] sm:$0xf] %v6401_v22  ;;  %v6394_v31 = vsel %vm9619_vm11, %v6093_v15, %v7244_v58  ;;  %v5878_v32 = vmax.f32 %v5846_v41, 0.0  ;;  %v5845_v35 = vadd.f32 %v8023_v17, %v9610_v60  ;;  %v7978_v40 = vpop.f32.mrb[12].mxu0 }
 0x201   : > { %v5876_v34 = vmax.f32 %v5844_v44, 0.0  ;;  %7245 = vst [vmem:[%s9531_s16 + $0x24] sm:$0xf] %v6394_v31  ;;  %v7323_v33 = vpack.c.bf16 %v5875_v24, %v5875_v24  ;;  %v5879_v46 = vmax.f32 %v5847_v26, 0.0  ;;  %v8024_v52 = vadd.f32 %v7978_v40, %v9599_v48  ;;  %v5654_v42 = vpop.f32.mrb[13].mxu0 }
 0x202   : > { %v9678_v45 = vpop.f32.mrb[16].mxu1  ;;  %v7321_v4 = vpack.c.bf16 %v5873_v25, %v5873_v25  ;;  %v7326_v54 = vpack.c.bf16 %v5878_v32, %v5878_v32  ;;  %v5877_v29 = vmax.f32 %v5845_v35, 0.0  ;;  %v8025_v57 = vadd.f32 %v5654_v42, %v9601_v50  ;;  %v7979_v59 = vpop.f32.mrb[14].mxu0  ;;  %v7254_v17 = vld [vmem:[%s9531_s16 + $0x3c] sm:$0xf] }
 0x203   : > { %v9683_v28 = vpop.f32.mrb[17].mxu1  ;;  %v7324_v55 = vpack.c.bf16 %v5876_v34, %v5876_v34  ;;  %v6113_v61 = vshrl.u32 %v7323_v33, 16  ;;  %v6116_v56 = vshll.u32 %v7323_v33, 16  ;;  %v5657_v0 = vpop.f32.mrb[15].mxu0  ;;  %v7327_v3 = vpack.c.bf16 %v5879_v46, %v5879_v46 }
 0x204   : > { %v9689_v27 = vpop.f32.mrb[18].mxu1  ;;  %v6096_v62 = vshrl.u32 %v7321_v4, 16  ;;  %v6099_v63 = vshll.u32 %v7321_v4, 16  ;;  %v6139_v16 = vshrl.u32 %v7326_v54, 16  ;;  %v6142_v30 = vshll.u32 %v7326_v54, 16 }
 0x205   : > { %v9693_v43 = vpop.f32.mrb[19].mxu1  ;;  %v6122_v36 = vshrl.u32 %v7324_v55, 16  ;;  %v6125_v48 = vshll.u32 %v7324_v55, 16  ;;  %v6115_v1 = vrot.slane %v6113_v61, 7  ;;  %v7325_v5 = vpack.c.bf16 %v5877_v29, %v5877_v29  ;;  %v7262_v61 = vld [vmem:[%s9531_s16 + $0x50] sm:$0x1] }
 0x206   : > { %v6098_v2 = vrot.slane %v6096_v62, 7  ;;  %v6141_v50 = vrot.slane %v6139_v16, 7  ;;  %v5850_v10 = vadd.f32 %v8024_v52, %v9610_v60  ;;  %v5848_v11 = vadd.f32 %v8025_v57, %v9610_v60 }
 0x207   : > { %v9698_v9 = vrot.slane %v6122_v36, 7  ;;  %v6118_v13 = vor.u32 %v6116_v56, %v6115_v1  ;;  %v6120_v14 = vrot.slane %v6115_v1, 4  ;;  %v6147_v32 = vshrl.u32 %v7327_v3, 16 }
 0x208   : > { %v6101_v38 = vor.u32 %v6099_v63, %v6098_v2  ;;  %v6103_v49 = vrot.slane %v6098_v2, 4  ;;  %v6144_v19 = vor.u32 %v6142_v30, %v6141_v50  ;;  %v6145_v58 = vrot.slane %v6141_v50, 4  ;;  %v7982_v15 = vpop.f32.mrb[16].mxu0 }
 0x209   : > { %v6127_v18 = vor.u32 %v6125_v48, %v9698_v9  ;;  %v6128_v12 = vrot.slane %v9698_v9, 4  ;;  %v6119_v44 = vsel %vm9628_vm12, %v6111_v20, %v6118_v13  ;;  %v6405_v22 = vsel %vm9634_vm13, %v6120_v14, %v7252_v6  ;;  %v5670_v26 = vpop.f32.mrb[17].mxu0  ;;  %v7257_v48 = vld [vmem:[%s9531_s16 + $0x44] sm:$0x1]  ;;  %v7269_v13 = vld [vmem:[%s9531_s16 + $0x60] sm:$0xf] }
 0x20a   : > { %v9706_v41 = vpop.f32.mrb[20].mxu1  ;;  %v6102_v24 = vsel %vm9628_vm12, %v6094_v21, %v6101_v38  ;;  %v6398_v25 = vsel %vm9634_vm13, %v6103_v49, %v7247_v7  ;;  %7251 = vst [vmem:[%s9531_s16 + $0x34] sm:$0xf] %v6119_v44  ;;  %7253 = vst [vmem:[%s9531_s16 + $0x38] sm:$0x1] %v6405_v22  ;;  %v6415_v8 = vsel %vm9619_vm11, %v6144_v19, %v7259_v47  ;;  %v6150_v34 = vshll.u32 %v7327_v3, 16 }
 0x20b   : > { %v9718_v31 = vpop.f32.mrb[21].mxu1  ;;  %7246 = vst [vmem:[%s9531_s16 + $0x28] sm:$0xf] %v6102_v24  ;;  %7248 = vst [vmem:[%s9531_s16 + $0x2c] sm:$0x1] %v6398_v25  ;;  %v6408_v20 = vsel %vm9619_vm11, %v6127_v18, %v7254_v17  ;;  %v7983_v21 = vpop.f32.mrb[18].mxu0  ;;  %v8026_v55 = vadd.f32 %v7979_v59, %v9603_v51  ;;  %v8027_v29 = vadd.f32 %v5657_v0, %v9605_v53 }
 0x20c   : > { %v9728_v35 = vpop.f32.mrb[22].mxu1  ;;  %7260 = vst [vmem:[%s9531_s16 + $0x48] sm:$0xf] %v6415_v8  ;;  %7255 = vst [vmem:[%s9531_s16 + $0x3c] sm:$0xf] %v6408_v20  ;;  %v6130_v40 = vshrl.u32 %v7325_v5, 16  ;;  %v8028_v57 = vadd.f32 %v7982_v15, %v9678_v45  ;;  %v8029_v16 = vadd.f32 %v5670_v26, %v9683_v28  ;;  %v8030_v15 = vadd.f32 %v7983_v21, %v9689_v27 }
 0x20d   : > { %v6133_v33 = vshll.u32 %v7325_v5, 16  ;;  %v5882_v4 = vmax.f32 %v5850_v10, 0.0  ;;  %v5880_v46 = vmax.f32 %v5848_v11, 0.0  ;;  %v9732_v52 = vpop.f32.mrb[19].mxu0  ;;  %v9734_v42 = vpop.f32.mrb[23].mxu1  ;;  %v6149_v54 = vrot.slane %v6147_v32, 7 }
 0x20e   : > { %v6132_v56 = vrot.slane %v6130_v40, 7  ;;  %v5851_v1 = vadd.f32 %v8026_v55, %v9610_v60  ;;  %v5849_v2 = vadd.f32 %v8027_v29, %v9610_v60  ;;  %v5854_v49 = vadd.f32 %v8028_v57, %v9610_v60  ;;  %v7264_v18 = vld [vmem:[%s9531_s16 + $0x54] sm:$0xf] }
 0x20f   : > { %v7330_v62 = vpack.c.bf16 %v5882_v4, %v5882_v4  ;;  %v7328_v63 = vpack.c.bf16 %v5880_v46, %v5880_v46  ;;  %v6152_v30 = vor.u32 %v6150_v34, %v6149_v54  ;;  %v6154_v36 = vrot.slane %v6149_v54, 4 }
 0x210   : > { %v6135_v51 = vor.u32 %v6133_v33, %v6132_v56  ;;  %v6137_v53 = vrot.slane %v6132_v56, 4  ;;  %v7986_v6 = vpop.f32.mrb[20].mxu0  ;;  %v5883_v10 = vmax.f32 %v5851_v1, 0.0  ;;  %v5881_v38 = vmax.f32 %v5849_v2, 0.0 }
 0x211   : > { %v6173_v45 = vshrl.u32 %v7330_v62, 16  ;;  %v6176_v59 = vshll.u32 %v7330_v62, 16  ;;  %v6153_v0 = vsel %vm9628_vm12, %v6145_v58, %v6152_v30  ;;  %v6419_v28 = vsel %vm9634_vm13, %v6154_v36, %v7262_v61  ;;  %v9754_v11 = vpop.f32.mrb[21].mxu0  ;;  %v7272_v62 = vld [vmem:[%s9531_s16 + $0x68] sm:$0x1] }
 0x212   : > { %v6156_v3 = vshrl.u32 %v7328_v63, 16  ;;  %v6159_v5 = vshll.u32 %v7328_v63, 16  ;;  %7261 = vst [vmem:[%s9531_s16 + $0x4c] sm:$0xf] %v6153_v0  ;;  %7263 = vst [vmem:[%s9531_s16 + $0x50] sm:$0x1] %v6419_v28  ;;  %v6136_v7 = vsel %vm9628_vm12, %v6128_v12, %v6135_v51  ;;  %v6412_v50 = vsel %vm9634_vm13, %v6137_v53, %v7257_v48 }
 0x213   : > { %v6175_v9 = vrot.slane %v6173_v45, 7  ;;  %7256 = vst [vmem:[%s9531_s16 + $0x40] sm:$0xf] %v6136_v7  ;;  %7258 = vst [vmem:[%s9531_s16 + $0x44] sm:$0x1] %v6412_v50  ;;  %v5852_v47 = vadd.f32 %v8029_v16, %v9610_v60  ;;  %v9761_v17 = vpop.f32.mrb[22].mxu0  ;;  %v7331_v12 = vpack.c.bf16 %v5883_v10, %v5883_v10  ;;  %v7329_v25 = vpack.c.bf16 %v5881_v38, %v5881_v38 }
 0x214   : > { %v6158_v14 = vrot.slane %v6156_v3, 7  ;;  %v9765_v44 = vpop.f32.mrb[23].mxu0  ;;  %v5886_v26 = vmax.f32 %v5854_v49, 0.0  ;;  %v9767_v8 = vpop.f32.mrb[24].mxu1  ;;  %v5855_v57 = vadd.f32 %v8030_v15, %v9610_v60  ;;  %v8031_v61 = vadd.f32 %v9732_v52, %v9693_v43  ;;  %v7267_v51 = vld [vmem:[%s9531_s16 + $0x5c] sm:$0x1] }
 0x215   : > { %v6178_v19 = vor.u32 %v6176_v59, %v6175_v9  ;;  %v6179_v58 = vrot.slane %v6175_v9, 4  ;;  %v6181_v32 = vshrl.u32 %v7331_v12, 16  ;;  %v6184_v34 = vshll.u32 %v7331_v12, 16  ;;  %v9771_v33 = vpop.f32.mrb[25].mxu1  ;;  %v7274_v49 = vld [vmem:[%s9531_s16 + $0x6c] sm:$0xf] }
 0x216   : > { %v6161_v22 = vor.u32 %v6159_v5, %v6158_v14  ;;  %v6162_v24 = vrot.slane %v6158_v14, 4  ;;  %v5884_v40 = vmax.f32 %v5852_v47, 0.0  ;;  %v6164_v21 = vshrl.u32 %v7329_v25, 16  ;;  %v9776_v54 = vpop.f32.mrb[26].mxu1 }
 0x217   : > { %v6429_v20 = vsel %vm9619_vm11, %v6178_v19, %v7269_v13  ;;  %v6167_v4 = vshll.u32 %v7329_v25, 16  ;;  %v7334_v46 = vpack.c.bf16 %v5886_v26, %v5886_v26  ;;  %v6183_v55 = vrot.slane %v6181_v32, 7  ;;  %v9782_v56 = vpop.f32.mrb[27].mxu1 }
 0x218   : > { %7270 = vst [vmem:[%s9531_s16 + $0x60] sm:$0xf] %v6429_v20  ;;  %v6422_v27 = vsel %vm9619_vm11, %v6161_v22, %v7264_v18  ;;  %v7332_v29 = vpack.c.bf16 %v5884_v40, %v5884_v40  ;;  %v6166_v63 = vrot.slane %v6164_v21, 7  ;;  %v8032_v36 = vadd.f32 %v7986_v6, %v9706_v41  ;;  %v7990_v48 = vpop.f32.mrb[24].mxu0  ;;  %v7279_v6 = vld [vmem:[%s9531_s16 + $0x78] sm:$0xf] }
 0x219   : > { %7265 = vst [vmem:[%s9531_s16 + $0x54] sm:$0xf] %v6422_v27  ;;  %v6207_v16 = vshrl.u32 %v7334_v46, 16  ;;  %v6210_v30 = vshll.u32 %v7334_v46, 16  ;;  %v6186_v1 = vor.u32 %v6184_v34, %v6183_v55  ;;  %v6188_v2 = vrot.slane %v6183_v55, 4  ;;  %v9787_v59 = vpop.f32.mrb[25].mxu0 }
 0x21a   : > { %v6190_v53 = vshrl.u32 %v7332_v29, 16  ;;  %v6193_v45 = vshll.u32 %v7332_v29, 16  ;;  %v6169_v43 = vor.u32 %v6167_v4, %v6166_v63  ;;  %v6171_v52 = vrot.slane %v6166_v63, 4  ;;  %v9791_v3 = vpop.f32.mrb[26].mxu0 }
 0x21b   : > { %v9789_v0 = vrot.slane %v6207_v16, 7  ;;  %v5887_v28 = vmax.f32 %v5855_v57, 0.0  ;;  %v6187_v41 = vsel %vm9628_vm12, %v6179_v58, %v6186_v1  ;;  %v6433_v5 = vsel %vm9634_vm13, %v6188_v2, %v7272_v62  ;;  %v9801_v9 = vpop.f32.mrb[27].mxu0  ;;  %v7282_v57 = vld [vmem:[%s9531_s16 + $0x80] sm:$0x1] }
 0x21c   : > { %v9798_v7 = vrot.slane %v6190_v53, 7  ;;  %v5853_v50 = vadd.f32 %v8031_v61, %v9610_v60  ;;  %7271 = vst [vmem:[%s9531_s16 + $0x64] sm:$0xf] %v6187_v41  ;;  %7273 = vst [vmem:[%s9531_s16 + $0x68] sm:$0x1] %v6433_v5  ;;  %v6170_v10 = vsel %vm9628_vm12, %v6162_v24, %v6169_v43  ;;  %v6426_v13 = vsel %vm9634_vm13, %v6171_v52, %v7267_v51 }
 0x21d   : > { %v6212_v14 = vor.u32 %v6210_v30, %v9789_v0  ;;  %v6213_v38 = vrot.slane %v9789_v0, 4  ;;  %7266 = vst [vmem:[%s9531_s16 + $0x58] sm:$0xf] %v6170_v10  ;;  %7268 = vst [vmem:[%s9531_s16 + $0x5c] sm:$0x1] %v6426_v13  ;;  %v7335_v58 = vpack.c.bf16 %v5887_v28, %v5887_v28  ;;  %v5858_v15 = vadd.f32 %v8032_v36, %v9610_v60 }
 0x21e   : > { %v6195_v47 = vor.u32 %v6193_v45, %v9798_v7  ;;  %v6196_v19 = vrot.slane %v9798_v7, 4  ;;  %v5885_v18 = vmax.f32 %v5853_v50, 0.0  ;;  %v8033_v22 = vadd.f32 %v9754_v11, %v9718_v31  ;;  %v9831_v11 = vpop.f32.mrb[28].mxu1  ;;  %v7277_v51 = vld [vmem:[%s9531_s16 + $0x74] sm:$0x1] }
 0x21f   : > { %v6443_v12 = vsel %vm9619_vm11, %v6212_v14, %v7279_v6  ;;  %v8034_v24 = vadd.f32 %v9761_v17, %v9728_v35  ;;  %v6215_v26 = vshrl.u32 %v7335_v58, 16  ;;  %v6218_v20 = vshll.u32 %v7335_v58, 16  ;;  %v9836_v55 = vpop.f32.mrb[29].mxu1 }
 0x220   : > { %7280 = vst [vmem:[%s9531_s16 + $0x78] sm:$0xf] %v6443_v12  ;;  %v6436_v25 = vsel %vm9619_vm11, %v6195_v47, %v7274_v49  ;;  %v7333_v32 = vpack.c.bf16 %v5885_v18, %v5885_v18  ;;  %v5890_v34 = vmax.f32 %v5858_v15, 0.0  ;;  %v5856_v40 = vadd.f32 %v8033_v22, %v9610_v60  ;;  %v9833_v35 = vpop.f32.mrb[28].mxu0  ;;  %v7284_v22 = vld [vmem:[%s9531_s16 + $0x84] sm:$0xf] }
 0x221   : > { %7275 = vst [vmem:[%s9531_s16 + $0x6c] sm:$0xf] %v6436_v25  ;;  %v5859_v27 = vadd.f32 %v8034_v24, %v9610_v60  ;;  %v8035_v31 = vadd.f32 %v9765_v44, %v9734_v42  ;;  %v6217_v17 = vrot.slane %v6215_v26, 7  ;;  %v8036_v46 = vadd.f32 %v7990_v48, %v9767_v8  ;;  %v9838_v29 = vpop.f32.mrb[29].mxu0  ;;  %v9842_v44 = vpop.f32.mrb[30].mxu1 }
 0x222   : > { %v6198_v21 = vshrl.u32 %v7333_v32, 16  ;;  %v6201_v4 = vshll.u32 %v7333_v32, 16  ;;  %v7338_v61 = vpack.c.bf16 %v5890_v34, %v5890_v34  ;;  %v5888_v62 = vmax.f32 %v5856_v40, 0.0  ;;  %v9844_v16 = vpop.f32.mrb[30].mxu0  ;;  %v9847_v1 = vpop.f32.mrb[31].mxu1 }
 0x223   : > { %v5891_v63 = vmax.f32 %v5859_v27, 0.0  ;;  %v5857_v42 = vadd.f32 %v8035_v31, %v9610_v60  ;;  %v6220_v30 = vor.u32 %v6218_v20, %v6217_v17  ;;  %v6222_v36 = vrot.slane %v6217_v17, 4  ;;  %v9849_v2 = vpop.f32.mrb[31].mxu0  ;;  %v7292_v27 = vld [vmem:[%s9531_s16 + $0x98] sm:$0x1] }
 0x224   : > { %v6200_v8 = vrot.slane %v6198_v21, 7  ;;  %v5862_v48 = vadd.f32 %v8036_v46, %v9610_v60  ;;  %v6241_v53 = vshrl.u32 %v7338_v61, 16  ;;  %v6244_v45 = vshll.u32 %v7338_v61, 16 }
 0x225   : > { %v7336_v43 = vpack.c.bf16 %v5888_v62, %v5888_v62  ;;  %v7339_v52 = vpack.c.bf16 %v5891_v63, %v5891_v63  ;;  %v6221_v0 = vsel %vm9628_vm12, %v6213_v38, %v6220_v30  ;;  %v6447_v28 = vsel %vm9634_vm13, %v6222_v36, %v7282_v57  ;;  %v7289_v38 = vld [vmem:[%s9531_s16 + $0x90] sm:$0xf]  ;;  %v7287_v63 = vld [vmem:[%s9531_s16 + $0x8c] sm:$0x1] }
 0x226   : > { %v6203_v41 = vor.u32 %v6201_v4, %v6200_v8  ;;  %v6205_v5 = vrot.slane %v6200_v8, 4  ;;  %7281 = vst [vmem:[%s9531_s16 + $0x7c] sm:$0xf] %v6221_v0  ;;  %7283 = vst [vmem:[%s9531_s16 + $0x80] sm:$0x1] %v6447_v28  ;;  %v6243_v6 = vrot.slane %v6241_v53, 7  ;;  %v8038_v26 = vadd.f32 %v9791_v3, %v9776_v54 }
 0x227   : > { %v6224_v7 = vshrl.u32 %v7336_v43, 16  ;;  %v6227_v50 = vshll.u32 %v7336_v43, 16  ;;  %v6249_v10 = vshrl.u32 %v7339_v52, 16  ;;  %v6252_v49 = vshll.u32 %v7339_v52, 16  ;;  %v7299_v43 = vld [vmem:[%s9531_s16 + $0xa8] sm:$0xf] }
 0x228   : > { %v6204_v13 = vsel %vm9628_vm12, %v6196_v19, %v6203_v41  ;;  %v6440_v14 = vsel %vm9634_vm13, %v6205_v5, %v7277_v51  ;;  %v5889_v47 = vmax.f32 %v5857_v42, 0.0  ;;  %v6246_v58 = vor.u32 %v6244_v45, %v6243_v6 }
 0x229   : > { %7276 = vst [vmem:[%s9531_s16 + $0x70] sm:$0xf] %v6204_v13  ;;  %7278 = vst [vmem:[%s9531_s16 + $0x74] sm:$0x1] %v6440_v14  ;;  %v6247_v18 = vrot.slane %v6243_v6, 4  ;;  %v6226_v12 = vrot.slane %v6224_v7, 7  ;;  %v8037_v19 = vadd.f32 %v9787_v59, %v9771_v33  ;;  %v5863_v3 = vadd.f32 %v8038_v26, %v9610_v60 }
 0x22a   : > { %v6251_v15 = vrot.slane %v6249_v10, 7  ;;  %v7337_v24 = vpack.c.bf16 %v5889_v47, %v5889_v47  ;;  %v5894_v25 = vmax.f32 %v5862_v48, 0.0  ;;  %v6457_v20 = vsel %vm9619_vm11, %v6246_v58, %v7289_v38  ;;  %v7294_v47 = vld [vmem:[%s9531_s16 + $0x9c] sm:$0xf]  ;;  %v7302_v58 = vld [vmem:[%s9531_s16 + $0xb0] sm:$0x1] }
 0x22b   : > { %v6229_v32 = vor.u32 %v6227_v50, %v6226_v12  ;;  %v6230_v34 = vrot.slane %v6226_v12, 4  ;;  %7290 = vst [vmem:[%s9531_s16 + $0x90] sm:$0xf] %v6457_v20  ;;  %v5860_v59 = vadd.f32 %v8037_v19, %v9610_v60  ;;  %v5895_v30 = vmax.f32 %v5863_v3, 0.0 }
 0x22c   : > { %v6254_v40 = vor.u32 %v6252_v49, %v6251_v15  ;;  %v6256_v31 = vrot.slane %v6251_v15, 4  ;;  %v6232_v17 = vshrl.u32 %v7337_v24, 16  ;;  %v6235_v21 = vshll.u32 %v7337_v24, 16 }
 0x22d   : > { %v7342_v4 = vpack.c.bf16 %v5894_v25, %v5894_v25  ;;  %v6450_v33 = vsel %vm9619_vm11, %v6229_v32, %v7284_v22  ;;  %v5892_v42 = vmax.f32 %v5860_v59, 0.0  ;;  %v8039_v36 = vadd.f32 %v9801_v9, %v9782_v56 }
 0x22e   : > { %v6255_v54 = vsel %vm9628_vm12, %v6247_v18, %v6254_v40  ;;  %7285 = vst [vmem:[%s9531_s16 + $0x84] sm:$0xf] %v6450_v33  ;;  %v6461_v46 = vsel %vm9634_vm13, %v6256_v31, %v7292_v27  ;;  %v6234_v57 = vrot.slane %v6232_v17, 7  ;;  %v8040_v8 = vadd.f32 %v9833_v35, %v9831_v11 }
 0x22f   : > { %7291 = vst [vmem:[%s9531_s16 + $0x94] sm:$0xf] %v6255_v54  ;;  %v6275_v61 = vshrl.u32 %v7342_v4, 16  ;;  %v6278_v62 = vshll.u32 %v7342_v4, 16  ;;  %7293 = vst [vmem:[%s9531_s16 + $0x98] sm:$0x1] %v6461_v46  ;;  %v8041_v45 = vadd.f32 %v9838_v29, %v9836_v55  ;;  %v7340_v52 = vpack.c.bf16 %v5892_v42, %v5892_v42 }
 0x230   : > { %v6237_v48 = vor.u32 %v6235_v21, %v6234_v57  ;;  %v6239_v51 = vrot.slane %v6234_v57, 4  ;;  %v7343_v0 = vpack.c.bf16 %v5895_v30, %v5895_v30  ;;  %v5861_v28 = vadd.f32 %v8039_v36, %v9610_v60  ;;  %v7297_v21 = vld [vmem:[%s9531_s16 + $0xa4] sm:$0x1]  ;;  %v7309_v4 = vld [vmem:[%s9531_s16 + $0xc0] sm:$0xf] }
 0x231   : > { %v6277_v53 = vrot.slane %v6275_v61, 7  ;;  %v5866_v41 = vadd.f32 %v8040_v8, %v9610_v60  ;;  %v6258_v35 = vshrl.u32 %v7340_v52, 16  ;;  %v6261_v55 = vshll.u32 %v7340_v52, 16  ;;  %v7304_v36 = vld [vmem:[%s9531_s16 + $0xb4] sm:$0xf] }
 0x232   : > { %v6238_v56 = vsel %vm9628_vm12, %v6230_v34, %v6237_v48  ;;  %v6454_v9 = vsel %vm9634_vm13, %v6239_v51, %v7287_v63  ;;  %v6283_v29 = vshrl.u32 %v7343_v0, 16  ;;  %v6286_v5 = vshll.u32 %v7343_v0, 16 }
 0x233   : > { %v6280_v11 = vor.u32 %v6278_v62, %v6277_v53  ;;  %7286 = vst [vmem:[%s9531_s16 + $0x88] sm:$0xf] %v6238_v56  ;;  %7288 = vst [vmem:[%s9531_s16 + $0x8c] sm:$0x1] %v6454_v9  ;;  %v5893_v7 = vmax.f32 %v5861_v28, 0.0  ;;  %v5898_v50 = vmax.f32 %v5866_v41, 0.0  ;;  %v5864_v10 = vadd.f32 %v8041_v45, %v9610_v60 }
 0x234   : > { %v6260_v13 = vrot.slane %v6258_v35, 7  ;;  %v6285_v14 = vrot.slane %v6283_v29, 7  ;;  %v8042_v38 = vadd.f32 %v9844_v16, %v9842_v44  ;;  %v8043_v49 = vadd.f32 %v9849_v2, %v9847_v1  ;;  %v7307_v35 = vld [vmem:[%s9531_s16 + $0xbc] sm:$0x1] }
 0x235   : > { %v6471_v6 = vsel %vm9619_vm11, %v6280_v11, %v7299_v43  ;;  %v7341_v18 = vpack.c.bf16 %v5893_v7, %v5893_v7  ;;  %v7346_v12 = vpack.c.bf16 %v5898_v50, %v5898_v50  ;;  %v5896_v15 = vmax.f32 %v5864_v10, 0.0  ;;  %v7312_v11 = vld [vmem:[%s9531_s16 + $0xc8] sm:$0x1] }
 0x236   : > { %7300 = vst [vmem:[%s9531_s16 + $0xa8] sm:$0xf] %v6471_v6  ;;  %v6281_v22 = vrot.slane %v6277_v53, 4  ;;  %v6263_v24 = vor.u32 %v6261_v55, %v6260_v13  ;;  %v6288_v25 = vor.u32 %v6286_v5, %v6285_v14  ;;  %v6290_v19 = vrot.slane %v6285_v14, 4 }
 0x237   : > { %v6266_v26 = vshrl.u32 %v7341_v18, 16  ;;  %v6269_v20 = vshll.u32 %v7341_v18, 16  ;;  %v6309_v44 = vshrl.u32 %v7346_v12, 16  ;;  %v6312_v16 = vshll.u32 %v7346_v12, 16 }
 0x238   : > { %v6464_v1 = vsel %vm9619_vm11, %v6263_v24, %v7294_v47  ;;  %v6289_v2 = vsel %vm9628_vm12, %v6281_v22, %v6288_v25  ;;  %v6475_v32 = vsel %vm9634_vm13, %v6290_v19, %v7302_v58  ;;  %v7344_v34 = vpack.c.bf16 %v5896_v15, %v5896_v15 }
 0x239   : > { %7295 = vst [vmem:[%s9531_s16 + $0x9c] sm:$0xf] %v6464_v1  ;;  %7301 = vst [vmem:[%s9531_s16 + $0xac] sm:$0xf] %v6289_v2  ;;  %v6268_v40 = vrot.slane %v6266_v26, 7  ;;  %v6311_v27 = vrot.slane %v6309_v44, 7  ;;  %v5867_v31 = vadd.f32 %v8042_v38, %v9610_v60  ;;  %v5865_v17 = vadd.f32 %v8043_v49, %v9610_v60 }
 0x23a   : > { %7303 = vst [vmem:[%s9531_s16 + $0xb0] sm:$0x1] %v6475_v32  ;;  %v6292_v33 = vshrl.u32 %v7344_v34, 16  ;;  %v6264_v54 = vrot.slane %v6260_v13, 4  ;;  %v6295_v61 = vshll.u32 %v7344_v34, 16 }
 0x23b   : > { %v6271_v59 = vor.u32 %v6269_v20, %v6268_v40  ;;  %v6273_v3 = vrot.slane %v6268_v40, 4  ;;  %v6314_v46 = vor.u32 %v6312_v16, %v6311_v27  ;;  %v5899_v62 = vmax.f32 %v5867_v31, 0.0 }
 0x23c   : > { %v6294_v57 = vrot.slane %v6292_v33, 7  ;;  %v5897_v63 = vmax.f32 %v5865_v17, 0.0  ;;  %v6315_v56 = vrot.slane %v6311_v27, 4 }
 0x23d   : > { %v6272_v42 = vsel %vm9628_vm12, %v6264_v54, %v6271_v59  ;;  %v6468_v60 = vsel %vm9634_vm13, %v6273_v3, %v7297_v21  ;;  %v6485_v30 = vsel %vm9619_vm11, %v6314_v46, %v7309_v4  ;;  %v7347_v48 = vpack.c.bf16 %v5899_v62, %v5899_v62 }
 0x23e   : > { %7296 = vst [vmem:[%s9531_s16 + $0xa0] sm:$0xf] %v6272_v42  ;;  %7298 = vst [vmem:[%s9531_s16 + $0xa4] sm:$0x1] %v6468_v60  ;;  %v6297_v8 = vor.u32 %v6295_v61, %v6294_v57  ;;  %v7345_v51 = vpack.c.bf16 %v5897_v63, %v5897_v63  ;;  %v6298_v9 = vrot.slane %v6294_v57, 4 }
 0x23f   : > { %7310 = vst [vmem:[%s9531_s16 + $0xc0] sm:$0xf] %v6485_v30  ;;  %v6317_v45 = vshrl.u32 %v7347_v48, 16  ;;  %v6320_v0 = vshll.u32 %v7347_v48, 16 }
 0x240   : > { %v6478_v53 = vsel %vm9619_vm11, %v6297_v8, %v7304_v36  ;;  %v6300_v43 = vshrl.u32 %v7345_v51, 16  ;;  %v6303_v41 = vshll.u32 %v7345_v51, 16 }
 0x241   : > { %7305 = vst [vmem:[%s9531_s16 + $0xb4] sm:$0xf] %v6478_v53  ;;  %v6319_v52 = vrot.slane %v6317_v45, 7 }
 0x242   : > { %v6302_v28 = vrot.slane %v6300_v43, 7 }
 0x243   : > { %v6322_v55 = vor.u32 %v6320_v0, %v6319_v52  ;;  %v6324_v29 = vrot.slane %v6319_v52, 4 }
 0x244   : > { %v6305_v5 = vor.u32 %v6303_v41, %v6302_v28  ;;  %v6307_v23 = vrot.slane %v6302_v28, 4 }
 0x245   : > { %v6323_v6 = vsel %vm9628_vm12, %v6315_v56, %v6322_v55  ;;  %v6489_v7 = vsel %vm9634_vm13, %v6324_v29, %v7312_v11 }
 0x246   : > { %v6306_v50 = vsel %vm9628_vm12, %v6298_v9, %v6305_v5  ;;  %v6482_v10 = vsel %vm9634_vm13, %v6307_v23, %v7307_v35  ;;  %7311 = vst [vmem:[%s9531_s16 + $0xc4] sm:$0xf] %v6323_v6  ;;  %7313 = vst [vmem:[%s9531_s16 + $0xc8] sm:$0x1] %v6489_v7 }
 0x247   : > { %7306 = vst [vmem:[%s9531_s16 + $0xb8] sm:$0xf] %v6306_v50  ;;  %7308 = vst [vmem:[%s9531_s16 + $0xbc] sm:$0x1] %v6482_v10 }
 0x248 PF: > { %s13_s12 = sadd.s32 1, %s8412_s12  }
 0x249   : > { %p10_p4 = scmp.ge.s32.totalorder %s13_s12, 4  }
 0x24b   :  { %12 = sbr.rel (!%p10_p4) target bundleno = 1 (0x1), region = 73 }

</bundles_post_ra>
